<compile_context>
chip_gen: v7x
topology: tpu7x:2x2x1
jax: 0.10.0
libtpu: 0.0.40
codegen_flags: <defaults>
</compile_context>

<pallas_src>
import jax
import jax.numpy as jnp
from jax.experimental import pallas as pl
from jax.experimental.pallas import tpu as pltpu


# ----------------------------- device tuning --------------------------------

def _device_tuning():
    """(lane_tile_pref, min_grid_steps, vmem_limit_bytes) per TPU generation.

    Defensive: any detection failure falls back to safe single-TC settings."""
    kind = ""
    try:
        kind = jax.devices()[0].device_kind.lower()
    except Exception:
        pass
    if "v7" in kind or "7x" in kind:
        # 2 TensorCores, 64 MiB VMEM: modest tiles, want >= 2 grid steps.
        return 512, 2, 32 * 1024 * 1024
    # v5e / v6e: single TC, 128 MiB VMEM -> bigger lane tiles, fewer steps.
    return 1024, 1, 64 * 1024 * 1024


def _compiler_params(vmem_limit):
    return pltpu.CompilerParams(
        dimension_semantics=("parallel",),
        vmem_limit_bytes=vmem_limit,
    )


def _pick_tile(size, pref, align, want_steps=1):
    """Largest tile <= pref that is a multiple of `align` and divides `size`
    (full extent if size <= pref).  When want_steps > 1 (v7x megacore) the
    preference is capped so the grid has >= want_steps blocks."""
    if want_steps > 1 and size >= 2 * align:
        cap = max(align, (size // want_steps) // align * align)
        pref = min(pref, cap)
    if size <= pref:
        return size
    t = (pref // align) * align
    while t >= align:
        if size % t == 0:
            return t
        t -= align
    # ragged fallback: pl.cdiv grid + Pallas-masked edge block
    return max(align, (pref // align) * align)


# ----------------------------- Pallas kernels -------------------------------

def _conv_pool_kernel(w_ref, b_ref, p00_ref, p01_ref, p10_ref, p11_ref, o_ref):
    """Fused conv-as-matmul + bias + ReLU + 2x2/stride-2 max-pool.

    o[Cout, tn] = max_d relu(W[Cout, K] @ P_d[K, tn] + b[Cout, 1]),
    one phase matrix P_d per pooling offset d = (di, dj)."""
    def branch(p_ref):
        acc = jnp.dot(w_ref[...], p_ref[...], preferred_element_type=jnp.float32)
        return jnp.maximum(acc + b_ref[...], 0.0)       # bias bcast along lanes

    o = jnp.maximum(jnp.maximum(branch(p00_ref), branch(p01_ref)),
                    jnp.maximum(branch(p10_ref), branch(p11_ref)))
    o_ref[...] = o.astype(o_ref.dtype)                   # bf16 store (half traffic)


def _fc_fused_t_kernel(f_ref, w1_ref, b1_ref, w2_ref, b2_ref, o_ref):
    """Transposed fc1 + ReLU + fc2 + log_softmax, batch on the lane axis.

    f: (800, tb) bf16, w1: (500, 800) bf16, w2: (10, 500) bf16, biases f32.
    out: (10, tb) f32, log_softmax along the class (sublane) axis."""
    h = jnp.dot(w1_ref[...], f_ref[...], preferred_element_type=jnp.float32)
    h = jnp.maximum(h + b1_ref[...], 0.0)
    logits = jnp.dot(w2_ref[...], h.astype(w2_ref.dtype),
                     preferred_element_type=jnp.float32)
    logits = logits + b2_ref[...]
    m = jnp.max(logits, axis=0, keepdims=True)
    s = logits - m
    lse = jnp.log(jnp.sum(jnp.exp(s), axis=0, keepdims=True))
    o_ref[...] = s - lse


# ----------------------------- kernel wrappers -------------------------------

def conv_relu_pool(phases, w, b, *, lane_pref, want_steps, vmem_limit):
    """phases: 4 x (K, N) bf16; w: (Cout, K) bf16; b: (Cout, 1) f32.
    Returns pooled activations (Cout, N) bf16, N = number of pooled positions."""
    Cout, K = w.shape
    Kp, N = phases[0].shape
    assert K == Kp
    tn = _pick_tile(N, lane_pref, 128, want_steps)
    return pl.pallas_call(
        _conv_pool_kernel,
        grid=(pl.cdiv(N, tn),),
        out_shape=jax.ShapeDtypeStruct((Cout, N), jnp.bfloat16),
        in_specs=[pl.BlockSpec((Cout, K), lambda m: (0, 0)),
                  pl.BlockSpec((Cout, 1), lambda m: (0, 0))]
                 + [pl.BlockSpec((K, tn), lambda m: (0, m))] * 4,
        out_specs=pl.BlockSpec((Cout, tn), lambda m: (0, m)),
        compiler_params=_compiler_params(vmem_limit),
    )(w, b, *phases)


def fc_fused_t(feats, w1, b1, w2, b2, *, lane_pref, want_steps, vmem_limit):
    """log_softmax(W2 @ relu(W1 @ feats + b1) + b2) with batch on lanes.

    feats: (800, B) bf16 -> (10, B) f32 log-probabilities."""
    K1, B = feats.shape
    H = w1.shape[0]
    C = w2.shape[0]
    tb = _pick_tile(B, lane_pref, 128, want_steps)
    return pl.pallas_call(
        _fc_fused_t_kernel,
        grid=(pl.cdiv(B, tb),),
        out_shape=jax.ShapeDtypeStruct((C, B), jnp.float32),
        in_specs=[pl.BlockSpec((K1, tb), lambda m: (0, m)),
                  pl.BlockSpec((H, K1), lambda m: (0, 0)),
                  pl.BlockSpec((H, 1), lambda m: (0, 0)),
                  pl.BlockSpec((C, H), lambda m: (0, 0)),
                  pl.BlockSpec((C, 1), lambda m: (0, 0))],
        out_specs=pl.BlockSpec((C, tb), lambda m: (0, m)),
        compiler_params=_compiler_params(vmem_limit),
    )(feats, w1, b1, w2, b2)


# -------------------------------- XLA glue -----------------------------------

def im2col_pooled(a, kh, kw, col_order):
    """(Cin, B, H, W) -> 4 phase-shifted, pooled im2col matrices (bf16).

    Phase d=(di,dj) column holds the conv-input window for conv-output
    position (2*oh+di, 2*ow+dj), so max_d relu(W @ P_d + b) IS the pooled
    conv+ReLU output.  Row order (ci, i, j) matches w.reshape(Cout, Cin*kh*kw).
    col_order: "bhw" -> columns indexed (b, oh, ow); "hwb" -> (oh, ow, b)."""
    Cin, B, H, W = a.shape
    OH, OW = H - kh + 1, W - kw + 1
    Ho, Wo = OH // 2, OW // 2
    mats = []
    for di in (0, 1):
        for dj in (0, 1):
            wins = [a[:, :, di + i: di + i + 2 * Ho: 2, dj + j: dj + j + 2 * Wo: 2]
                    for i in range(kh) for j in range(kw)]
            p = jnp.stack(wins, axis=1)                 # (Cin, kh*kw, B, Ho, Wo)
            if col_order == "hwb":
                p = p.transpose(0, 1, 3, 4, 2)          # (Cin, kh*kw, Ho, Wo, B)
            mats.append(p.reshape(Cin * kh * kw, -1).astype(jnp.bfloat16))
    return mats, Ho, Wo


# --------------------------------- network -----------------------------------

def net_forward(prep, x):
    """x: (B, 1, 28, 28) NCHW f32 -> (B, 10) log-probabilities."""
    lane_pref, want_steps, vmem_limit = _device_tuning()
    tune = dict(lane_pref=lane_pref, want_steps=want_steps, vmem_limit=vmem_limit)
    B = x.shape[0]

    # conv1 (1 -> 20, 5x5) + ReLU + 2x2 max-pool, fused.  Columns (b, oh, ow).
    p1, H1, W1 = im2col_pooled(x.transpose(1, 0, 2, 3), 5, 5, "bhw")  # 4x(25, B*144)
    a1 = conv_relu_pool(p1, prep["w1"], prep["b1"], **tune)           # (20, B*144) bf16
    a1 = a1.reshape(20, B, H1, W1)                                    # (20, B, 12, 12)

    # conv2 (20 -> 50, 5x5) + ReLU + 2x2 max-pool, fused.  Columns (oh, ow, b)
    # so the pooled output reshapes directly into PyTorch (c, h, w) features.
    p2, H2, W2 = im2col_pooled(a1, 5, 5, "hwb")                       # 4x(500, 16*B)
    a2 = conv_relu_pool(p2, prep["w2"], prep["b2"], **tune)           # (50, 16*B) bf16
    feats = a2.reshape(50 * H2 * W2, B)                               # (800, B) bf16

    # fc1 + ReLU + fc2 + log_softmax, transposed (batch on lanes, lane-dense).
    out_t = fc_fused_t(feats, prep["fc1_w"], prep["fc1_b"],
                       prep["fc2_w"], prep["fc2_b"], **tune)          # (10, B) f32
    return out_t.T                                                    # (B, 10)


def init_params(key):
    """Deterministic PyTorch-style uniform(-1/sqrt(fan_in), 1/sqrt(fan_in)) init."""
    keys = jax.random.split(key, 8)

    def u(k, shape, fan_in):
        bound = 1.0 / jnp.sqrt(float(fan_in))
        return jax.random.uniform(k, shape, jnp.float32, -bound, bound)

    return {
        "conv1_w": u(keys[0], (20, 1, 5, 5), 1 * 5 * 5),
        "conv1_b": u(keys[1], (20,), 1 * 5 * 5),
        "conv2_w": u(keys[2], (50, 20, 5, 5), 20 * 5 * 5),
        "conv2_b": u(keys[3], (50,), 20 * 5 * 5),
        "fc1_w": u(keys[4], (500, 800), 800),
        "fc1_b": u(keys[5], (500,), 800),
        "fc2_w": u(keys[6], (10, 500), 500),
        "fc2_b": u(keys[7], (10,), 500),
    }


def prepare_params(params):
    """One-time weight layout/dtype prep, done OUTSIDE the jitted forward.
    Transposed fc kernels use PyTorch Linear weights (out, in) as-is."""
    return {
        "w1": params["conv1_w"].reshape(20, -1).astype(jnp.bfloat16),   # (20, 25)
        "b1": params["conv1_b"].reshape(-1, 1).astype(jnp.float32),     # (20, 1)
        "w2": params["conv2_w"].reshape(50, -1).astype(jnp.bfloat16),   # (50, 500)
        "b2": params["conv2_b"].reshape(-1, 1).astype(jnp.float32),     # (50, 1)
        "fc1_w": params["fc1_w"].astype(jnp.bfloat16),                  # (500, 800)
        "fc1_b": params["fc1_b"].reshape(-1, 1).astype(jnp.float32),    # (500, 1)
        "fc2_w": params["fc2_w"].astype(jnp.bfloat16),                  # (10, 500)
        "fc2_b": params["fc2_b"].reshape(-1, 1).astype(jnp.float32),    # (10, 1)
    }


if __name__ == "__main__":
    key = jax.random.PRNGKey(0)
    pkey, xkey = jax.random.split(key)
    params = init_params(pkey)
    prep = prepare_params(params)                 # layout prep outside jit

    # MNIST-shaped input implied by fc1's 4*4*50 flatten: (B, 1, 28, 28)
    x = jax.random.normal(xkey, (2, 1, 28, 28), jnp.float32)

    out = jax.jit(net_forward)(prep, x)
    out = jax.block_until_ready(out)

    assert out.shape == (2, 10), out.shape
    # log_softmax sanity: rows exponentiate-sum to 1
    assert bool(jnp.all(jnp.abs(jnp.sum(jnp.exp(out), axis=1) - 1.0) < 1e-3))
    print("KERNEL_OK")
</pallas_src>

<mosaic_0001>
module attributes {stable_mosaic.version = 11 : i64} {
  func.func @_conv_pool_kernel(%arg0: i32, %arg1: memref<20x25xbf16, #tpu.memory_space<vmem>>, %arg2: memref<20x1xf32, #tpu.memory_space<vmem>>, %arg3: memref<25x288xbf16, #tpu.memory_space<vmem>>, %arg4: memref<25x288xbf16, #tpu.memory_space<vmem>>, %arg5: memref<25x288xbf16, #tpu.memory_space<vmem>>, %arg6: memref<25x288xbf16, #tpu.memory_space<vmem>>, %arg7: memref<20x288xbf16, #tpu.memory_space<vmem>>) attributes {dimension_semantics = [#tpu.dimension_semantics<parallel>], iteration_bounds = array<i64: 1>, scalar_prefetch = 0 : i64, scratch_operands = 0 : i64, tpu.core_type = #tpu.core_type<tc>, window_params = [{pipeline_mode = #tpu.pipeline_mode<synchronous>, transform_indices = @transform_0, window_bounds = array<i64: 20, 25>}, {pipeline_mode = #tpu.pipeline_mode<synchronous>, transform_indices = @transform_1, window_bounds = array<i64: 20, 1>}, {transform_indices = @transform_2, window_bounds = array<i64: 25, 288>}, {transform_indices = @transform_3, window_bounds = array<i64: 25, 288>}, {transform_indices = @transform_4, window_bounds = array<i64: 25, 288>}, {transform_indices = @transform_5, window_bounds = array<i64: 25, 288>}, {transform_indices = @transform_6, window_bounds = array<i64: 20, 288>}]} {
    %c0 = arith.constant 0 : index
    %c0_0 = arith.constant 0 : index
    %0 = vector.load %arg1[%c0, %c0_0] : memref<20x25xbf16, #tpu.memory_space<vmem>>, vector<20x25xbf16>
    %c0_1 = arith.constant 0 : index
    %c0_2 = arith.constant 0 : index
    %1 = vector.load %arg3[%c0_1, %c0_2] : memref<25x288xbf16, #tpu.memory_space<vmem>>, vector<25x288xbf16>
    %cst = arith.constant dense<0.000000e+00> : vector<20x288xf32>
    %2 = tpu.matmul %0, %1, %cst {dimension_numbers = #tpu.dot_dimension_numbers<[1], [0], [0], [1], [0, 0, 1, 1], [], []>} : vector<20x25xbf16>, vector<25x288xbf16>, vector<20x288xf32> -> vector<20x288xf32>
    %c0_3 = arith.constant 0 : index
    %c0_4 = arith.constant 0 : index
    %3 = vector.load %arg2[%c0_3, %c0_4] : memref<20x1xf32, #tpu.memory_space<vmem>>, vector<20x1xf32>
    %4 = vector.broadcast %3 : vector<20x1xf32> to vector<20x288xf32>
    %5 = arith.addf %2, %4 : vector<20x288xf32>
    %cst_5 = arith.constant 0.000000e+00 : f32
    %6 = vector.broadcast %cst_5 : f32 to vector<20x288xf32>
    %7 = arith.maximumf %5, %6 : vector<20x288xf32>
    %c0_6 = arith.constant 0 : index
    %c0_7 = arith.constant 0 : index
    %8 = vector.load %arg1[%c0_6, %c0_7] : memref<20x25xbf16, #tpu.memory_space<vmem>>, vector<20x25xbf16>
    %c0_8 = arith.constant 0 : index
    %c0_9 = arith.constant 0 : index
    %9 = vector.load %arg4[%c0_8, %c0_9] : memref<25x288xbf16, #tpu.memory_space<vmem>>, vector<25x288xbf16>
    %cst_10 = arith.constant dense<0.000000e+00> : vector<20x288xf32>
    %10 = tpu.matmul %8, %9, %cst_10 {dimension_numbers = #tpu.dot_dimension_numbers<[1], [0], [0], [1], [0, 0, 1, 1], [], []>} : vector<20x25xbf16>, vector<25x288xbf16>, vector<20x288xf32> -> vector<20x288xf32>
    %c0_11 = arith.constant 0 : index
    %c0_12 = arith.constant 0 : index
    %11 = vector.load %arg2[%c0_11, %c0_12] : memref<20x1xf32, #tpu.memory_space<vmem>>, vector<20x1xf32>
    %12 = vector.broadcast %11 : vector<20x1xf32> to vector<20x288xf32>
    %13 = arith.addf %10, %12 : vector<20x288xf32>
    %cst_13 = arith.constant 0.000000e+00 : f32
    %14 = vector.broadcast %cst_13 : f32 to vector<20x288xf32>
    %15 = arith.maximumf %13, %14 : vector<20x288xf32>
    %16 = arith.maximumf %7, %15 : vector<20x288xf32>
    %c0_14 = arith.constant 0 : index
    %c0_15 = arith.constant 0 : index
    %17 = vector.load %arg1[%c0_14, %c0_15] : memref<20x25xbf16, #tpu.memory_space<vmem>>, vector<20x25xbf16>
    %c0_16 = arith.constant 0 : index
    %c0_17 = arith.constant 0 : index
    %18 = vector.load %arg5[%c0_16, %c0_17] : memref<25x288xbf16, #tpu.memory_space<vmem>>, vector<25x288xbf16>
    %cst_18 = arith.constant dense<0.000000e+00> : vector<20x288xf32>
    %19 = tpu.matmul %17, %18, %cst_18 {dimension_numbers = #tpu.dot_dimension_numbers<[1], [0], [0], [1], [0, 0, 1, 1], [], []>} : vector<20x25xbf16>, vector<25x288xbf16>, vector<20x288xf32> -> vector<20x288xf32>
    %c0_19 = arith.constant 0 : index
    %c0_20 = arith.constant 0 : index
    %20 = vector.load %arg2[%c0_19, %c0_20] : memref<20x1xf32, #tpu.memory_space<vmem>>, vector<20x1xf32>
    %21 = vector.broadcast %20 : vector<20x1xf32> to vector<20x288xf32>
    %22 = arith.addf %19, %21 : vector<20x288xf32>
    %cst_21 = arith.constant 0.000000e+00 : f32
    %23 = vector.broadcast %cst_21 : f32 to vector<20x288xf32>
    %24 = arith.maximumf %22, %23 : vector<20x288xf32>
    %c0_22 = arith.constant 0 : index
    %c0_23 = arith.constant 0 : index
    %25 = vector.load %arg1[%c0_22, %c0_23] : memref<20x25xbf16, #tpu.memory_space<vmem>>, vector<20x25xbf16>
    %c0_24 = arith.constant 0 : index
    %c0_25 = arith.constant 0 : index
    %26 = vector.load %arg6[%c0_24, %c0_25] : memref<25x288xbf16, #tpu.memory_space<vmem>>, vector<25x288xbf16>
    %cst_26 = arith.constant dense<0.000000e+00> : vector<20x288xf32>
    %27 = tpu.matmul %25, %26, %cst_26 {dimension_numbers = #tpu.dot_dimension_numbers<[1], [0], [0], [1], [0, 0, 1, 1], [], []>} : vector<20x25xbf16>, vector<25x288xbf16>, vector<20x288xf32> -> vector<20x288xf32>
    %c0_27 = arith.constant 0 : index
    %c0_28 = arith.constant 0 : index
    %28 = vector.load %arg2[%c0_27, %c0_28] : memref<20x1xf32, #tpu.memory_space<vmem>>, vector<20x1xf32>
    %29 = vector.broadcast %28 : vector<20x1xf32> to vector<20x288xf32>
    %30 = arith.addf %27, %29 : vector<20x288xf32>
    %cst_29 = arith.constant 0.000000e+00 : f32
    %31 = vector.broadcast %cst_29 : f32 to vector<20x288xf32>
    %32 = arith.maximumf %30, %31 : vector<20x288xf32>
    %33 = arith.maximumf %24, %32 : vector<20x288xf32>
    %34 = arith.maximumf %16, %33 : vector<20x288xf32>
    %35 = arith.truncf %34 : vector<20x288xf32> to vector<20x288xbf16>
    %c0_30 = arith.constant 0 : index
    %c0_31 = arith.constant 0 : index
    %36 = vector.load %arg7[%c0_30, %c0_31] : memref<20x288xbf16, #tpu.memory_space<vmem>>, vector<20x288xbf16>
    tpu.vector_store %arg7[%c0_30, %c0_31], %35 {strides = array<i32>} : memref<20x288xbf16, #tpu.memory_space<vmem>>, vector<20x288xbf16>,
    return
  }
  func.func @transform_0(%arg0: i32) -> (i32, i32) {
    %c0_i32 = arith.constant 0 : i32
    %c0_i32_0 = arith.constant 0 : i32
    %c0_i32_1 = arith.constant 0 : i32
    return %c0_i32, %c0_i32_0 : i32, i32
  }
  func.func @transform_1(%arg0: i32) -> (i32, i32) {
    %c0_i32 = arith.constant 0 : i32
    %c0_i32_0 = arith.constant 0 : i32
    %c0_i32_1 = arith.constant 0 : i32
    return %c0_i32, %c0_i32_0 : i32, i32
  }
  func.func @transform_2(%arg0: i32) -> (i32, i32) {
    %c0_i32 = arith.constant 0 : i32
    %c0_i32_0 = arith.constant 0 : i32
    return %c0_i32, %arg0 : i32, i32
  }
  func.func @transform_3(%arg0: i32) -> (i32, i32) {
    %c0_i32 = arith.constant 0 : i32
    %c0_i32_0 = arith.constant 0 : i32
    return %c0_i32, %arg0 : i32, i32
  }
  func.func @transform_4(%arg0: i32) -> (i32, i32) {
    %c0_i32 = arith.constant 0 : i32
    %c0_i32_0 = arith.constant 0 : i32
    return %c0_i32, %arg0 : i32, i32
  }
  func.func @transform_5(%arg0: i32) -> (i32, i32) {
    %c0_i32 = arith.constant 0 : i32
    %c0_i32_0 = arith.constant 0 : i32
    return %c0_i32, %arg0 : i32, i32
  }
  func.func @transform_6(%arg0: i32) -> (i32, i32) {
    %c0_i32 = arith.constant 0 : i32
    %c0_i32_0 = arith.constant 0 : i32
    return %c0_i32, %arg0 : i32, i32
  }
}

module attributes {stable_mosaic.version = 11 : i64} {
  func.func @_conv_pool_kernel(%arg0: i32, %arg1: memref<50x500xbf16, #tpu.memory_space<vmem>>, %arg2: memref<50x1xf32, #tpu.memory_space<vmem>>, %arg3: memref<500x32xbf16, #tpu.memory_space<vmem>>, %arg4: memref<500x32xbf16, #tpu.memory_space<vmem>>, %arg5: memref<500x32xbf16, #tpu.memory_space<vmem>>, %arg6: memref<500x32xbf16, #tpu.memory_space<vmem>>, %arg7: memref<50x32xbf16, #tpu.memory_space<vmem>>) attributes {dimension_semantics = [#tpu.dimension_semantics<parallel>], iteration_bounds = array<i64: 1>, scalar_prefetch = 0 : i64, scratch_operands = 0 : i64, tpu.core_type = #tpu.core_type<tc>, window_params = [{pipeline_mode = #tpu.pipeline_mode<synchronous>, transform_indices = @transform_0, window_bounds = array<i64: 50, 500>}, {pipeline_mode = #tpu.pipeline_mode<synchronous>, transform_indices = @transform_1, window_bounds = array<i64: 50, 1>}, {transform_indices = @transform_2, window_bounds = array<i64: 500, 32>}, {transform_indices = @transform_3, window_bounds = array<i64: 500, 32>}, {transform_indices = @transform_4, window_bounds = array<i64: 500, 32>}, {transform_indices = @transform_5, window_bounds = array<i64: 500, 32>}, {transform_indices = @transform_6, window_bounds = array<i64: 50, 32>}]} {
    %c0 = arith.constant 0 : index
    %c0_0 = arith.constant 0 : index
    %0 = vector.load %arg1[%c0, %c0_0] : memref<50x500xbf16, #tpu.memory_space<vmem>>, vector<50x500xbf16>
    %c0_1 = arith.constant 0 : index
    %c0_2 = arith.constant 0 : index
    %1 = vector.load %arg3[%c0_1, %c0_2] : memref<500x32xbf16, #tpu.memory_space<vmem>>, vector<500x32xbf16>
    %cst = arith.constant dense<0.000000e+00> : vector<50x32xf32>
    %2 = tpu.matmul %0, %1, %cst {dimension_numbers = #tpu.dot_dimension_numbers<[1], [0], [0], [1], [0, 0, 1, 1], [], []>} : vector<50x500xbf16>, vector<500x32xbf16>, vector<50x32xf32> -> vector<50x32xf32>
    %c0_3 = arith.constant 0 : index
    %c0_4 = arith.constant 0 : index
    %3 = vector.load %arg2[%c0_3, %c0_4] : memref<50x1xf32, #tpu.memory_space<vmem>>, vector<50x1xf32>
    %4 = vector.broadcast %3 : vector<50x1xf32> to vector<50x32xf32>
    %5 = arith.addf %2, %4 : vector<50x32xf32>
    %cst_5 = arith.constant 0.000000e+00 : f32
    %6 = vector.broadcast %cst_5 : f32 to vector<50x32xf32>
    %7 = arith.maximumf %5, %6 : vector<50x32xf32>
    %c0_6 = arith.constant 0 : index
    %c0_7 = arith.constant 0 : index
    %8 = vector.load %arg1[%c0_6, %c0_7] : memref<50x500xbf16, #tpu.memory_space<vmem>>, vector<50x500xbf16>
    %c0_8 = arith.constant 0 : index
    %c0_9 = arith.constant 0 : index
    %9 = vector.load %arg4[%c0_8, %c0_9] : memref<500x32xbf16, #tpu.memory_space<vmem>>, vector<500x32xbf16>
    %cst_10 = arith.constant dense<0.000000e+00> : vector<50x32xf32>
    %10 = tpu.matmul %8, %9, %cst_10 {dimension_numbers = #tpu.dot_dimension_numbers<[1], [0], [0], [1], [0, 0, 1, 1], [], []>} : vector<50x500xbf16>, vector<500x32xbf16>, vector<50x32xf32> -> vector<50x32xf32>
    %c0_11 = arith.constant 0 : index
    %c0_12 = arith.constant 0 : index
    %11 = vector.load %arg2[%c0_11, %c0_12] : memref<50x1xf32, #tpu.memory_space<vmem>>, vector<50x1xf32>
    %12 = vector.broadcast %11 : vector<50x1xf32> to vector<50x32xf32>
    %13 = arith.addf %10, %12 : vector<50x32xf32>
    %cst_13 = arith.constant 0.000000e+00 : f32
    %14 = vector.broadcast %cst_13 : f32 to vector<50x32xf32>
    %15 = arith.maximumf %13, %14 : vector<50x32xf32>
    %16 = arith.maximumf %7, %15 : vector<50x32xf32>
    %c0_14 = arith.constant 0 : index
    %c0_15 = arith.constant 0 : index
    %17 = vector.load %arg1[%c0_14, %c0_15] : memref<50x500xbf16, #tpu.memory_space<vmem>>, vector<50x500xbf16>
    %c0_16 = arith.constant 0 : index
    %c0_17 = arith.constant 0 : index
    %18 = vector.load %arg5[%c0_16, %c0_17] : memref<500x32xbf16, #tpu.memory_space<vmem>>, vector<500x32xbf16>
    %cst_18 = arith.constant dense<0.000000e+00> : vector<50x32xf32>
    %19 = tpu.matmul %17, %18, %cst_18 {dimension_numbers = #tpu.dot_dimension_numbers<[1], [0], [0], [1], [0, 0, 1, 1], [], []>} : vector<50x500xbf16>, vector<500x32xbf16>, vector<50x32xf32> -> vector<50x32xf32>
    %c0_19 = arith.constant 0 : index
    %c0_20 = arith.constant 0 : index
    %20 = vector.load %arg2[%c0_19, %c0_20] : memref<50x1xf32, #tpu.memory_space<vmem>>, vector<50x1xf32>
    %21 = vector.broadcast %20 : vector<50x1xf32> to vector<50x32xf32>
    %22 = arith.addf %19, %21 : vector<50x32xf32>
    %cst_21 = arith.constant 0.000000e+00 : f32
    %23 = vector.broadcast %cst_21 : f32 to vector<50x32xf32>
    %24 = arith.maximumf %22, %23 : vector<50x32xf32>
    %c0_22 = arith.constant 0 : index
    %c0_23 = arith.constant 0 : index
    %25 = vector.load %arg1[%c0_22, %c0_23] : memref<50x500xbf16, #tpu.memory_space<vmem>>, vector<50x500xbf16>
    %c0_24 = arith.constant 0 : index
    %c0_25 = arith.constant 0 : index
    %26 = vector.load %arg6[%c0_24, %c0_25] : memref<500x32xbf16, #tpu.memory_space<vmem>>, vector<500x32xbf16>
    %cst_26 = arith.constant dense<0.000000e+00> : vector<50x32xf32>
    %27 = tpu.matmul %25, %26, %cst_26 {dimension_numbers = #tpu.dot_dimension_numbers<[1], [0], [0], [1], [0, 0, 1, 1], [], []>} : vector<50x500xbf16>, vector<500x32xbf16>, vector<50x32xf32> -> vector<50x32xf32>
    %c0_27 = arith.constant 0 : index
    %c0_28 = arith.constant 0 : index
    %28 = vector.load %arg2[%c0_27, %c0_28] : memref<50x1xf32, #tpu.memory_space<vmem>>, vector<50x1xf32>
    %29 = vector.broadcast %28 : vector<50x1xf32> to vector<50x32xf32>
    %30 = arith.addf %27, %29 : vector<50x32xf32>
    %cst_29 = arith.constant 0.000000e+00 : f32
    %31 = vector.broadcast %cst_29 : f32 to vector<50x32xf32>
    %32 = arith.maximumf %30, %31 : vector<50x32xf32>
    %33 = arith.maximumf %24, %32 : vector<50x32xf32>
    %34 = arith.maximumf %16, %33 : vector<50x32xf32>
    %35 = arith.truncf %34 : vector<50x32xf32> to vector<50x32xbf16>
    %c0_30 = arith.constant 0 : index
    %c0_31 = arith.constant 0 : index
    %36 = vector.load %arg7[%c0_30, %c0_31] : memref<50x32xbf16, #tpu.memory_space<vmem>>, vector<50x32xbf16>
    tpu.vector_store %arg7[%c0_30, %c0_31], %35 {strides = array<i32>} : memref<50x32xbf16, #tpu.memory_space<vmem>>, vector<50x32xbf16>,
    return
  }
  func.func @transform_0(%arg0: i32) -> (i32, i32) {
    %c0_i32 = arith.constant 0 : i32
    %c0_i32_0 = arith.constant 0 : i32
    %c0_i32_1 = arith.constant 0 : i32
    return %c0_i32, %c0_i32_0 : i32, i32
  }
  func.func @transform_1(%arg0: i32) -> (i32, i32) {
    %c0_i32 = arith.constant 0 : i32
    %c0_i32_0 = arith.constant 0 : i32
    %c0_i32_1 = arith.constant 0 : i32
    return %c0_i32, %c0_i32_0 : i32, i32
  }
  func.func @transform_2(%arg0: i32) -> (i32, i32) {
    %c0_i32 = arith.constant 0 : i32
    %c0_i32_0 = arith.constant 0 : i32
    return %c0_i32, %arg0 : i32, i32
  }
  func.func @transform_3(%arg0: i32) -> (i32, i32) {
    %c0_i32 = arith.constant 0 : i32
    %c0_i32_0 = arith.constant 0 : i32
    return %c0_i32, %arg0 : i32, i32
  }
  func.func @transform_4(%arg0: i32) -> (i32, i32) {
    %c0_i32 = arith.constant 0 : i32
    %c0_i32_0 = arith.constant 0 : i32
    return %c0_i32, %arg0 : i32, i32
  }
  func.func @transform_5(%arg0: i32) -> (i32, i32) {
    %c0_i32 = arith.constant 0 : i32
    %c0_i32_0 = arith.constant 0 : i32
    return %c0_i32, %arg0 : i32, i32
  }
  func.func @transform_6(%arg0: i32) -> (i32, i32) {
    %c0_i32 = arith.constant 0 : i32
    %c0_i32_0 = arith.constant 0 : i32
    return %c0_i32, %arg0 : i32, i32
  }
}

module attributes {stable_mosaic.version = 11 : i64} {
  func.func @_fc_fused_t_kernel(%arg0: i32, %arg1: memref<800x2xbf16, #tpu.memory_space<vmem>>, %arg2: memref<500x800xbf16, #tpu.memory_space<vmem>>, %arg3: memref<500x1xf32, #tpu.memory_space<vmem>>, %arg4: memref<10x500xbf16, #tpu.memory_space<vmem>>, %arg5: memref<10x1xf32, #tpu.memory_space<vmem>>, %arg6: memref<10x2xf32, #tpu.memory_space<vmem>>) attributes {dimension_semantics = [#tpu.dimension_semantics<parallel>], iteration_bounds = array<i64: 1>, scalar_prefetch = 0 : i64, scratch_operands = 0 : i64, tpu.core_type = #tpu.core_type<tc>, window_params = [{transform_indices = @transform_0, window_bounds = array<i64: 800, 2>}, {pipeline_mode = #tpu.pipeline_mode<synchronous>, transform_indices = @transform_1, window_bounds = array<i64: 500, 800>}, {pipeline_mode = #tpu.pipeline_mode<synchronous>, transform_indices = @transform_2, window_bounds = array<i64: 500, 1>}, {pipeline_mode = #tpu.pipeline_mode<synchronous>, transform_indices = @transform_3, window_bounds = array<i64: 10, 500>}, {pipeline_mode = #tpu.pipeline_mode<synchronous>, transform_indices = @transform_4, window_bounds = array<i64: 10, 1>}, {transform_indices = @transform_5, window_bounds = array<i64: 10, 2>}]} {
    %c0 = arith.constant 0 : index
    %c0_0 = arith.constant 0 : index
    %0 = vector.load %arg2[%c0, %c0_0] : memref<500x800xbf16, #tpu.memory_space<vmem>>, vector<500x800xbf16>
    %c0_1 = arith.constant 0 : index
    %c0_2 = arith.constant 0 : index
    %1 = vector.load %arg1[%c0_1, %c0_2] : memref<800x2xbf16, #tpu.memory_space<vmem>>, vector<800x2xbf16>
    %cst = arith.constant dense<0.000000e+00> : vector<500x2xf32>
    %2 = tpu.matmul %0, %1, %cst {dimension_numbers = #tpu.dot_dimension_numbers<[1], [0], [0], [1], [0, 0, 1, 1], [], []>} : vector<500x800xbf16>, vector<800x2xbf16>, vector<500x2xf32> -> vector<500x2xf32>
    %c0_3 = arith.constant 0 : index
    %c0_4 = arith.constant 0 : index
    %3 = vector.load %arg3[%c0_3, %c0_4] : memref<500x1xf32, #tpu.memory_space<vmem>>, vector<500x1xf32>
    %4 = vector.broadcast %3 : vector<500x1xf32> to vector<500x2xf32>
    %5 = arith.addf %2, %4 : vector<500x2xf32>
    %cst_5 = arith.constant 0.000000e+00 : f32
    %6 = vector.broadcast %cst_5 : f32 to vector<500x2xf32>
    %7 = arith.maximumf %5, %6 : vector<500x2xf32>
    %c0_6 = arith.constant 0 : index
    %c0_7 = arith.constant 0 : index
    %8 = vector.load %arg4[%c0_6, %c0_7] : memref<10x500xbf16, #tpu.memory_space<vmem>>, vector<10x500xbf16>
    %9 = arith.truncf %7 : vector<500x2xf32> to vector<500x2xbf16>
    %cst_8 = arith.constant dense<0.000000e+00> : vector<10x2xf32>
    %10 = tpu.matmul %8, %9, %cst_8 {dimension_numbers = #tpu.dot_dimension_numbers<[1], [0], [0], [1], [0, 0, 1, 1], [], []>} : vector<10x500xbf16>, vector<500x2xbf16>, vector<10x2xf32> -> vector<10x2xf32>
    %c0_9 = arith.constant 0 : index
    %c0_10 = arith.constant 0 : index
    %11 = vector.load %arg5[%c0_9, %c0_10] : memref<10x1xf32, #tpu.memory_space<vmem>>, vector<10x1xf32>
    %12 = vector.broadcast %11 : vector<10x1xf32> to vector<10x2xf32>
    %13 = arith.addf %10, %12 : vector<10x2xf32>
    %cst_11 = arith.constant dense<0xFF800000> : vector<2xf32>
    %14 = vector.multi_reduction <maximumf>, %13, %cst_11 [0] : vector<10x2xf32> to vector<2xf32>
    %15 = vector.shape_cast %14 : vector<2xf32> to vector<1x2xf32>
    %16 = vector.broadcast %15 : vector<1x2xf32> to vector<10x2xf32>
    %17 = arith.subf %13, %16 : vector<10x2xf32>
    %18 = math.exp %17 : vector<10x2xf32>
    %cst_12 = arith.constant dense<0.000000e+00> : vector<2xf32>
    %19 = vector.multi_reduction <add>, %18, %cst_12 [0] : vector<10x2xf32> to vector<2xf32>
    %20 = vector.shape_cast %19 : vector<2xf32> to vector<1x2xf32>
    %21 = math.log %20 : vector<1x2xf32>
    %22 = vector.broadcast %21 : vector<1x2xf32> to vector<10x2xf32>
    %23 = arith.subf %17, %22 : vector<10x2xf32>
    %c0_13 = arith.constant 0 : index
    %c0_14 = arith.constant 0 : index
    %24 = vector.load %arg6[%c0_13, %c0_14] : memref<10x2xf32, #tpu.memory_space<vmem>>, vector<10x2xf32>
    tpu.vector_store %arg6[%c0_13, %c0_14], %23 {strides = array<i32>} : memref<10x2xf32, #tpu.memory_space<vmem>>, vector<10x2xf32>,
    return
  }
  func.func @transform_0(%arg0: i32) -> (i32, i32) {
    %c0_i32 = arith.constant 0 : i32
    %c0_i32_0 = arith.constant 0 : i32
    return %c0_i32, %arg0 : i32, i32
  }
  func.func @transform_1(%arg0: i32) -> (i32, i32) {
    %c0_i32 = arith.constant 0 : i32
    %c0_i32_0 = arith.constant 0 : i32
    %c0_i32_1 = arith.constant 0 : i32
    return %c0_i32, %c0_i32_0 : i32, i32
  }
  func.func @transform_2(%arg0: i32) -> (i32, i32) {
    %c0_i32 = arith.constant 0 : i32
    %c0_i32_0 = arith.constant 0 : i32
    %c0_i32_1 = arith.constant 0 : i32
    return %c0_i32, %c0_i32_0 : i32, i32
  }
  func.func @transform_3(%arg0: i32) -> (i32, i32) {
    %c0_i32 = arith.constant 0 : i32
    %c0_i32_0 = arith.constant 0 : i32
    %c0_i32_1 = arith.constant 0 : i32
    return %c0_i32, %c0_i32_0 : i32, i32
  }
  func.func @transform_4(%arg0: i32) -> (i32, i32) {
    %c0_i32 = arith.constant 0 : i32
    %c0_i32_0 = arith.constant 0 : i32
    %c0_i32_1 = arith.constant 0 : i32
    return %c0_i32, %c0_i32_0 : i32, i32
  }
  func.func @transform_5(%arg0: i32) -> (i32, i32) {
    %c0_i32 = arith.constant 0 : i32
    %c0_i32_0 = arith.constant 0 : i32
    return %c0_i32, %arg0 : i32, i32
  }
}

</mosaic_0001>

<bundles_post_ra>
// kernel: net_forward.3
= control target key start
LH: loop header
LB: loop body
LE: loop exit
PB: predicated region body
PF: predicated region fallthrough
CT: control target
= control target key end

     0   :  { %11 = vsyncpa [#allocation3], 0  ;;  %s1446_s0 = inlined_call_operand.hbm [shape: bf16[20,25], index: 0, kind: input, shape index: {}]   ;;  %s1447_s1 = inlined_call_operand.hbm [shape: f32[20,1], index: 1, kind: input, shape index: {}]   ;;  %s1448_s2 = inlined_call_operand.hbm [shape: bf16[25,288], index: 2, kind: input, shape index: {}]   ;;  %s1449_s3 = inlined_call_operand.hbm [shape: bf16[25,288], index: 3, kind: input, shape index: {}]   ;;  %s1450_s4 = inlined_call_operand.hbm [shape: bf16[25,288], index: 4, kind: input, shape index: {}]   ;;  %s1451_s5 = inlined_call_operand.hbm [shape: bf16[25,288], index: 5, kind: input, shape index: {}]   ;;  %s1452_s6 = inlined_call_operand.hbm [shape: bf16[20,288], index: 6, kind: output, shape index: {}]  }
   0x1   :  { %12 = vsyncpa [#allocation6], 0 }
   0x2   :  { %13 = vsyncpa [#allocation9], 0 }
   0x3   :  { %14 = vsyncpa [#allocation12], 0 }
   0x4   :  { %15 = vsyncpa [#allocation4], 0  ;;  %s1168_s21 = smov [#allocation5]   ;;  %s1004_s25 = scalar_lea.hbm %s1447_s1, 384 }
   0x5   :  { %s33_s22 = sshll.u32 %s1168_s21, 4  ;;  %p1005_p0 = scmp.ne.s32.totalorder %s1447_s1, %s1004_s25  ;;  %s34_s22 = int_to_ptr.vmem [resolvable:$true] %s33_s22 }
   0x6   :  { %p1008_p1 = scmp.lt.u32.totalorder %s1004_s25, %s1447_s1 }
   0x8   :  { %p1010_p2 = pnand %p1008_p1, %p1005_p0 }
   0xa   :  { %1013 = shalt.err (!%p1010_p2)
}
   0xb   :  { %s1014_s30 = scalar_lea.vmem %s34_s22, 384  ;;  %p1019_p4 = scmp.lt.s32.totalorder %s34_s22, %s34_s22 }
   0xc   :  { %p1015_p3 = scmp.ne.s32.totalorder %s34_s22, %s1014_s30  ;;  %p1020_p5 = scmp.lt.s32.totalorder %s1014_s30, %s1014_s30 }
   0xe   :  { %p1021_p6 = por %p1020_p5, %p1019_p4 }
  0x10   :  { %p1022_p7 = pnand %p1021_p6, %p1015_p3 }
  0x12   :  { %1025 = shalt.err (!%p1022_p7)
}
  0x13   :  { %s1169_s7 = smov 128   ;;  %s1170_s8 = smov 8  }
  0x14   :  { %39 = dma.hbm_to_vmem [thread:$0]  %s1447_s1, 384, %s34_s22, [#allocation6], %s1169_s7, %s1169_s7, %s1170_s8  }
  0x15   :  { %s1171_s11 = smov [#allocation8]   ;;  %s1172_s13 = smov [#allocation2]  }
  0x16   :  { %s57_s12 = sshll.u32 %s1171_s11, 4  ;;  %s21_s14 = sshll.u32 %s1172_s13, 4  ;;  %s58_s12 = int_to_ptr.vmem [resolvable:$true] %s57_s12  ;;  %s22_s14 = int_to_ptr.vmem [resolvable:$true] %s21_s14 }
  0x17   :  { %s1026_s17 = scalar_lea.hbm %s1449_s3, 768 }
  0x18   :  { %p1027_p8 = scmp.ne.s32.totalorder %s1449_s3, %s1026_s17  ;;  %p1030_p9 = scmp.lt.u32.totalorder %s1026_s17, %s1449_s3 }
  0x1a   :  { %p1032_p10 = pnand %p1030_p9, %p1027_p8 }
  0x1c   :  { %1035 = shalt.err (!%p1032_p10)
}
  0x1d   :  { %s1036_s1 = scalar_lea.vmem %s58_s12, 768  ;;  %p1041_p12 = scmp.lt.s32.totalorder %s58_s12, %s58_s12 }
  0x1e   :  { %p1037_p11 = scmp.ne.s32.totalorder %s58_s12, %s1036_s1  ;;  %p1042_p13 = scmp.lt.s32.totalorder %s1036_s1, %s1036_s1 }
  0x20   :  { %p1043_p0 = por %p1042_p13, %p1041_p12 }
  0x22   :  { %p1044_p1 = pnand %p1043_p0, %p1037_p11 }
  0x24   :  { %1047 = shalt.err (!%p1044_p1)
}
  0x25   :  { %s1173_s22 = smov 192   ;;  %s1174_s23 = smov 12  }
  0x26   :  { %63 = dma.hbm_to_vmem [thread:$0]  %s1449_s3, 768, %s58_s12, [#allocation9], %s1173_s22, %s1173_s22, %s1174_s23  }
  0x27   :  { %s1048_s28 = scalar_lea.hbm %s1446_s0, 192 }
  0x28   :  { %p1049_p2 = scmp.ne.s32.totalorder %s1446_s0, %s1048_s28  ;;  %p1052_p3 = scmp.lt.u32.totalorder %s1048_s28, %s1446_s0 }
  0x2a   :  { %p1054_p4 = pnand %p1052_p3, %p1049_p2 }
  0x2c   :  { %1057 = shalt.err (!%p1054_p4)
}
  0x2d   :  { %s1058_s9 = scalar_lea.vmem %s22_s14, 192  ;;  %p1063_p6 = scmp.lt.s32.totalorder %s22_s14, %s22_s14 }
  0x2e   :  { %p1059_p5 = scmp.ne.s32.totalorder %s22_s14, %s1058_s9  ;;  %p1064_p7 = scmp.lt.s32.totalorder %s1058_s9, %s1058_s9 }
  0x30   :  { %p1065_p8 = por %p1064_p7, %p1063_p6 }
  0x32   :  { %p1066_p9 = pnand %p1065_p8, %p1059_p5 }
  0x34   :  { %1069 = shalt.err (!%p1066_p9)
}
  0x35   :  { %s1175_s3 = smov 64   ;;  %s1176_s10 = smov 4  }
  0x36   :  { %27 = dma.hbm_to_vmem [thread:$0]  %s1446_s0, 192, %s22_s14, [#allocation3], %s1175_s3, %s1175_s3, %s1176_s10  }
  0x37   :  { %s1177_s13 = smov [#allocation7]   ;;  %s1178_s16 = smov [#allocation10]  }
  0x38   :  { %s45_s15 = sshll.u32 %s1177_s13, 4  ;;  %s69_s17 = sshll.u32 %s1178_s16, 4  ;;  %s46_s15 = int_to_ptr.vmem [resolvable:$true] %s45_s15  ;;  %s70_s17 = int_to_ptr.vmem [resolvable:$true] %s69_s17 }
  0x39   :  { %s1070_s20 = scalar_lea.hbm %s1448_s2, 768 }
  0x3a   :  { %p1071_p10 = scmp.ne.s32.totalorder %s1448_s2, %s1070_s20  ;;  %p1074_p11 = scmp.lt.u32.totalorder %s1070_s20, %s1448_s2 }
  0x3c   :  { %p1076_p12 = pnand %p1074_p11, %p1071_p10 }
  0x3e   :  { %1079 = shalt.err (!%p1076_p12)
}
  0x3f   :  { %s1080_s0 = scalar_lea.vmem %s46_s15, 768  ;;  %p1085_p0 = scmp.lt.s32.totalorder %s46_s15, %s46_s15 }
  0x40   :  { %p1081_p13 = scmp.ne.s32.totalorder %s46_s15, %s1080_s0  ;;  %p1086_p1 = scmp.lt.s32.totalorder %s1080_s0, %s1080_s0 }
  0x42   :  { %p1087_p2 = por %p1086_p1, %p1085_p0 }
  0x44   :  { %p1088_p3 = pnand %p1087_p2, %p1081_p13 }
  0x46   :  { %1091 = shalt.err (!%p1088_p3)
}
  0x47   :  { %51 = dma.hbm_to_vmem [thread:$0]  %s1448_s2, 768, %s46_s15, [#allocation6], %s1173_s22, %s1173_s22, %s1174_s23  }
  0x48   :  { %s1092_s29 = scalar_lea.hbm %s1450_s4, 768 }
  0x49   :  { %p1093_p4 = scmp.ne.s32.totalorder %s1450_s4, %s1092_s29  ;;  %p1096_p5 = scmp.lt.u32.totalorder %s1092_s29, %s1450_s4 }
  0x4b   :  { %p1098_p6 = pnand %p1096_p5, %p1093_p4 }
  0x4d   :  { %1101 = shalt.err (!%p1098_p6)
}
  0x4e   :  { %s1102_s3 = scalar_lea.vmem %s70_s17, 768  ;;  %p1107_p8 = scmp.lt.s32.totalorder %s70_s17, %s70_s17 }
  0x4f   :  { %p1103_p7 = scmp.ne.s32.totalorder %s70_s17, %s1102_s3  ;;  %p1108_p9 = scmp.lt.s32.totalorder %s1102_s3, %s1102_s3 }
  0x51   :  { %p1109_p10 = por %p1108_p9, %p1107_p8 }
  0x53   :  { %p1110_p11 = pnand %p1109_p10, %p1103_p7 }
  0x55   :  { %1113 = shalt.err (!%p1110_p11)
}
  0x56   :  { %75 = dma.hbm_to_vmem [thread:$0]  %s1450_s4, 768, %s70_s17, [#allocation9], %s1173_s22, %s1173_s22, %s1174_s23  }
  0x57   :  { %s1179_s11 = smov [#allocation11]   ;;  %s1114_s16 = scalar_lea.hbm %s1451_s5, 768 }
  0x58   :  { %s81_s12 = sshll.u32 %s1179_s11, 4  ;;  %p1115_p12 = scmp.ne.s32.totalorder %s1451_s5, %s1114_s16  ;;  %s82_s12 = int_to_ptr.vmem [resolvable:$true] %s81_s12 }
  0x59   :  { %p1118_p13 = scmp.lt.u32.totalorder %s1114_s16, %s1451_s5 }
  0x5b   :  { %p1120_p0 = pnand %p1118_p13, %p1115_p12 }
  0x5d   :  { %1123 = shalt.err (!%p1120_p0)
}
  0x5e   :  { %s1124_s1 = scalar_lea.vmem %s82_s12, 768  ;;  %p1129_p2 = scmp.lt.s32.totalorder %s82_s12, %s82_s12 }
  0x5f   :  { %p1125_p1 = scmp.ne.s32.totalorder %s82_s12, %s1124_s1  ;;  %p1130_p3 = scmp.lt.s32.totalorder %s1124_s1, %s1124_s1 }
  0x61   :  { %p1131_p4 = por %p1130_p3, %p1129_p2 }
  0x63   :  { %p1132_p5 = pnand %p1131_p4, %p1125_p1 }
  0x65   :  { %1135 = shalt.err (!%p1132_p5)
}
  0x66   :  { %87 = dma.hbm_to_vmem [thread:$0]  %s1451_s5, 768, %s82_s12, [#allocation12], %s1173_s22, %s1173_s22, %s1174_s23  }
  0x67   :  { %1158 = dma.done.wait [#allocation3], 192  }
  0x68   :  { %1159 = vsyncadd [#allocation3], 4294967104 }
  0x69   :  { %1160 = dma.done.wait [#allocation6], 1152  }
  0x6a   :  { %1161 = vsyncadd [#allocation6], 4294966144 }
  0x6b   :  { %1162 = dma.done.wait [#allocation9], 1536  }
  0x6c   :  { %1163 = vsyncadd [#allocation9], 4294965760 }
  0x6d   :  { %1164 = dma.done.wait [#allocation12], 768  }
  0x6e   :  { %1165 = vsyncadd [#allocation12], 4294966528  ;;  %v1180_v0 = vmov 0   ;;  %vm180_vm0 = vcmask 1043456   ;;  %vm181_vm1 = vcmask 1044480   ;;  %v1181_v1 = vmov 65535  }
  0x6f   :  { %225 = vmatprep.mubr.bf16.mxu0 %v1180_v0  ;;  %968 = vset.pattern.permute.xlu0 %v1180_v0  ;;  %v182_v2 = vsel %vm180_vm0, 4294967295, %v1181_v1  ;;  %v970_v3 = vld [vmem:[#allocation7 + $0x4] ss:$12 sps:$4 sm:$0xff]   ;;  %vm173_vm2 = vcmask 203776   ;;  %v972_v4 = vld [vmem:[#allocation7 + $0x8] ss:$12 sps:$4 sm:$0xff]  }
  0x70   :  { %969 = vset.pattern.permute.xlu1 %v1180_v0  ;;  %193 = vmatprep.subr.bf16.mxu0 %v970_v3  ;;  %v973_v5 = vld [vmem:[#allocation7] ss:$12 sps:$4 sm:$0xff]   ;;  %v1305_v6 = vsel %vm181_vm1, %v182_v2, 0  ;;  %v974_v7 = vld [vmem:[#allocation7 + $0x1c] ss:$12 sps:$4 sm:$0x1f]  }
  0x71   :  { %921 = vmatprep.subr.bf16.mxu1 %v972_v4  ;;  %v1307_v8 = vld [vmem:[#allocation2] sm:$0xff]   ;;  %194 = vmatpush1.bf16.msra.mxu0 %v973_v5  ;;  %v188_v10 = vand.u32 %v974_v7, %v1305_v6  ;;  %v977_v11 = vld [vmem:[#allocation7 + $0x18] ss:$12 sps:$4 sm:$0x1f]   ;;  %v988_v24 = vld [vmem:[#allocation10 + $0x8] ss:$12 sps:$4 sm:$0xff]  }
  0x72   :  { %922 = vmatpush3.bf16.msra.mxu1 %v972_v4  ;;  %v976_v9 = vld [vmem:[#allocation7 + $0x20] ss:$12 sps:$4 sm:$0x1f]   ;;  %925 = vmatprep.mubr.msk.bf16.mxu1 %vm173_vm2, %v1307_v8  ;;  %v185_v13 = vand.u32 %v977_v11, %v1305_v6  ;;  %v1314_v14 = vld [vmem:[#allocation2 + $0x8] ss:$0 sps:$4 sm:$0x33]  }
  0x73   :  { %v191_v12 = vand.u32 %v976_v9, %v1305_v6  ;;  %195 = vmatprep.subr.bf16.mxu0 %v188_v10  ;;  %v980_v15 = vld [vmem:[#allocation8] ss:$12 sps:$4 sm:$0xff]   ;;  %v982_v16 = vld [vmem:[#allocation8 + $0x4] ss:$12 sps:$4 sm:$0xff]   ;;  %v983_v17 = vld [vmem:[#allocation8 + $0x8] ss:$12 sps:$4 sm:$0xff]  }
  0x74   :  { %v984_v18 = vld [vmem:[#allocation8 + $0x18] ss:$12 sps:$4 sm:$0x1f]   ;;  %v986_v19 = vld [vmem:[#allocation8 + $0x1c] ss:$12 sps:$4 sm:$0x1f]  }
  0x75   :  { %923 = vmatprep.subr.bf16.mxu1 %v191_v12  ;;  %196 = vmatpush1.bf16.msra.mxu0 %v185_v13  ;;  %v987_v20 = vld [vmem:[#allocation8 + $0x20] ss:$12 sps:$4 sm:$0x1f]   ;;  %v342_v21 = vand.u32 %v986_v19, %v1305_v6  ;;  %v339_v22 = vand.u32 %v984_v18, %v1305_v6  ;;  %v992_v26 = vld [vmem:[#allocation10 + $0x20] ss:$12 sps:$4 sm:$0x1f]  }
  0x76   :  { %924 = vmatpush3.bf16.msra.mxu1 %v191_v12  ;;  %929 = vmatprep.subr.bf16.mxu0 %v983_v17  ;;  %v345_v23 = vand.u32 %v987_v20, %v1305_v6  ;;  %v991_v25 = vld [vmem:[#allocation10 + $0x4] ss:$12 sps:$4 sm:$0xff]   ;;  %v508_v27 = vand.u32 %v992_v26, %v1305_v6  ;;  %v118_v28 = vld [vmem:[#allocation5] sm:$0xff]  ;;  %v120_v29 = vld [vmem:[#allocation5 + $0x10] sm:$0xf]  ;;  %vm829_vm3 = vcmask 254976  }
  0x77   :  { %347 = vmatprep.subr.bf16.mxu1 %v982_v16  ;;  %v995_v30 = vld [vmem:[#allocation10 + $0x1c] ss:$12 sps:$4 sm:$0x1f]   ;;  %v998_v31 = vld [vmem:[#allocation11 + $0x4] ss:$12 sps:$4 sm:$0xff]   ;;  %123 = vperm.xlu0 %968, %v118_v28   ;;  %vm824_vm4 = vcmask 257024  }
  0x78   :  { %859 = vmatmul.mubr.msk.bf16.vlgmr.msra.gmra.mrb[0].mxu0 %vm173_vm2, %v1307_v8  ;;  %133 = vperm.xlu1 %969, %v120_v29   ;;  %v119_v32 = vld [vmem:[#allocation5 + $0x8] sm:$0xff]  ;;  %v989_v33 = vld [vmem:[#allocation10] ss:$12 sps:$4 sm:$0xff]   ;;  %v993_v34 = vld [vmem:[#allocation10 + $0x18] ss:$12 sps:$4 sm:$0x1f]   ;;  %v505_v35 = vand.u32 %v995_v30, %v1305_v6 }
  0x79   :  { %926 = vmatmul.mubr.msk.bf16.vlgmr.msra.gmra.mrb[0].mxu1 %vm173_vm2, %v1314_v14  ;;  %930 = vmatpush3.bf16.msra.mxu0 %v983_v17  ;;  %v502_v36 = vand.u32 %v993_v34, %v1305_v6  ;;  %v999_v37 = vld [vmem:[#allocation11 + $0x8] ss:$12 sps:$4 sm:$0xff]   ;;  %v1003_v39 = vld [vmem:[#allocation11 + $0x20] ss:$12 sps:$4 sm:$0x1f]   ;;  %s1182_s5 = smov [#allocation13]  }
  0x7a   :  { %348 = vmatpush1.bf16.msra.mxu1 %v980_v15  ;;  %235 = vmatprep.mubr.bf16.mxu0 %v1180_v0  ;;  %v1002_v38 = vld [vmem:[#allocation11 + $0x1c] ss:$12 sps:$4 sm:$0x1f]   ;;  %v996_v40 = vld [vmem:[#allocation11] ss:$12 sps:$4 sm:$0xff]   ;;  %v662_v43 = vand.u32 %v1003_v39, %v1305_v6  ;;  %s836_s24 = sshll.u32 %s1182_s5, 4  ;;  %s837_s24 = int_to_ptr.vmem [resolvable:$true] %s836_s24 }
  0x7b   :  { %349 = vmatprep.subr.bf16.mxu1 %v342_v21  ;;  %379 = vmatprep.mubr.bf16.mxu1 %v1180_v0  ;;  %v1000_v41 = vld [vmem:[#allocation11 + $0x18] ss:$12 sps:$4 sm:$0x1f]   ;;  %v659_v42 = vand.u32 %v1002_v38, %v1305_v6  ;;  %s1136_s25 = scalar_lea.vmem %s837_s24, 576  ;;  %p1141_p7 = scmp.lt.s32.totalorder %s837_s24, %s837_s24 }
  0x7c   :  { %931 = vmatprep.subr.bf16.mxu0 %v345_v23  ;;  %128 = vperm.xlu0 %968, %v119_v32   ;;  %v656_v44 = vand.u32 %v1000_v41, %v1305_v6  ;;  %p1137_p6 = scmp.ne.s32.totalorder %s837_s24, %s1136_s25  ;;  %p1142_p8 = scmp.lt.s32.totalorder %s1136_s25, %s1136_s25 }
  0x7d   :  { %932 = vmatpush3.bf16.msra.mxu0 %v345_v23 }
  0x7e   :  { %350 = vmatpush1.bf16.msra.mxu1 %v339_v22  ;;  %510 = vmatprep.subr.bf16.mxu0 %v991_v25  ;;  %p1143_p9 = por %p1142_p8, %p1141_p7 }
  0x7f   :  { %937 = vmatprep.subr.bf16.mxu1 %v988_v24 }
  0x80   :  { %860 = vmatmul.mubr.msk.bf16.gmra.mrb[4].mxu0 %vm173_vm2, %v1314_v14  ;;  %p1144_p10 = pnand %p1143_p9, %p1137_p6 }
  0x81   :  { %869 = vmatmul.mubr.msk.bf16.vlgmr.msra.gmra.mrb[4].mxu1 %vm173_vm2, %v1307_v8  ;;  %933 = vmatprep.mubr.msk.bf16.mxu0 %vm173_vm2, %v1307_v8 }
  0x82   :  { %938 = vmatpush3.bf16.msra.mxu1 %v988_v24  ;;  %389 = vmatprep.mubr.bf16.mxu1 %v1180_v0 }
  0x83   :  { %939 = vmatprep.subr.bf16.mxu1 %v508_v27 }
  0x86   :  { %940 = vmatpush3.bf16.msra.mxu1 %v508_v27 }
  0x87   :  { %664 = vmatprep.subr.bf16.mxu1 %v998_v31 }
  0x88   :  { %934 = vmatmul.mubr.msk.bf16.vlgmr.msra.gmra.mrb[8].mxu0 %vm173_vm2, %v1314_v14 }
  0x89   :  { %870 = vmatmul.mubr.msk.bf16.gmra.mrb[8].mxu1 %vm173_vm2, %v1314_v14  ;;  %511 = vmatpush1.bf16.msra.mxu0 %v989_v33 }
  0x8a   :  { %542 = vmatprep.mubr.bf16.mxu0 %v1180_v0  ;;  %512 = vmatprep.subr.bf16.mxu0 %v505_v35 }
  0x8b   :  { %941 = vmatprep.mubr.msk.bf16.mxu1 %vm173_vm2, %v1307_v8 }
  0x8d   :  { %513 = vmatpush1.bf16.msra.mxu0 %v502_v36 }
  0x8e   :  { %945 = vmatprep.subr.bf16.mxu0 %v999_v37 }
  0x90   :  { %879 = vmatmul.mubr.msk.bf16.vlgmr.msra.gmra.mrb[12].mxu0 %vm173_vm2, %v1307_v8 }
  0x91   :  { %942 = vmatmul.mubr.msk.bf16.vlgmr.msra.gmra.mrb[12].mxu1 %vm173_vm2, %v1314_v14  ;;  %946 = vmatpush3.bf16.msra.mxu0 %v999_v37 }
  0x92   :  { %665 = vmatpush1.bf16.msra.mxu1 %v996_v40  ;;  %552 = vmatprep.mubr.bf16.mxu0 %v1180_v0 }
  0x93   :  { %666 = vmatprep.subr.bf16.mxu1 %v659_v42  ;;  %696 = vmatprep.mubr.bf16.mxu1 %v1180_v0 }
  0x94   :  { %947 = vmatprep.subr.bf16.mxu0 %v662_v43 }
  0x95   :  { %948 = vmatpush3.bf16.msra.mxu0 %v662_v43 }
  0x96   :  { %667 = vmatpush1.bf16.msra.mxu1 %v656_v44 }
  0x98   :  { %880 = vmatmul.mubr.msk.bf16.gmra.mrb[16].mxu0 %vm173_vm2, %v1314_v14 }
  0x99   :  { %889 = vmatmul.mubr.msk.bf16.vlgmr.msra.gmra.mrb[16].mxu1 %vm173_vm2, %v1307_v8  ;;  %949 = vmatprep.mubr.msk.bf16.mxu0 %vm173_vm2, %v1307_v8 }
  0x9a   :  { %706 = vmatprep.mubr.bf16.mxu1 %v1180_v0 }
  0xa0   :  { %950 = vmatmul.mubr.msk.bf16.vlgmr.msra.gmra.mrb[20].mxu0 %vm173_vm2, %v1314_v14 }
  0xa1   :  { %890 = vmatmul.mubr.msk.bf16.gmra.mrb[20].mxu1 %vm173_vm2, %v1314_v14 }
  0xf6   :  { %v1362_v45 = vpop.permute.xlu0 %123 }
  0xf7   :  { %v1367_v56 = vpop.permute.xlu1 %133 }
  0xfb   :  { %v1364_v54 = vpop.permute.xlu0 %128 }
 0x14b   :  { %v227_v46 = vpop.f32.mrb[0].mxu0 }
 0x14c   :  { %v927_v47 = vpop.f32.mrb[0].mxu1  ;;  %v229_v48 = vpop.f32.mrb[1].mxu0  ;;  %v228_v55 = vadd.f32 %v227_v46, %v1362_v45 }
 0x14d   :  { %v278_v49 = vpop.f32.mrb[1].mxu1  ;;  %v231_v50 = vpop.f32.mrb[2].mxu0  ;;  %v230_v57 = vadd.f32 %v229_v48, %v1362_v45  ;;  %v287_v18 = vadd.f32 %v927_v47, %v1367_v56 }
 0x14e   :  { %v928_v51 = vpop.f32.mrb[2].mxu1  ;;  %v233_v52 = vpop.f32.mrb[3].mxu0  ;;  %v232_v60 = vadd.f32 %v231_v50, %v1364_v54  ;;  %v292_v4 = vmax.f32 %v228_v55, 0.0  ;;  %v279_v19 = vadd.f32 %v278_v49, %v1362_v45 }
 0x14f   :  { %v281_v53 = vpop.f32.mrb[3].mxu1  ;;  %v234_v0 = vadd.f32 %v233_v52, %v1364_v54  ;;  %v293_v9 = vmax.f32 %v230_v57, 0.0  ;;  %v300_v31 = vmax.f32 %v287_v18, 0.0 }
 0x150   :  { %v295_v12 = vmax.f32 %v232_v60, 0.0  ;;  %v282_v30 = vadd.f32 %v281_v53, %v1364_v54  ;;  %v294_v36 = vmax.f32 %v279_v19, 0.0 }
 0x151   :  { %v296_v15 = vmax.f32 %v234_v0, 0.0 }
 0x152   :  { %v297_v49 = vmax.f32 %v282_v30, 0.0 }
 0x153   :  { %v237_v58 = vpop.f32.mrb[4].mxu0 }
 0x154   :  { %v381_v59 = vpop.f32.mrb[4].mxu1  ;;  %v239_v62 = vpop.f32.mrb[5].mxu0  ;;  %v238_v20 = vadd.f32 %v237_v58, %v1367_v56 }
 0x155   :  { %v382_v61 = vadd.f32 %v381_v59, %v1362_v45  ;;  %v383_v63 = vpop.f32.mrb[5].mxu1  ;;  %v241_v2 = vpop.f32.mrb[6].mxu0  ;;  %v240_v22 = vadd.f32 %v239_v62, %v1367_v56 }
 0x156   :  { %v384_v1 = vadd.f32 %v383_v63, %v1362_v45  ;;  %v385_v3 = vpop.f32.mrb[6].mxu1  ;;  %v242_v7 = vpop.f32.mrb[7].mxu0  ;;  %v298_v37 = vmax.f32 %v238_v20, 0.0 }
 0x157   :  { %v446_v5 = vmax.f32 %v382_v61, 0.0  ;;  %v386_v6 = vadd.f32 %v385_v3, %v1364_v54  ;;  %v387_v8 = vpop.f32.mrb[7].mxu1  ;;  %v299_v42 = vmax.f32 %v240_v22, 0.0 }
 0x158   :  { %v447_v10 = vmax.f32 %v384_v1, 0.0  ;;  %v388_v11 = vadd.f32 %v387_v8, %v1364_v54 }
 0x159   :  { %v1376_v13 = vmax.f32 %v292_v4, %v446_v5  ;;  %v449_v14 = vmax.f32 %v386_v6, 0.0 }
 0x15a   :  { %v1378_v16 = vmax.f32 %v293_v9, %v447_v10  ;;  %v450_v17 = vmax.f32 %v388_v11, 0.0 }
 0x15b   :  { %v1383_v21 = vmax.f32 %v295_v12, %v449_v14  ;;  %v935_v25 = vpop.f32.mrb[8].mxu0 }
 0x15c   :  { %v1386_v23 = vmax.f32 %v296_v15, %v450_v17  ;;  %v391_v24 = vpop.f32.mrb[8].mxu1  ;;  %v441_v27 = vadd.f32 %v935_v25, %v1367_v56  ;;  %v432_v29 = vpop.f32.mrb[9].mxu0 }
 0x15d   :  { %v392_v26 = vadd.f32 %v391_v24, %v1367_v56  ;;  %v393_v28 = vpop.f32.mrb[9].mxu1  ;;  %v433_v33 = vadd.f32 %v432_v29, %v1362_v45  ;;  %v936_v35 = vpop.f32.mrb[10].mxu0 }
 0x15e   :  { %v394_v32 = vadd.f32 %v393_v28, %v1367_v56  ;;  %v395_v34 = vpop.f32.mrb[10].mxu1  ;;  %v454_v39 = vmax.f32 %v441_v27, 0.0  ;;  %v435_v41 = vpop.f32.mrb[11].mxu0 }
 0x15f   :  { %v452_v38 = vmax.f32 %v392_v26, 0.0  ;;  %v396_v40 = vpop.f32.mrb[11].mxu1  ;;  %v448_v44 = vmax.f32 %v433_v33, 0.0  ;;  %v436_v46 = vadd.f32 %v435_v41, %v1364_v54 }
 0x160   :  { %v453_v43 = vmax.f32 %v394_v32, 0.0  ;;  %v1396_v48 = vmax.f32 %v300_v31, %v454_v39 }
 0x161   :  { %v1394_v47 = vmax.f32 %v298_v37, %v452_v38  ;;  %v1400_v51 = vmax.f32 %v294_v36, %v448_v44  ;;  %v451_v52 = vmax.f32 %v436_v46, 0.0 }
 0x162   :  { %v1398_v50 = vmax.f32 %v299_v42, %v453_v43 }
 0x163   :  { %v1402_v53 = vmax.f32 %v297_v49, %v451_v52  ;;  %v544_v55 = vpop.f32.mrb[12].mxu0 }
 0x164   :  { %v943_v57 = vpop.f32.mrb[12].mxu1  ;;  %v546_v58 = vpop.f32.mrb[13].mxu0  ;;  %v545_v0 = vadd.f32 %v544_v55, %v1362_v45 }
 0x165   :  { %v595_v59 = vpop.f32.mrb[13].mxu1  ;;  %v548_v60 = vpop.f32.mrb[14].mxu0  ;;  %v547_v1 = vadd.f32 %v546_v58, %v1362_v45  ;;  %v604_v14 = vadd.f32 %v943_v57, %v1367_v56 }
 0x166   :  { %v944_v61 = vpop.f32.mrb[14].mxu1  ;;  %v550_v62 = vpop.f32.mrb[15].mxu0  ;;  %v549_v4 = vadd.f32 %v548_v60, %v1364_v54  ;;  %v609_v12 = vmax.f32 %v545_v0, 0.0  ;;  %v596_v22 = vadd.f32 %v595_v59, %v1362_v45 }
 0x167   :  { %v598_v63 = vpop.f32.mrb[15].mxu1  ;;  %v551_v8 = vadd.f32 %v550_v62, %v1364_v54  ;;  %v610_v20 = vmax.f32 %v547_v1, 0.0  ;;  %v617_v36 = vmax.f32 %v604_v14, 0.0 }
 0x168   :  { %v612_v26 = vmax.f32 %v549_v4, 0.0  ;;  %v611_v37 = vmax.f32 %v596_v22, 0.0  ;;  %v599_v42 = vadd.f32 %v598_v63, %v1364_v54 }
 0x169   :  { %v613_v29 = vmax.f32 %v551_v8, 0.0 }
 0x16b   :  { %v554_v2 = vpop.f32.mrb[16].mxu0 }
 0x16c   :  { %v698_v3 = vpop.f32.mrb[16].mxu1  ;;  %v556_v6 = vpop.f32.mrb[17].mxu0  ;;  %v555_v32 = vadd.f32 %v554_v2, %v1367_v56 }
 0x16d   :  { %v699_v5 = vadd.f32 %v698_v3, %v1362_v45  ;;  %v700_v7 = vpop.f32.mrb[17].mxu1  ;;  %v558_v10 = vpop.f32.mrb[18].mxu0  ;;  %v557_v34 = vadd.f32 %v556_v6, %v1367_v56  ;;  %v614_v6 = vmax.f32 %v599_v42, 0.0 }
 0x16e   :  { %v701_v9 = vadd.f32 %v700_v7, %v1362_v45  ;;  %v702_v11 = vpop.f32.mrb[18].mxu1  ;;  %v559_v18 = vpop.f32.mrb[19].mxu0  ;;  %v615_v60 = vmax.f32 %v555_v32, 0.0 }
 0x16f   :  { %v763_v15 = vmax.f32 %v699_v5, 0.0  ;;  %v703_v17 = vadd.f32 %v702_v11, %v1364_v54  ;;  %v704_v19 = vpop.f32.mrb[19].mxu1  ;;  %v616_v61 = vmax.f32 %v557_v34, 0.0 }
 0x170   :  { %v764_v24 = vmax.f32 %v701_v9, 0.0  ;;  %v705_v25 = vadd.f32 %v704_v19, %v1364_v54 }
 0x171   :  { %v772_v27 = vmax.f32 %v609_v12, %v763_v15  ;;  %v766_v28 = vmax.f32 %v703_v17, 0.0 }
 0x172   :  { %v773_v30 = vmax.f32 %v610_v20, %v764_v24  ;;  %v767_v31 = vmax.f32 %v705_v25, 0.0 }
 0x173   :  { %v781_v33 = vmax.f32 %v1376_v13, %v772_v27  ;;  %v775_v35 = vmax.f32 %v612_v26, %v766_v28  ;;  %v951_v41 = vpop.f32.mrb[20].mxu0 }
 0x174   :  { %v782_v38 = vmax.f32 %v1378_v16, %v773_v30  ;;  %v776_v39 = vmax.f32 %v613_v29, %v767_v31  ;;  %v708_v40 = vpop.f32.mrb[20].mxu1  ;;  %v758_v46 = vadd.f32 %v951_v41, %v1367_v56  ;;  %v749_v13 = vpop.f32.mrb[21].mxu0 }
 0x175   :  { %v784_v43 = vmax.f32 %v1383_v21, %v775_v35  ;;  %v709_v44 = vadd.f32 %v708_v40, %v1367_v56  ;;  %v710_v49 = vpop.f32.mrb[21].mxu1  ;;  %v750_v16 = vadd.f32 %v749_v13, %v1362_v45  ;;  %v952_v59 = vpop.f32.mrb[22].mxu0 }
 0x176   :  { %v899_v52 = vpack.c.bf16 %v782_v38, %v781_v33  ;;  %v785_v55 = vmax.f32 %v1386_v23, %v776_v39  ;;  %v711_v57 = vadd.f32 %v710_v49, %v1367_v56  ;;  %v712_v58 = vpop.f32.mrb[22].mxu1  ;;  %v771_v63 = vmax.f32 %v758_v46, 0.0  ;;  %v752_v0 = vpop.f32.mrb[23].mxu0 }
 0x177   :  { %v769_v62 = vmax.f32 %v709_v44, 0.0  ;;  %v713_v21 = vpop.f32.mrb[23].mxu1  ;;  %v765_v3 = vmax.f32 %v750_v16, 0.0  ;;  %v753_v4 = vadd.f32 %v752_v0, %v1364_v54 }
 0x178   :  { %823 = vst [vmem:[#allocation13] sm:$0xff] %v899_v52  ;;  %v901_v1 = vpack.c.bf16 %v785_v55, %v784_v43  ;;  %v770_v2 = vmax.f32 %v711_v57, 0.0  ;;  %v780_v23 = vmax.f32 %v617_v36, %v771_v63 }
 0x179   :  { %v778_v5 = vmax.f32 %v615_v60, %v769_v62  ;;  %v774_v45 = vmax.f32 %v611_v37, %v765_v3  ;;  %v768_v7 = vmax.f32 %v753_v4, 0.0 }
 0x17a   :  { %826 = vst [vmem:[#allocation13 + $0xc] sm:$0xff] %v901_v1  ;;  %v779_v56 = vmax.f32 %v616_v61, %v770_v2  ;;  %v789_v9 = vmax.f32 %v1396_v48, %v780_v23 }
 0x17b   :  { %v787_v8 = vmax.f32 %v1394_v47, %v778_v5  ;;  %v783_v11 = vmax.f32 %v1400_v51, %v774_v45  ;;  %v777_v12 = vmax.f32 %v614_v6, %v768_v7 }
 0x17c   :  { %v788_v10 = vmax.f32 %v1398_v50, %v779_v56  ;;  %v904_v14 = vpack.c.bf16 %v789_v9, %v789_v9 }
 0x17d   :  { %v900_v15 = vpack.c.bf16 %v783_v11, %v783_v11  ;;  %v786_v17 = vmax.f32 %v1402_v53, %v777_v12 }
 0x17e   :  { %v903_v54 = vpack.c.bf16 %v788_v10, %v787_v8  ;;  %830 = vst.msk [vmem:[#allocation13 + $0x20] sm:$0x3] %vm829_vm3, %v904_v14 }
 0x17f   :  { %825 = vst.msk [vmem:[#allocation13 + $0x8] sm:$0xf] %vm824_vm4, %v900_v15  ;;  %v902_v47 = vpack.c.bf16 %v786_v17, %v786_v17 }
 0x180   :  { %828 = vst [vmem:[#allocation13 + $0x18] sm:$0x33] %v903_v54 }
 0x181   :  { %827 = vst.msk [vmem:[#allocation13 + $0x14] sm:$0xf] %vm824_vm4, %v902_v47 }
 0x182   :  { %1147 = shalt.err (!%p1144_p10)
}
 0x183   :  { %s1148_s26 = scalar_lea.hbm %s1452_s6, 576 }
 0x184   :  { %p1149_p11 = scmp.ne.s32.totalorder %s1452_s6, %s1148_s26  ;;  %p1152_p12 = scmp.lt.u32.totalorder %s1148_s26, %s1452_s6 }
 0x186   :  { %p1154_p13 = pnand %p1152_p12, %p1149_p11 }
 0x188   :  { %1157 = shalt.err (!%p1154_p13)
}
 0x189   :  { %842 = dma.vmem_to_hbm [thread:$0]  %s837_s24, 576, %s1452_s6, [#allocation4], %s1173_s22, %s1173_s22, %s1174_s23  }
 0x18a   :  { %1166 = dma.done.wait [#allocation4], 576  }
 0x18b   :  { %1167 = vsyncadd [#allocation4], 4294966720 }
 0x18c   :  { %846 = vsyncpa [#allocation3], 1 }
 0x18d   :  { %847 = vsyncpa [#allocation6], 1 }
 0x18e   :  { %848 = vsyncpa [#allocation9], 1 }
 0x18f   :  { %849 = vsyncpa [#allocation12], 1 }
 0x190   :  { %850 = vsyncpa [#allocation4], 1 }

// kernel: net_forward.4
= control target key start
LH: loop header
LB: loop body
LE: loop exit
PB: predicated region body
PF: predicated region fallthrough
CT: control target
= control target key end

     0   :  { %11 = vsyncpa [#allocation3], 0  ;;  %s3089_s0 = inlined_call_operand.hbm [shape: bf16[50,500], index: 0, kind: input, shape index: {}]   ;;  %s3090_s1 = inlined_call_operand.hbm [shape: f32[50,1], index: 1, kind: input, shape index: {}]   ;;  %s3091_s2 = inlined_call_operand.hbm [shape: bf16[500,32], index: 2, kind: input, shape index: {}]   ;;  %s3092_s3 = inlined_call_operand.hbm [shape: bf16[500,32], index: 3, kind: input, shape index: {}]   ;;  %s3093_s4 = inlined_call_operand.hbm [shape: bf16[500,32], index: 4, kind: input, shape index: {}]   ;;  %s3094_s5 = inlined_call_operand.hbm [shape: bf16[500,32], index: 5, kind: input, shape index: {}]   ;;  %s3095_s6 = inlined_call_operand.hbm [shape: bf16[50,32], index: 6, kind: output, shape index: {}]  }
   0x1   :  { %12 = vsyncpa [#allocation6], 0 }
   0x2   :  { %13 = vsyncpa [#allocation9], 0 }
   0x3   :  { %14 = vsyncpa [#allocation12], 0 }
   0x4   :  { %15 = vsyncpa [#allocation4], 0  ;;  %s2714_s21 = smov [#allocation5]   ;;  %s2550_s25 = scalar_lea.hbm %s3090_s1, 896 }
   0x5   :  { %s33_s22 = sshll.u32 %s2714_s21, 4  ;;  %p2551_p0 = scmp.ne.s32.totalorder %s3090_s1, %s2550_s25  ;;  %s34_s22 = int_to_ptr.vmem [resolvable:$true] %s33_s22 }
   0x6   :  { %p2554_p1 = scmp.lt.u32.totalorder %s2550_s25, %s3090_s1 }
   0x8   :  { %p2556_p2 = pnand %p2554_p1, %p2551_p0 }
   0xa   :  { %2559 = shalt.err (!%p2556_p2)
}
   0xb   :  { %s2560_s30 = scalar_lea.vmem %s34_s22, 896  ;;  %p2565_p4 = scmp.lt.s32.totalorder %s34_s22, %s34_s22 }
   0xc   :  { %p2561_p3 = scmp.ne.s32.totalorder %s34_s22, %s2560_s30  ;;  %p2566_p5 = scmp.lt.s32.totalorder %s2560_s30, %s2560_s30 }
   0xe   :  { %p2567_p6 = por %p2566_p5, %p2565_p4 }
  0x10   :  { %p2568_p7 = pnand %p2567_p6, %p2561_p3 }
  0x12   :  { %2571 = shalt.err (!%p2568_p7)
}
  0x13   :  { %s2715_s7 = smov 128   ;;  %s2716_s8 = smov 8  }
  0x14   :  { %39 = dma.hbm_to_vmem [thread:$0]  %s3090_s1, 896, %s34_s22, [#allocation6], %s2715_s7, %s2715_s7, %s2716_s8  }
  0x15   :  { %s2717_s11 = smov [#allocation8]   ;;  %s2718_s13 = smov [#allocation2]  }
  0x16   :  { %s57_s12 = sshll.u32 %s2717_s11, 4  ;;  %s21_s14 = sshll.u32 %s2718_s13, 4  ;;  %s58_s12 = int_to_ptr.vmem [resolvable:$true] %s57_s12  ;;  %s22_s14 = int_to_ptr.vmem [resolvable:$true] %s21_s14 }
  0x17   :  { %s2572_s17 = scalar_lea.hbm %s3092_s3, 4032 }
  0x18   :  { %p2573_p8 = scmp.ne.s32.totalorder %s3092_s3, %s2572_s17  ;;  %p2576_p9 = scmp.lt.u32.totalorder %s2572_s17, %s3092_s3 }
  0x1a   :  { %p2578_p10 = pnand %p2576_p9, %p2573_p8 }
  0x1c   :  { %2581 = shalt.err (!%p2578_p10)
}
  0x1d   :  { %s2582_s1 = scalar_lea.vmem %s58_s12, 4032  ;;  %p2587_p12 = scmp.lt.s32.totalorder %s58_s12, %s58_s12 }
  0x1e   :  { %p2583_p11 = scmp.ne.s32.totalorder %s58_s12, %s2582_s1  ;;  %p2588_p13 = scmp.lt.s32.totalorder %s2582_s1, %s2582_s1 }
  0x20   :  { %p2589_p0 = por %p2588_p13, %p2587_p12 }
  0x22   :  { %p2590_p1 = pnand %p2589_p0, %p2583_p11 }
  0x24   :  { %2593 = shalt.err (!%p2590_p1)
}
  0x25   :  { %s2719_s22 = smov 64   ;;  %s2720_s23 = smov 4  }
  0x26   :  { %63 = dma.hbm_to_vmem [thread:$0]  %s3092_s3, 4032, %s58_s12, [#allocation9], %s2719_s22, %s2719_s22, %s2720_s23  }
  0x27   :  { %s2594_s28 = scalar_lea.hbm %s3089_s0, 1792 }
  0x28   :  { %p2595_p2 = scmp.ne.s32.totalorder %s3089_s0, %s2594_s28  ;;  %p2598_p3 = scmp.lt.u32.totalorder %s2594_s28, %s3089_s0 }
  0x2a   :  { %p2600_p4 = pnand %p2598_p3, %p2595_p2 }
  0x2c   :  { %2603 = shalt.err (!%p2600_p4)
}
  0x2d   :  { %s2604_s9 = scalar_lea.vmem %s22_s14, 1792  ;;  %p2609_p6 = scmp.lt.s32.totalorder %s22_s14, %s22_s14 }
  0x2e   :  { %p2605_p5 = scmp.ne.s32.totalorder %s22_s14, %s2604_s9  ;;  %p2610_p7 = scmp.lt.s32.totalorder %s2604_s9, %s2604_s9 }
  0x30   :  { %p2611_p8 = por %p2610_p7, %p2609_p6 }
  0x32   :  { %p2612_p9 = pnand %p2611_p8, %p2605_p5 }
  0x34   :  { %2615 = shalt.err (!%p2612_p9)
}
  0x35   :  { %s2721_s3 = smov 256   ;;  %s2722_s10 = smov 16  }
  0x36   :  { %27 = dma.hbm_to_vmem [thread:$0]  %s3089_s0, 1792, %s22_s14, [#allocation3], %s2721_s3, %s2721_s3, %s2722_s10  }
  0x37   :  { %s2723_s13 = smov [#allocation7]   ;;  %s2724_s16 = smov [#allocation10]  }
  0x38   :  { %s45_s15 = sshll.u32 %s2723_s13, 4  ;;  %s69_s17 = sshll.u32 %s2724_s16, 4  ;;  %s46_s15 = int_to_ptr.vmem [resolvable:$true] %s45_s15  ;;  %s70_s17 = int_to_ptr.vmem [resolvable:$true] %s69_s17 }
  0x39   :  { %s2616_s20 = scalar_lea.hbm %s3091_s2, 4032 }
  0x3a   :  { %p2617_p10 = scmp.ne.s32.totalorder %s3091_s2, %s2616_s20  ;;  %p2620_p11 = scmp.lt.u32.totalorder %s2616_s20, %s3091_s2 }
  0x3c   :  { %p2622_p12 = pnand %p2620_p11, %p2617_p10 }
  0x3e   :  { %2625 = shalt.err (!%p2622_p12)
}
  0x3f   :  { %s2626_s0 = scalar_lea.vmem %s46_s15, 4032  ;;  %p2631_p0 = scmp.lt.s32.totalorder %s46_s15, %s46_s15 }
  0x40   :  { %p2627_p13 = scmp.ne.s32.totalorder %s46_s15, %s2626_s0  ;;  %p2632_p1 = scmp.lt.s32.totalorder %s2626_s0, %s2626_s0 }
  0x42   :  { %p2633_p2 = por %p2632_p1, %p2631_p0 }
  0x44   :  { %p2634_p3 = pnand %p2633_p2, %p2627_p13 }
  0x46   :  { %2637 = shalt.err (!%p2634_p3)
}
  0x47   :  { %51 = dma.hbm_to_vmem [thread:$0]  %s3091_s2, 4032, %s46_s15, [#allocation6], %s2719_s22, %s2719_s22, %s2720_s23  }
  0x48   :  { %s2638_s29 = scalar_lea.hbm %s3093_s4, 4032 }
  0x49   :  { %p2639_p4 = scmp.ne.s32.totalorder %s3093_s4, %s2638_s29  ;;  %p2642_p5 = scmp.lt.u32.totalorder %s2638_s29, %s3093_s4 }
  0x4b   :  { %p2644_p6 = pnand %p2642_p5, %p2639_p4 }
  0x4d   :  { %2647 = shalt.err (!%p2644_p6)
}
  0x4e   :  { %s2648_s3 = scalar_lea.vmem %s70_s17, 4032  ;;  %p2653_p8 = scmp.lt.s32.totalorder %s70_s17, %s70_s17 }
  0x4f   :  { %p2649_p7 = scmp.ne.s32.totalorder %s70_s17, %s2648_s3  ;;  %p2654_p9 = scmp.lt.s32.totalorder %s2648_s3, %s2648_s3 }
  0x51   :  { %p2655_p10 = por %p2654_p9, %p2653_p8 }
  0x53   :  { %p2656_p11 = pnand %p2655_p10, %p2649_p7 }
  0x55   :  { %2659 = shalt.err (!%p2656_p11)
}
  0x56   :  { %75 = dma.hbm_to_vmem [thread:$0]  %s3093_s4, 4032, %s70_s17, [#allocation9], %s2719_s22, %s2719_s22, %s2720_s23  }
  0x57   :  { %s2725_s11 = smov [#allocation11]   ;;  %s2660_s16 = scalar_lea.hbm %s3094_s5, 4032 }
  0x58   :  { %s81_s12 = sshll.u32 %s2725_s11, 4  ;;  %p2661_p12 = scmp.ne.s32.totalorder %s3094_s5, %s2660_s16  ;;  %s82_s12 = int_to_ptr.vmem [resolvable:$true] %s81_s12 }
  0x59   :  { %p2664_p13 = scmp.lt.u32.totalorder %s2660_s16, %s3094_s5 }
  0x5b   :  { %p2666_p0 = pnand %p2664_p13, %p2661_p12 }
  0x5d   :  { %2669 = shalt.err (!%p2666_p0)
}
  0x5e   :  { %s2670_s1 = scalar_lea.vmem %s82_s12, 4032  ;;  %p2675_p2 = scmp.lt.s32.totalorder %s82_s12, %s82_s12 }
  0x5f   :  { %p2671_p1 = scmp.ne.s32.totalorder %s82_s12, %s2670_s1  ;;  %p2676_p3 = scmp.lt.s32.totalorder %s2670_s1, %s2670_s1 }
  0x61   :  { %p2677_p4 = por %p2676_p3, %p2675_p2 }
  0x63   :  { %p2678_p5 = pnand %p2677_p4, %p2671_p1 }
  0x65   :  { %2681 = shalt.err (!%p2678_p5)
}
  0x66   :  { %87 = dma.hbm_to_vmem [thread:$0]  %s3094_s5, 4032, %s82_s12, [#allocation12], %s2719_s22, %s2719_s22, %s2720_s23  }
  0x67   :  { %2704 = dma.done.wait [#allocation3], 1792  }
  0x68   :  { %2705 = vsyncadd [#allocation3], 4294965504 }
  0x69   :  { %2706 = dma.done.wait [#allocation6], 4928  }
  0x6a   :  { %2707 = vsyncadd [#allocation6], 4294962368 }
  0x6b   :  { %2708 = dma.done.wait [#allocation9], 8064  }
  0x6c   :  { %2709 = vsyncadd [#allocation9], 4294959232 }
  0x6d   :  { %2710 = dma.done.wait [#allocation12], 4032  }
  0x6e   :  { %2711 = vsyncadd [#allocation12], 4294963264  ;;  %v2726_v0 = vmov 0   ;;  %v2400_v1 = vld [vmem:[#allocation7 + $0x40] sm:$0xff]   ;;  %v2404_v5 = vld [vmem:[#allocation7 + $0x48] sm:$0xff]   ;;  %vm498_vm0 = vcmask 1041408  }
  0x6f   :  { %2398 = vset.pattern.permute.xlu0 %v2726_v0  ;;  %2399 = vset.pattern.permute.xlu1 %v2726_v0  ;;  %v2401_v2 = vld [vmem:[#allocation7 + $0xc0] sm:$0xff]   ;;  %v2405_v6 = vld [vmem:[#allocation7 + $0xc8] sm:$0xff]   ;;  %v2408_v9 = vld [vmem:[#allocation7 + $0x50] sm:$0xff]   ;;  %vm485_vm1 = vcmask 949248   ;;  %vm1857_vm2 = vcmask 257024   ;;  %s2727_s5 = smov [#allocation13]  }
  0x70   :  { %2060 = vmatprep.subr.bf16.mxu0 %v2400_v1  ;;  %v2402_v3 = vld [vmem:[#allocation7] sm:$0xff]   ;;  %2100 = vmatprep.subr.bf16.mxu1 %v2401_v2  ;;  %v2406_v7 = vld [vmem:[#allocation7 + $0x8] sm:$0xff]   ;;  %v2409_v10 = vld [vmem:[#allocation7 + $0xd0] sm:$0xff]   ;;  %s1871_s24 = sshll.u32 %s2727_s5, 4  ;;  %vm1864_vm3 = vcmask 253952   ;;  %s1872_s24 = int_to_ptr.vmem [resolvable:$true] %s1871_s24 }
  0x71   :  { %v2403_v4 = vld [vmem:[#allocation7 + $0x80] sm:$0xff]   ;;  %2061 = vmatpush3.bf16.msra.mxu0 %v2402_v3  ;;  %v2407_v8 = vld [vmem:[#allocation7 + $0x88] sm:$0xff]   ;;  %v2410_v11 = vld [vmem:[#allocation7 + $0x10] sm:$0xff]   ;;  %s2682_s25 = scalar_lea.vmem %s1872_s24, 448  ;;  %p2687_p7 = scmp.lt.s32.totalorder %s1872_s24, %s1872_s24 }
  0x72   :  { %2101 = vmatpush3.bf16.msra.mxu1 %v2403_v4  ;;  %2062 = vmatprep.subr.bf16.mxu0 %v2404_v5  ;;  %v2411_v12 = vld [vmem:[#allocation7 + $0x90] sm:$0xff]   ;;  %v2412_v13 = vld [vmem:[#allocation7 + $0x58] sm:$0xff]   ;;  %v2416_v17 = vld [vmem:[#allocation7 + $0x60] sm:$0xff]   ;;  %p2683_p6 = scmp.ne.s32.totalorder %s1872_s24, %s2682_s25  ;;  %p2688_p8 = scmp.lt.s32.totalorder %s2682_s25, %s2682_s25 }
  0x73   :  { %2102 = vmatprep.subr.bf16.mxu1 %v2405_v6  ;;  %v2413_v14 = vld [vmem:[#allocation7 + $0xd8] sm:$0xff]   ;;  %v2417_v18 = vld [vmem:[#allocation7 + $0xe0] sm:$0xff]   ;;  %v2420_v21 = vld [vmem:[#allocation7 + $0x68] sm:$0xff]  }
  0x74   :  { %v2414_v15 = vld [vmem:[#allocation7 + $0x18] sm:$0xff]   ;;  %v2418_v19 = vld [vmem:[#allocation7 + $0x20] sm:$0xff]   ;;  %v2421_v22 = vld [vmem:[#allocation7 + $0xe8] sm:$0xff]   ;;  %p2689_p9 = por %p2688_p8, %p2687_p7 }
  0x75   :  { %2063 = vmatpush3.bf16.msra.mxu0 %v2406_v7  ;;  %v2415_v16 = vld [vmem:[#allocation7 + $0x98] sm:$0xff]   ;;  %v2419_v20 = vld [vmem:[#allocation7 + $0xa0] sm:$0xff]   ;;  %v2422_v23 = vld [vmem:[#allocation7 + $0x28] sm:$0xff]  }
  0x76   :  { %2103 = vmatpush3.bf16.msra.mxu1 %v2407_v8  ;;  %2064 = vmatprep.subr.bf16.mxu0 %v2408_v9  ;;  %v2423_v24 = vld [vmem:[#allocation7 + $0xa8] sm:$0xff]   ;;  %v2424_v25 = vld [vmem:[#allocation7 + $0x70] sm:$0xff]   ;;  %v2428_v29 = vld [vmem:[#allocation7 + $0x78] sm:$0xff]   ;;  %p2690_p10 = pnand %p2689_p9, %p2683_p6 }
  0x77   :  { %2104 = vmatprep.subr.bf16.mxu1 %v2409_v10  ;;  %v2425_v26 = vld [vmem:[#allocation7 + $0xf0] sm:$0xff]   ;;  %v2429_v30 = vld [vmem:[#allocation7 + $0xf8] ss:$0 sps:$4 sm:$0x33]   ;;  %v2848_v33 = vld [vmem:[#allocation2 + $0x4] ss:$16 sps:$4 sm:$0xff]  }
  0x78   :  { %v2426_v27 = vld [vmem:[#allocation7 + $0x30] sm:$0xff]   ;;  %v2430_v31 = vld [vmem:[#allocation7 + $0x38] sm:$0xff]   ;;  %534 = vmatprep.mubr.bf16.mxu0 %v2848_v33  ;;  %v2442_v41 = vld [vmem:[#allocation8 + $0x48] sm:$0xff]  }
  0x79   :  { %2065 = vmatpush3.bf16.msra.mxu0 %v2410_v11  ;;  %v2427_v28 = vld [vmem:[#allocation7 + $0xb0] sm:$0xff]   ;;  %v2431_v32 = vld [vmem:[#allocation7 + $0xb8] sm:$0xff]   ;;  %v2443_v42 = vld [vmem:[#allocation8 + $0xc8] sm:$0xff]  }
  0x7a   :  { %2105 = vmatpush3.bf16.msra.mxu1 %v2411_v12  ;;  %2066 = vmatprep.subr.bf16.mxu0 %v2412_v13  ;;  %v2850_v34 = vld [vmem:[#allocation2 + $0xc] ss:$16 sps:$4 sm:$0xff]   ;;  %v2852_v35 = vld [vmem:[#allocation2] ss:$16 sps:$4 sm:$0xff]   ;;  %v2855_v36 = vld [vmem:[#allocation2 + $0x8] ss:$16 sps:$4 sm:$0xff]  }
  0x7b   :  { %2106 = vmatprep.subr.bf16.mxu1 %v2413_v14  ;;  %1934 = vmatprep.mubr.msk.bf16.mxu1 %vm485_vm1, %v2850_v34  ;;  %v2438_v37 = vld [vmem:[#allocation8 + $0x40] sm:$0xff]   ;;  %v2444_v43 = vld [vmem:[#allocation8 + $0x8] sm:$0xff]   ;;  %v2452_v49 = vld [vmem:[#allocation8 + $0x50] sm:$0xff]  }
  0x7c   :  { %v2439_v38 = vld [vmem:[#allocation8 + $0xc0] sm:$0xff]   ;;  %v2445_v44 = vld [vmem:[#allocation8 + $0x88] sm:$0xff]   ;;  %v2453_v50 = vld [vmem:[#allocation8 + $0xd0] sm:$0xff]  }
  0x7d   :  { %2067 = vmatpush3.bf16.msra.mxu0 %v2414_v15  ;;  %v2440_v39 = vld [vmem:[#allocation8] sm:$0xff]   ;;  %v2863_v46 = vld [vmem:[#allocation2 + $0x2c] ss:$16 sps:$4 sm:$0xff]   ;;  %v2865_v47 = vld [vmem:[#allocation2 + $0x20] ss:$16 sps:$4 sm:$0xff]  }
  0x7e   :  { %2107 = vmatpush3.bf16.msra.mxu1 %v2415_v16  ;;  %2068 = vmatprep.subr.bf16.mxu0 %v2416_v17  ;;  %v2441_v40 = vld [vmem:[#allocation8 + $0x80] sm:$0xff]   ;;  %v2454_v51 = vld [vmem:[#allocation8 + $0x10] sm:$0xff]   ;;  %v2456_v53 = vld [vmem:[#allocation8 + $0x58] sm:$0xff]  }
  0x7f   :  { %2108 = vmatprep.subr.bf16.mxu1 %v2417_v18  ;;  %v2861_v45 = vld [vmem:[#allocation2 + $0x24] ss:$16 sps:$4 sm:$0xff]   ;;  %v2867_v48 = vld [vmem:[#allocation2 + $0x28] ss:$16 sps:$4 sm:$0xff]   ;;  %v2457_v54 = vld [vmem:[#allocation8 + $0xd8] sm:$0xff]  }
  0x80   :  { %v2455_v52 = vld [vmem:[#allocation8 + $0x90] sm:$0xff]   ;;  %v2458_v55 = vld [vmem:[#allocation8 + $0x18] sm:$0xff]   ;;  %v2466_v61 = vld [vmem:[#allocation8 + $0x60] sm:$0xff]  }
  0x81   :  { %2069 = vmatpush3.bf16.msra.mxu0 %v2418_v19  ;;  %v2459_v56 = vld [vmem:[#allocation8 + $0x98] sm:$0xff]   ;;  %v2874_v57 = vld [vmem:[#allocation2 + $0x44] ss:$16 sps:$4 sm:$0xff]   ;;  %v2881_v60 = vld [vmem:[#allocation2 + $0x48] ss:$16 sps:$4 sm:$0xff]  }
  0x82   :  { %2109 = vmatpush3.bf16.msra.mxu1 %v2419_v20  ;;  %2070 = vmatprep.subr.bf16.mxu0 %v2420_v21  ;;  %v2876_v58 = vld [vmem:[#allocation2 + $0x4c] ss:$16 sps:$4 sm:$0xff]   ;;  %v2879_v59 = vld [vmem:[#allocation2 + $0x40] ss:$16 sps:$4 sm:$0xff]   ;;  %v2467_v62 = vld [vmem:[#allocation8 + $0xe0] sm:$0xff]  }
  0x83   :  { %2110 = vmatprep.subr.bf16.mxu1 %v2421_v22  ;;  %v2468_v63 = vld [vmem:[#allocation8 + $0x20] sm:$0xff]   ;;  %v2470_v1 = vld [vmem:[#allocation8 + $0x68] sm:$0xff]   ;;  %v2478_v11 = vld [vmem:[#allocation8 + $0x70] sm:$0xff]  }
  0x84   :  { %v2469_v0 = vld [vmem:[#allocation8 + $0xa0] sm:$0xff]   ;;  %v2471_v2 = vld [vmem:[#allocation8 + $0xe8] sm:$0xff]   ;;  %v2479_v12 = vld [vmem:[#allocation8 + $0xf0] sm:$0xff]  }
  0x85   :  { %2071 = vmatpush3.bf16.msra.mxu0 %v2422_v23  ;;  %v2472_v3 = vld [vmem:[#allocation8 + $0x28] sm:$0xff]   ;;  %v119_v5 = vld [vmem:[#allocation2 + $0x60] sm:$0x11]  ;;  %v2480_v13 = vld [vmem:[#allocation8 + $0x30] sm:$0xff]  }
  0x86   :  { %2111 = vmatpush3.bf16.msra.mxu1 %v2423_v24  ;;  %2072 = vmatprep.subr.bf16.mxu0 %v2424_v25  ;;  %v2473_v4 = vld [vmem:[#allocation8 + $0xa8] sm:$0xff]   ;;  %v2887_v6 = vcombine.high %v119_v5, %v119_v5  ;;  %v2889_v8 = vcombine.low %v119_v5, %v119_v5  ;;  %v2481_v14 = vld [vmem:[#allocation8 + $0xb0] sm:$0xff]   ;;  %v2482_v15 = vld [vmem:[#allocation8 + $0x78] sm:$0xff]  }
  0x87   :  { %2112 = vmatprep.subr.bf16.mxu1 %v2425_v26  ;;  %v120_v7 = vld [vmem:[#allocation2 + $0x68] sm:$0x11]  ;;  %v2483_v16 = vld [vmem:[#allocation8 + $0xf8] ss:$0 sps:$4 sm:$0x33]   ;;  %v2486_v19 = vld [vmem:[#allocation10 + $0x40] sm:$0xff]  }
  0x88   :  { %v2891_v9 = vcombine.high %v120_v7, %v120_v7  ;;  %v2893_v10 = vcombine.low %v120_v7, %v120_v7  ;;  %v2484_v17 = vld [vmem:[#allocation8 + $0x38] sm:$0xff]   ;;  %v2490_v23 = vld [vmem:[#allocation10 + $0x48] sm:$0xff]  }
  0x89   :  { %2073 = vmatpush3.bf16.msra.mxu0 %v2426_v27  ;;  %v2485_v18 = vld [vmem:[#allocation8 + $0xb8] sm:$0xff]   ;;  %v2491_v24 = vld [vmem:[#allocation10 + $0xc8] sm:$0xff]   ;;  %v2494_v27 = vld [vmem:[#allocation10 + $0x50] sm:$0xff]  }
  0x8a   :  { %2113 = vmatpush3.bf16.msra.mxu1 %v2427_v28  ;;  %2074 = vmatprep.subr.bf16.mxu0 %v2428_v29  ;;  %v2487_v20 = vld [vmem:[#allocation10 + $0xc0] sm:$0xff]   ;;  %v2492_v25 = vld [vmem:[#allocation10 + $0x8] sm:$0xff]   ;;  %v2495_v28 = vld [vmem:[#allocation10 + $0xd0] sm:$0xff]  }
  0x8b   :  { %2380 = vmatprep.subr.msk.bf16.mxu1 %vm498_vm0, %v2429_v30  ;;  %v2488_v21 = vld [vmem:[#allocation10] sm:$0xff]   ;;  %v2493_v26 = vld [vmem:[#allocation10 + $0x88] sm:$0xff]   ;;  %v2496_v29 = vld [vmem:[#allocation10 + $0x10] sm:$0xff]  }
  0x8c   :  { %v2489_v22 = vld [vmem:[#allocation10 + $0x80] sm:$0xff]   ;;  %v2497_v30 = vld [vmem:[#allocation10 + $0x90] sm:$0xff]  }
  0x8d   :  { %2075 = vmatpush3.bf16.msra.mxu0 %v2430_v31  ;;  %v2498_v31 = vld [vmem:[#allocation10 + $0x58] sm:$0xff]   ;;  %v2524_v5 = vld [vmem:[#allocation11 + $0x8] sm:$0xff]  }
  0x8e   :  { %2115 = vmatpush3.bf16.msra.mxu1 %v2431_v32  ;;  %2140 = vmatprep.subr.bf16.mxu0 %v2438_v37  ;;  %v2499_v32 = vld [vmem:[#allocation10 + $0xd8] sm:$0xff]   ;;  %v2525_v7 = vld [vmem:[#allocation11 + $0x88] sm:$0xff]  }
  0x8f   :  { %2180 = vmatprep.subr.bf16.mxu1 %v2439_v38  ;;  %v2500_v37 = vld [vmem:[#allocation10 + $0x18] sm:$0xff]  }
  0x90   :  { %535 = vmatmul.mubr.bf16.vlgmr.msra.gmra.mrb[0].mxu0 %v2852_v35  ;;  %v2501_v38 = vld [vmem:[#allocation10 + $0x98] sm:$0xff]  }
  0x91   :  { %599 = vmatmul.mubr.bf16.vlgmr.msra.gmra.mrb[0].mxu1 %v2855_v36  ;;  %2141 = vmatpush3.bf16.msra.mxu0 %v2440_v39  ;;  %v2502_v39 = vld [vmem:[#allocation10 + $0x60] sm:$0xff]  }
  0x92   :  { %2181 = vmatpush3.bf16.msra.mxu1 %v2441_v40  ;;  %2142 = vmatprep.subr.bf16.mxu0 %v2442_v41  ;;  %v2503_v40 = vld [vmem:[#allocation10 + $0xe0] sm:$0xff]  }
  0x93   :  { %2182 = vmatprep.subr.bf16.mxu1 %v2443_v42  ;;  %542 = vmatprep.mubr.bf16.mxu0 %v2861_v45  ;;  %v2504_v41 = vld [vmem:[#allocation10 + $0x20] sm:$0xff]  }
  0x94   :  { %1935 = vmatprep.mubr.msk.bf16.mxu1 %vm485_vm1, %v2863_v46  ;;  %v2505_v42 = vld [vmem:[#allocation10 + $0xa0] sm:$0xff]  }
  0x95   :  { %2143 = vmatpush3.bf16.msra.mxu0 %v2444_v43  ;;  %v2506_v43 = vld [vmem:[#allocation10 + $0x68] sm:$0xff]  }
  0x96   :  { %2183 = vmatpush3.bf16.msra.mxu1 %v2445_v44  ;;  %2144 = vmatprep.subr.bf16.mxu0 %v2452_v49  ;;  %v2507_v44 = vld [vmem:[#allocation10 + $0xe8] sm:$0xff]  }
  0x97   :  { %2184 = vmatprep.subr.bf16.mxu1 %v2453_v50  ;;  %v2508_v49 = vld [vmem:[#allocation10 + $0x28] sm:$0xff]  }
  0x98   :  { %543 = vmatmul.mubr.bf16.gmra.mrb[4].mxu0 %v2865_v47  ;;  %v2509_v50 = vld [vmem:[#allocation10 + $0xa8] sm:$0xff]  }
  0x99   :  { %607 = vmatmul.mubr.bf16.gmra.mrb[4].mxu1 %v2867_v48  ;;  %2145 = vmatpush3.bf16.msra.mxu0 %v2454_v51  ;;  %v2510_v51 = vld [vmem:[#allocation10 + $0x70] sm:$0xff]  }
  0x9a   :  { %2185 = vmatpush3.bf16.msra.mxu1 %v2455_v52  ;;  %2146 = vmatprep.subr.bf16.mxu0 %v2456_v53  ;;  %v2511_v52 = vld [vmem:[#allocation10 + $0xf0] sm:$0xff]  }
  0x9b   :  { %2186 = vmatprep.subr.bf16.mxu1 %v2457_v54  ;;  %550 = vmatprep.mubr.bf16.mxu0 %v2874_v57  ;;  %v2512_v53 = vld [vmem:[#allocation10 + $0x30] sm:$0xff]  }
  0x9c   :  { %1936 = vmatprep.mubr.msk.bf16.mxu1 %vm485_vm1, %v2876_v58  ;;  %v2513_v54 = vld [vmem:[#allocation10 + $0xb0] sm:$0xff]  }
  0x9d   :  { %2147 = vmatpush3.bf16.msra.mxu0 %v2458_v55  ;;  %v2514_v55 = vld [vmem:[#allocation10 + $0x78] sm:$0xff]  }
  0x9e   :  { %2187 = vmatpush3.bf16.msra.mxu1 %v2459_v56  ;;  %2148 = vmatprep.subr.bf16.mxu0 %v2466_v61  ;;  %v2515_v56 = vld [vmem:[#allocation10 + $0xf8] ss:$0 sps:$4 sm:$0x33]  }
  0x9f   :  { %2188 = vmatprep.subr.bf16.mxu1 %v2467_v62  ;;  %v2516_v61 = vld [vmem:[#allocation10 + $0x38] sm:$0xff]  }
  0xa0   :  { %551 = vmatmul.mubr.bf16.gmra.mrb[8].mxu0 %v2879_v59  ;;  %v2517_v62 = vld [vmem:[#allocation10 + $0xb8] sm:$0xff]  }
  0xa1   :  { %615 = vmatmul.mubr.bf16.gmra.mrb[8].mxu1 %v2881_v60  ;;  %2149 = vmatpush3.bf16.msra.mxu0 %v2468_v63  ;;  %v2518_v63 = vld [vmem:[#allocation11 + $0x40] sm:$0xff]  }
  0xa2   :  { %2189 = vmatpush3.bf16.msra.mxu1 %v2469_v0  ;;  %2150 = vmatprep.subr.bf16.mxu0 %v2470_v1  ;;  %v2519_v0 = vld [vmem:[#allocation11 + $0xc0] sm:$0xff]  }
  0xa3   :  { %2190 = vmatprep.subr.bf16.mxu1 %v2471_v2  ;;  %558 = vmatprep.mubr.bf16.mxu0 %v2887_v6  ;;  %v2520_v1 = vld [vmem:[#allocation11] sm:$0xff]  }
  0xa4   :  { %1937 = vmatprep.mubr.msk.bf16.mxu1 %vm485_vm1, %v2891_v9  ;;  %v2521_v2 = vld [vmem:[#allocation11 + $0x80] sm:$0xff]  }
  0xa5   :  { %2151 = vmatpush3.bf16.msra.mxu0 %v2472_v3  ;;  %v2522_v3 = vld [vmem:[#allocation11 + $0x48] sm:$0xff]  }
  0xa6   :  { %2191 = vmatpush3.bf16.msra.mxu1 %v2473_v4  ;;  %2152 = vmatprep.subr.bf16.mxu0 %v2478_v11  ;;  %v2523_v4 = vld [vmem:[#allocation11 + $0xc8] sm:$0xff]   ;;  %v2526_v11 = vld [vmem:[#allocation11 + $0x50] sm:$0xff]  }
  0xa7   :  { %2192 = vmatprep.subr.bf16.mxu1 %v2479_v12  ;;  %v2527_v12 = vld [vmem:[#allocation11 + $0xd0] sm:$0xff]  }
  0xa8   :  { %559 = vmatmul.mubr.bf16.gmra.mrb[12].mxu0 %v2889_v8 }
  0xa9   :  { %623 = vmatmul.mubr.bf16.gmra.mrb[12].mxu1 %v2893_v10  ;;  %2153 = vmatpush3.bf16.msra.mxu0 %v2480_v13  ;;  %v2528_v13 = vld [vmem:[#allocation11 + $0x10] sm:$0xff]  }
  0xaa   :  { %2193 = vmatpush3.bf16.msra.mxu1 %v2481_v14  ;;  %924 = vmatprep.mubr.bf16.mxu0 %v2848_v33  ;;  %v2529_v14 = vld [vmem:[#allocation11 + $0x90] sm:$0xff]  }
  0xab   :  { %2154 = vmatprep.subr.bf16.mxu0 %v2482_v15  ;;  %2381 = vmatprep.subr.msk.bf16.mxu1 %vm498_vm0, %v2483_v16  ;;  %v2530_v15 = vld [vmem:[#allocation11 + $0x58] sm:$0xff]  }
  0xac   :  { %1970 = vmatprep.mubr.msk.bf16.mxu1 %vm485_vm1, %v2850_v34  ;;  %v2531_v16 = vld [vmem:[#allocation11 + $0xd8] sm:$0xff]  }
  0xad   :  { %2155 = vmatpush3.bf16.msra.mxu0 %v2484_v17  ;;  %v2532_v17 = vld [vmem:[#allocation11 + $0x18] sm:$0xff]  }
  0xae   :  { %2195 = vmatpush3.bf16.msra.mxu1 %v2485_v18  ;;  %2220 = vmatprep.subr.bf16.mxu0 %v2486_v19  ;;  %v2533_v18 = vld [vmem:[#allocation11 + $0x98] sm:$0xff]   ;;  %v2534_v19 = vld [vmem:[#allocation11 + $0x60] sm:$0xff]  }
  0xaf   :  { %2260 = vmatprep.subr.bf16.mxu1 %v2487_v20  ;;  %v2535_v20 = vld [vmem:[#allocation11 + $0xe0] sm:$0xff]  }
  0xb0   :  { %925 = vmatmul.mubr.bf16.vlgmr.msra.gmra.mrb[16].mxu0 %v2852_v35 }
  0xb1   :  { %989 = vmatmul.mubr.bf16.vlgmr.msra.gmra.mrb[16].mxu1 %v2855_v36  ;;  %2221 = vmatpush3.bf16.msra.mxu0 %v2488_v21  ;;  %v2536_v21 = vld [vmem:[#allocation11 + $0x20] sm:$0xff]  }
  0xb2   :  { %2261 = vmatpush3.bf16.msra.mxu1 %v2489_v22  ;;  %2222 = vmatprep.subr.bf16.mxu0 %v2490_v23  ;;  %v2537_v22 = vld [vmem:[#allocation11 + $0xa0] sm:$0xff]   ;;  %v2538_v23 = vld [vmem:[#allocation11 + $0x68] sm:$0xff]  }
  0xb3   :  { %2262 = vmatprep.subr.bf16.mxu1 %v2491_v24  ;;  %932 = vmatprep.mubr.bf16.mxu0 %v2861_v45  ;;  %v2539_v24 = vld [vmem:[#allocation11 + $0xe8] sm:$0xff]  }
  0xb4   :  { %1971 = vmatprep.mubr.msk.bf16.mxu1 %vm485_vm1, %v2863_v46 }
  0xb5   :  { %2223 = vmatpush3.bf16.msra.mxu0 %v2492_v25  ;;  %v184_v25 = vld [vmem:[#allocation5] sm:$0xff] }
  0xb6   :  { %2263 = vmatpush3.bf16.msra.mxu1 %v2493_v26  ;;  %2224 = vmatprep.subr.bf16.mxu0 %v2494_v27  ;;  %v2540_v26 = vld [vmem:[#allocation11 + $0x28] sm:$0xff]  }
  0xb7   :  { %2264 = vmatprep.subr.bf16.mxu1 %v2495_v28  ;;  %193 = vperm.xlu0 %2398, %v184_v25   ;;  %v2541_v27 = vld [vmem:[#allocation11 + $0xa8] sm:$0xff]   ;;  %v2542_v28 = vld [vmem:[#allocation11 + $0x70] sm:$0xff]  }
  0xb8   :  { %933 = vmatmul.mubr.bf16.gmra.mrb[20].mxu0 %v2865_v47 }
  0xb9   :  { %997 = vmatmul.mubr.bf16.gmra.mrb[20].mxu1 %v2867_v48  ;;  %2225 = vmatpush3.bf16.msra.mxu0 %v2496_v29  ;;  %v2543_v29 = vld [vmem:[#allocation11 + $0xf0] sm:$0xff]  }
  0xba   :  { %2265 = vmatpush3.bf16.msra.mxu1 %v2497_v30  ;;  %2226 = vmatprep.subr.bf16.mxu0 %v2498_v31  ;;  %v185_v30 = vld [vmem:[#allocation5 + $0x8] sm:$0xff]  ;;  %v2544_v31 = vld [vmem:[#allocation11 + $0x30] sm:$0xff]  }
  0xbb   :  { %2266 = vmatprep.subr.bf16.mxu1 %v2499_v32  ;;  %940 = vmatprep.mubr.bf16.mxu0 %v2874_v57  ;;  %v2545_v32 = vld [vmem:[#allocation11 + $0xb0] sm:$0xff]  }
  0xbc   :  { %1972 = vmatprep.mubr.msk.bf16.mxu1 %vm485_vm1, %v2876_v58  ;;  %198 = vperm.xlu0 %2398, %v185_v30  }
  0xbd   :  { %2227 = vmatpush3.bf16.msra.mxu0 %v2500_v37  ;;  %v2546_v37 = vld [vmem:[#allocation11 + $0x78] sm:$0xff]  }
  0xbe   :  { %2267 = vmatpush3.bf16.msra.mxu1 %v2501_v38  ;;  %2228 = vmatprep.subr.bf16.mxu0 %v2502_v39  ;;  %v2547_v38 = vld [vmem:[#allocation11 + $0xf8] ss:$0 sps:$4 sm:$0x33]   ;;  %v186_v39 = vld [vmem:[#allocation5 + $0x10] sm:$0xff] }
  0xbf   :  { %2268 = vmatprep.subr.bf16.mxu1 %v2503_v40  ;;  %v2548_v40 = vld [vmem:[#allocation11 + $0x38] sm:$0xff]   ;;  %203 = vperm.xlu1 %2399, %v186_v39  }
  0xc0   :  { %941 = vmatmul.mubr.bf16.gmra.mrb[24].mxu0 %v2879_v59 }
  0xc1   :  { %1005 = vmatmul.mubr.bf16.gmra.mrb[24].mxu1 %v2881_v60  ;;  %2229 = vmatpush3.bf16.msra.mxu0 %v2504_v41  ;;  %v2549_v41 = vld [vmem:[#allocation11 + $0xb8] sm:$0xff]  }
  0xc2   :  { %2269 = vmatpush3.bf16.msra.mxu1 %v2505_v42  ;;  %2230 = vmatprep.subr.bf16.mxu0 %v2506_v43  ;;  %v188_v42 = vld [vmem:[#allocation5 + $0x20] sm:$0xff]  ;;  %v187_v43 = vld [vmem:[#allocation5 + $0x18] sm:$0xff] }
  0xc3   :  { %2270 = vmatprep.subr.bf16.mxu1 %v2507_v44  ;;  %948 = vmatprep.mubr.bf16.mxu0 %v2887_v6  ;;  %v190_v44 = vld [vmem:[#allocation5 + $0x30] sm:$0x3] }
  0xc4   :  { %1973 = vmatprep.mubr.msk.bf16.mxu1 %vm485_vm1, %v2891_v9  ;;  %213 = vperm.xlu0 %2398, %v188_v42  }
  0xc5   :  { %2231 = vmatpush3.bf16.msra.mxu0 %v2508_v49  ;;  %208 = vperm.xlu1 %2399, %v187_v43  }
  0xc6   :  { %2271 = vmatpush3.bf16.msra.mxu1 %v2509_v50  ;;  %2232 = vmatprep.subr.bf16.mxu0 %v2510_v51 }
  0xc7   :  { %2272 = vmatprep.subr.bf16.mxu1 %v2511_v52 }
  0xc8   :  { %949 = vmatmul.mubr.bf16.gmra.mrb[28].mxu0 %v2889_v8  ;;  %223 = vperm.xlu0 %2398, %v190_v44  }
  0xc9   :  { %1013 = vmatmul.mubr.bf16.gmra.mrb[28].mxu1 %v2893_v10  ;;  %2233 = vmatpush3.bf16.msra.mxu0 %v2512_v53 }
  0xca   :  { %2273 = vmatpush3.bf16.msra.mxu1 %v2513_v54  ;;  %2234 = vmatprep.subr.bf16.mxu0 %v2514_v55 }
  0xcb   :  { %2382 = vmatprep.subr.msk.bf16.mxu1 %vm498_vm0, %v2515_v56  ;;  %1321 = vmatprep.mubr.bf16.mxu0 %v2848_v33 }
  0xcc   :  { %2006 = vmatprep.mubr.msk.bf16.mxu1 %vm485_vm1, %v2850_v34 }
  0xcd   :  { %2235 = vmatpush3.bf16.msra.mxu0 %v2516_v61 }
  0xce   :  { %2275 = vmatpush3.bf16.msra.mxu1 %v2517_v62  ;;  %2300 = vmatprep.subr.bf16.mxu0 %v2518_v63 }
  0xcf   :  { %2340 = vmatprep.subr.bf16.mxu1 %v2519_v0 }
  0xd0   :  { %1322 = vmatmul.mubr.bf16.vlgmr.msra.gmra.mrb[32].mxu0 %v2852_v35 }
  0xd1   :  { %1386 = vmatmul.mubr.bf16.vlgmr.msra.gmra.mrb[32].mxu1 %v2855_v36  ;;  %2301 = vmatpush3.bf16.msra.mxu0 %v2520_v1 }
  0xd2   :  { %2341 = vmatpush3.bf16.msra.mxu1 %v2521_v2  ;;  %2302 = vmatprep.subr.bf16.mxu0 %v2522_v3 }
  0xd3   :  { %2342 = vmatprep.subr.bf16.mxu1 %v2523_v4  ;;  %1329 = vmatprep.mubr.bf16.mxu0 %v2861_v45 }
  0xd4   :  { %2007 = vmatprep.mubr.msk.bf16.mxu1 %vm485_vm1, %v2863_v46 }
  0xd5   :  { %2303 = vmatpush3.bf16.msra.mxu0 %v2524_v5 }
  0xd6   :  { %2343 = vmatpush3.bf16.msra.mxu1 %v2525_v7  ;;  %2304 = vmatprep.subr.bf16.mxu0 %v2526_v11 }
  0xd7   :  { %2344 = vmatprep.subr.bf16.mxu1 %v2527_v12 }
  0xd8   :  { %1330 = vmatmul.mubr.bf16.gmra.mrb[36].mxu0 %v2865_v47 }
  0xd9   :  { %1394 = vmatmul.mubr.bf16.gmra.mrb[36].mxu1 %v2867_v48  ;;  %2305 = vmatpush3.bf16.msra.mxu0 %v2528_v13 }
  0xda   :  { %2345 = vmatpush3.bf16.msra.mxu1 %v2529_v14  ;;  %2306 = vmatprep.subr.bf16.mxu0 %v2530_v15 }
  0xdb   :  { %2346 = vmatprep.subr.bf16.mxu1 %v2531_v16  ;;  %1337 = vmatprep.mubr.bf16.mxu0 %v2874_v57 }
  0xdc   :  { %2008 = vmatprep.mubr.msk.bf16.mxu1 %vm485_vm1, %v2876_v58 }
  0xdd   :  { %2307 = vmatpush3.bf16.msra.mxu0 %v2532_v17 }
  0xde   :  { %2347 = vmatpush3.bf16.msra.mxu1 %v2533_v18  ;;  %2308 = vmatprep.subr.bf16.mxu0 %v2534_v19 }
  0xdf   :  { %2348 = vmatprep.subr.bf16.mxu1 %v2535_v20 }
  0xe0   :  { %1338 = vmatmul.mubr.bf16.gmra.mrb[40].mxu0 %v2879_v59 }
  0xe1   :  { %1402 = vmatmul.mubr.bf16.gmra.mrb[40].mxu1 %v2881_v60  ;;  %2309 = vmatpush3.bf16.msra.mxu0 %v2536_v21 }
  0xe2   :  { %2349 = vmatpush3.bf16.msra.mxu1 %v2537_v22  ;;  %2310 = vmatprep.subr.bf16.mxu0 %v2538_v23 }
  0xe3   :  { %2350 = vmatprep.subr.bf16.mxu1 %v2539_v24  ;;  %1345 = vmatprep.mubr.bf16.mxu0 %v2887_v6 }
  0xe4   :  { %2009 = vmatprep.mubr.msk.bf16.mxu1 %vm485_vm1, %v2891_v9 }
  0xe5   :  { %2311 = vmatpush3.bf16.msra.mxu0 %v2540_v26 }
  0xe6   :  { %2351 = vmatpush3.bf16.msra.mxu1 %v2541_v27  ;;  %2312 = vmatprep.subr.bf16.mxu0 %v2542_v28 }
  0xe7   :  { %2352 = vmatprep.subr.bf16.mxu1 %v2543_v29 }
  0xe8   :  { %1346 = vmatmul.mubr.bf16.gmra.mrb[44].mxu0 %v2889_v8 }
  0xe9   :  { %1410 = vmatmul.mubr.bf16.gmra.mrb[44].mxu1 %v2893_v10  ;;  %2313 = vmatpush3.bf16.msra.mxu0 %v2544_v31 }
  0xea   :  { %2353 = vmatpush3.bf16.msra.mxu1 %v2545_v32  ;;  %1711 = vmatprep.mubr.bf16.mxu0 %v2848_v33  ;;  %v189_v33 = vld [vmem:[#allocation5 + $0x28] sm:$0xff] }
  0xeb   :  { %2314 = vmatprep.subr.bf16.mxu0 %v2546_v37  ;;  %2383 = vmatprep.subr.msk.bf16.mxu1 %vm498_vm0, %v2547_v38 }
  0xec   :  { %2042 = vmatprep.mubr.msk.bf16.mxu1 %vm485_vm1, %v2850_v34  ;;  %218 = vperm.xlu1 %2399, %v189_v33  }
  0xed   :  { %2315 = vmatpush3.bf16.msra.mxu0 %v2548_v40 }
  0xee   :  { %2355 = vmatpush3.bf16.msra.mxu1 %v2549_v41 }
  0xf0   :  { %1712 = vmatmul.mubr.bf16.vlgmr.msra.gmra.mrb[48].mxu0 %v2852_v35 }
  0xf1   :  { %1776 = vmatmul.mubr.bf16.vlgmr.msra.gmra.mrb[48].mxu1 %v2855_v36  ;;  %1719 = vmatprep.mubr.bf16.mxu0 %v2861_v45 }
  0xf2   :  { %2043 = vmatprep.mubr.msk.bf16.mxu1 %vm485_vm1, %v2863_v46 }
  0xf8   :  { %1720 = vmatmul.mubr.bf16.gmra.mrb[52].mxu0 %v2865_v47 }
  0xf9   :  { %1784 = vmatmul.mubr.bf16.gmra.mrb[52].mxu1 %v2867_v48  ;;  %1727 = vmatprep.mubr.bf16.mxu0 %v2874_v57 }
  0xfa   :  { %2044 = vmatprep.mubr.msk.bf16.mxu1 %vm485_vm1, %v2876_v58 }
 0x100   :  { %1728 = vmatmul.mubr.bf16.gmra.mrb[56].mxu0 %v2879_v59 }
 0x101   :  { %1792 = vmatmul.mubr.bf16.gmra.mrb[56].mxu1 %v2881_v60  ;;  %1735 = vmatprep.mubr.bf16.mxu0 %v2887_v6 }
 0x102   :  { %2045 = vmatprep.mubr.msk.bf16.mxu1 %vm485_vm1, %v2891_v9 }
 0x108   :  { %1736 = vmatmul.mubr.bf16.gmra.mrb[60].mxu0 %v2889_v8 }
 0x109   :  { %1800 = vmatmul.mubr.bf16.gmra.mrb[60].mxu1 %v2893_v10 }
 0x136   :  { %v2963_v6 = vpop.permute.xlu0 %193 }
 0x13b   :  { %v2968_v10 = vpop.permute.xlu0 %198 }
 0x13e   :  { %v2973_v4 = vpop.permute.xlu1 %203 }
 0x143   :  { %v2980_v12 = vpop.permute.xlu0 %213 }
 0x144   :  { %v2978_v11 = vpop.permute.xlu1 %208 }
 0x147   :  { %v2993_v37 = vpop.permute.xlu0 %223 }
 0x163   :  { %v2076_v34 = vpop.f32.mrb[0].mxu0 }
 0x164   :  { %v2116_v35 = vpop.f32.mrb[0].mxu1  ;;  %v2077_v36 = vpop.f32.mrb[1].mxu0 }
 0x165   :  { %v2078_v45 = vadd.f32 %v2077_v36, %v2076_v34  ;;  %v2117_v46 = vpop.f32.mrb[1].mxu1  ;;  %v2079_v47 = vpop.f32.mrb[2].mxu0 }
 0x166   :  { %v2118_v48 = vadd.f32 %v2117_v46, %v2116_v35  ;;  %v2119_v57 = vpop.f32.mrb[2].mxu1  ;;  %v2080_v58 = vpop.f32.mrb[3].mxu0 }
 0x167   :  { %v2081_v59 = vadd.f32 %v2080_v58, %v2079_v47  ;;  %v2120_v60 = vpop.f32.mrb[3].mxu1  ;;  %v537_v9 = vadd.f32 %v2078_v45, %v2963_v6 }
 0x168   :  { %v2121_v49 = vadd.f32 %v2120_v60, %v2119_v57 }
 0x169   :  { %v2966_v50 = vadd.f32 %v2118_v48, %v537_v9  ;;  %v540_v52 = vadd.f32 %v2081_v59, %v2968_v10 }
 0x16b   :  { %v2082_v8 = vpop.f32.mrb[4].mxu0  ;;  %v2971_v1 = vadd.f32 %v2121_v49, %v540_v52  ;;  %v2986_v28 = vpop.permute.xlu1 %218 }
 0x16c   :  { %v2122_v51 = vpop.f32.mrb[4].mxu1  ;;  %v2083_v53 = vpop.f32.mrb[5].mxu0 }
 0x16d   :  { %v2123_v54 = vpop.f32.mrb[5].mxu1  ;;  %v2084_v55 = vadd.f32 %v2083_v53, %v2082_v8  ;;  %v2085_v61 = vpop.f32.mrb[6].mxu0 }
 0x16e   :  { %v2124_v56 = vadd.f32 %v2123_v54, %v2122_v51  ;;  %v2125_v62 = vpop.f32.mrb[6].mxu1  ;;  %v2086_v63 = vpop.f32.mrb[7].mxu0 }
 0x16f   :  { %v2126_v0 = vpop.f32.mrb[7].mxu1  ;;  %v2087_v2 = vadd.f32 %v2086_v63, %v2085_v61  ;;  %v545_v5 = vadd.f32 %v2084_v55, %v2973_v4  ;;  %v630_v55 = vmax.f32 %v2966_v50, 0.0 }
 0x170   :  { %v2127_v3 = vadd.f32 %v2126_v0, %v2125_v62 }
 0x171   :  { %v2976_v7 = vadd.f32 %v2124_v56, %v545_v5  ;;  %v548_v13 = vadd.f32 %v2087_v2, %v2978_v11 }
 0x173   :  { %v2088_v14 = vpop.f32.mrb[8].mxu0  ;;  %v2983_v22 = vadd.f32 %v2127_v3, %v548_v13  ;;  %v631_v3 = vmax.f32 %v2971_v1, 0.0 }
 0x174   :  { %v2128_v15 = vpop.f32.mrb[8].mxu1  ;;  %v2089_v16 = vpop.f32.mrb[9].mxu0 }
 0x175   :  { %v2129_v17 = vpop.f32.mrb[9].mxu1  ;;  %v2090_v18 = vadd.f32 %v2089_v16, %v2088_v14  ;;  %v2091_v20 = vpop.f32.mrb[10].mxu0 }
 0x176   :  { %v2130_v19 = vadd.f32 %v2129_v17, %v2128_v15  ;;  %v2131_v21 = vpop.f32.mrb[10].mxu1  ;;  %v2092_v23 = vpop.f32.mrb[11].mxu0 }
 0x177   :  { %v2132_v24 = vpop.f32.mrb[11].mxu1  ;;  %v553_v25 = vadd.f32 %v2090_v18, %v2980_v12  ;;  %v2093_v26 = vadd.f32 %v2092_v23, %v2091_v20 }
 0x178   :  { %v2133_v27 = vadd.f32 %v2132_v24, %v2131_v21 }
 0x179   :  { %v556_v29 = vadd.f32 %v2093_v26, %v2986_v28  ;;  %v2989_v30 = vadd.f32 %v2130_v19, %v553_v25  ;;  %v632_v26 = vmax.f32 %v2976_v7, 0.0 }
 0x17b   :  { %v2991_v31 = vadd.f32 %v2133_v27, %v556_v29  ;;  %v2094_v32 = vpop.f32.mrb[12].mxu0 }
 0x17c   :  { %v2134_v38 = vpop.f32.mrb[12].mxu1  ;;  %v2095_v39 = vpop.f32.mrb[13].mxu0 }
 0x17d   :  { %v2096_v40 = vadd.f32 %v2095_v39, %v2094_v32  ;;  %v2135_v41 = vpop.f32.mrb[13].mxu1  ;;  %v2097_v42 = vpop.f32.mrb[14].mxu0 }
 0x17e   :  { %v2136_v43 = vadd.f32 %v2135_v41, %v2134_v38  ;;  %v2137_v44 = vpop.f32.mrb[14].mxu1  ;;  %v2098_v33 = vpop.f32.mrb[15].mxu0 }
 0x17f   :  { %v561_v34 = vadd.f32 %v2096_v40, %v2993_v37  ;;  %v2138_v35 = vpop.f32.mrb[15].mxu1  ;;  %v633_v40 = vmax.f32 %v2983_v22, 0.0 }
 0x181   :  { %v2996_v36 = vadd.f32 %v2136_v43, %v561_v34 }
 0x183   :  { %v2156_v45 = vpop.f32.mrb[16].mxu0 }
 0x184   :  { %v2196_v46 = vpop.f32.mrb[16].mxu1  ;;  %v2157_v47 = vpop.f32.mrb[17].mxu0 }
 0x185   :  { %v2158_v48 = vadd.f32 %v2157_v47, %v2156_v45  ;;  %v2197_v57 = vpop.f32.mrb[17].mxu1  ;;  %v2159_v58 = vpop.f32.mrb[18].mxu0 }
 0x186   :  { %v2198_v59 = vadd.f32 %v2197_v57, %v2196_v46  ;;  %v2199_v60 = vpop.f32.mrb[18].mxu1  ;;  %v2160_v49 = vpop.f32.mrb[19].mxu0 }
 0x187   :  { %v927_v9 = vadd.f32 %v2158_v48, %v2963_v6  ;;  %v2161_v8 = vadd.f32 %v2160_v49, %v2159_v58  ;;  %v2200_v51 = vpop.f32.mrb[19].mxu1 }
 0x188   :  { %v2201_v52 = vadd.f32 %v2200_v51, %v2199_v60  ;;  %v635_v51 = vmax.f32 %v2991_v31, 0.0 }
 0x189   :  { %v991_v53 = vadd.f32 %v2198_v59, %v927_v9  ;;  %v930_v54 = vadd.f32 %v2161_v8, %v2968_v10  ;;  %v634_v59 = vmax.f32 %v2989_v30, 0.0 }
 0x18b   :  { %v1020_v56 = vmax.f32 %v991_v53, 0.0  ;;  %v994_v61 = vadd.f32 %v2201_v52, %v930_v54  ;;  %v2162_v62 = vpop.f32.mrb[20].mxu0 }
 0x18c   :  { %v2202_v63 = vpop.f32.mrb[20].mxu1  ;;  %v2163_v0 = vpop.f32.mrb[21].mxu0 }
 0x18d   :  { %v3001_v2 = vmax.f32 %v630_v55, %v1020_v56  ;;  %v1021_v5 = vmax.f32 %v994_v61, 0.0  ;;  %v2164_v13 = vadd.f32 %v2163_v0, %v2162_v62  ;;  %v2203_v14 = vpop.f32.mrb[21].mxu1  ;;  %v2165_v15 = vpop.f32.mrb[22].mxu0 }
 0x18e   :  { %v2204_v16 = vadd.f32 %v2203_v14, %v2202_v63  ;;  %v2205_v17 = vpop.f32.mrb[22].mxu1  ;;  %v2166_v18 = vpop.f32.mrb[23].mxu0 }
 0x18f   :  { %v3004_v19 = vmax.f32 %v631_v3, %v1021_v5  ;;  %v935_v50 = vadd.f32 %v2164_v13, %v2973_v4  ;;  %v2167_v20 = vadd.f32 %v2166_v18, %v2165_v15  ;;  %v2206_v21 = vpop.f32.mrb[23].mxu1  ;;  %v636_v13 = vmax.f32 %v2996_v36, 0.0 }
 0x190   :  { %v2207_v23 = vadd.f32 %v2206_v21, %v2205_v17 }
 0x191   :  { %v999_v24 = vadd.f32 %v2204_v16, %v935_v50  ;;  %v938_v25 = vadd.f32 %v2167_v20, %v2978_v11 }
 0x193   :  { %v1022_v1 = vmax.f32 %v999_v24, 0.0  ;;  %v1002_v27 = vadd.f32 %v2207_v23, %v938_v25  ;;  %v2168_v29 = vpop.f32.mrb[24].mxu0 }
 0x194   :  { %v2208_v32 = vpop.f32.mrb[24].mxu1  ;;  %v2169_v38 = vpop.f32.mrb[25].mxu0 }
 0x195   :  { %v3009_v39 = vmax.f32 %v632_v26, %v1022_v1  ;;  %v1023_v41 = vmax.f32 %v1002_v27, 0.0  ;;  %v2170_v42 = vadd.f32 %v2169_v38, %v2168_v29  ;;  %v2209_v43 = vpop.f32.mrb[25].mxu1  ;;  %v2171_v44 = vpop.f32.mrb[26].mxu0 }
 0x196   :  { %v2210_v33 = vadd.f32 %v2209_v43, %v2208_v32  ;;  %v2211_v34 = vpop.f32.mrb[26].mxu1  ;;  %v2172_v35 = vpop.f32.mrb[27].mxu0 }
 0x197   :  { %v3012_v45 = vmax.f32 %v633_v40, %v1023_v41  ;;  %v943_v7 = vadd.f32 %v2170_v42, %v2980_v12  ;;  %v2173_v46 = vadd.f32 %v2172_v35, %v2171_v44  ;;  %v2212_v47 = vpop.f32.mrb[27].mxu1 }
 0x198   :  { %v2213_v48 = vadd.f32 %v2212_v47, %v2211_v34 }
 0x199   :  { %v1007_v57 = vadd.f32 %v2210_v33, %v943_v7  ;;  %v946_v58 = vadd.f32 %v2173_v46, %v2986_v28 }
 0x19b   :  { %v1024_v22 = vmax.f32 %v1007_v57, 0.0  ;;  %v1010_v60 = vadd.f32 %v2213_v48, %v946_v58  ;;  %v2174_v49 = vpop.f32.mrb[28].mxu0 }
 0x19c   :  { %v2214_v9 = vpop.f32.mrb[28].mxu1  ;;  %v2175_v8 = vpop.f32.mrb[29].mxu0 }
 0x19d   :  { %v3018_v52 = vmax.f32 %v634_v59, %v1024_v22  ;;  %v1025_v53 = vmax.f32 %v1010_v60, 0.0  ;;  %v2176_v54 = vadd.f32 %v2175_v8, %v2174_v49  ;;  %v2215_v55 = vpop.f32.mrb[29].mxu1  ;;  %v2177_v56 = vpop.f32.mrb[30].mxu0 }
 0x19e   :  { %v2216_v61 = vadd.f32 %v2215_v55, %v2214_v9  ;;  %v2217_v62 = vpop.f32.mrb[30].mxu1  ;;  %v2178_v63 = vpop.f32.mrb[31].mxu0 }
 0x19f   :  { %v3020_v0 = vmax.f32 %v635_v51, %v1025_v53  ;;  %v951_v30 = vadd.f32 %v2176_v54, %v2993_v37  ;;  %v2218_v3 = vpop.f32.mrb[31].mxu1 }
 0x1a1   :  { %v1015_v5 = vadd.f32 %v2216_v61, %v951_v30 }
 0x1a3   :  { %v1026_v14 = vmax.f32 %v1015_v5, 0.0  ;;  %v2236_v15 = vpop.f32.mrb[32].mxu0 }
 0x1a4   :  { %v2276_v31 = vpop.f32.mrb[32].mxu1  ;;  %v2237_v16 = vpop.f32.mrb[33].mxu0 }
 0x1a5   :  { %v3024_v17 = vmax.f32 %v636_v13, %v1026_v14  ;;  %v2238_v18 = vadd.f32 %v2237_v16, %v2236_v15  ;;  %v2277_v50 = vpop.f32.mrb[33].mxu1  ;;  %v2239_v20 = vpop.f32.mrb[34].mxu0 }
 0x1a6   :  { %v2278_v21 = vadd.f32 %v2277_v50, %v2276_v31  ;;  %v2279_v23 = vpop.f32.mrb[34].mxu1  ;;  %v2240_v24 = vpop.f32.mrb[35].mxu0 }
 0x1a7   :  { %v1324_v25 = vadd.f32 %v2238_v18, %v2963_v6  ;;  %v2241_v26 = vadd.f32 %v2240_v24, %v2239_v20  ;;  %v2280_v1 = vpop.f32.mrb[35].mxu1 }
 0x1a8   :  { %v2281_v27 = vadd.f32 %v2280_v1, %v2279_v23 }
 0x1a9   :  { %v3027_v29 = vadd.f32 %v2278_v21, %v1324_v25  ;;  %v1327_v36 = vadd.f32 %v2241_v26, %v2968_v10 }
 0x1ab   :  { %v3030_v32 = vadd.f32 %v2281_v27, %v1327_v36  ;;  %v2242_v38 = vpop.f32.mrb[36].mxu0 }
 0x1ac   :  { %v2282_v40 = vpop.f32.mrb[36].mxu1  ;;  %v2243_v41 = vpop.f32.mrb[37].mxu0 }
 0x1ad   :  { %v2244_v42 = vadd.f32 %v2243_v41, %v2242_v38  ;;  %v2283_v43 = vpop.f32.mrb[37].mxu1  ;;  %v2245_v44 = vpop.f32.mrb[38].mxu0 }
 0x1ae   :  { %v2284_v33 = vadd.f32 %v2283_v43, %v2282_v40  ;;  %v2285_v34 = vpop.f32.mrb[38].mxu1  ;;  %v2246_v35 = vpop.f32.mrb[39].mxu0 }
 0x1af   :  { %v1332_v7 = vadd.f32 %v2244_v42, %v2973_v4  ;;  %v2247_v46 = vadd.f32 %v2246_v35, %v2245_v44  ;;  %v2286_v47 = vpop.f32.mrb[39].mxu1 }
 0x1b0   :  { %v2287_v48 = vadd.f32 %v2286_v47, %v2285_v34  ;;  %v1417_v47 = vmax.f32 %v3027_v29, 0.0 }
 0x1b1   :  { %v3033_v57 = vadd.f32 %v2284_v33, %v1332_v7  ;;  %v1335_v58 = vadd.f32 %v2247_v46, %v2978_v11 }
 0x1b3   :  { %v3036_v59 = vadd.f32 %v2287_v48, %v1335_v58  ;;  %v2248_v22 = vpop.f32.mrb[40].mxu0 }
 0x1b4   :  { %v2288_v60 = vpop.f32.mrb[40].mxu1  ;;  %v2249_v49 = vpop.f32.mrb[41].mxu0 }
 0x1b5   :  { %v2250_v9 = vadd.f32 %v2249_v49, %v2248_v22  ;;  %v2289_v8 = vpop.f32.mrb[41].mxu1  ;;  %v2251_v51 = vpop.f32.mrb[42].mxu0 }
 0x1b6   :  { %v2290_v53 = vadd.f32 %v2289_v8, %v2288_v60  ;;  %v2291_v54 = vpop.f32.mrb[42].mxu1  ;;  %v2252_v55 = vpop.f32.mrb[43].mxu0 }
 0x1b7   :  { %v1340_v56 = vadd.f32 %v2250_v9, %v2980_v12  ;;  %v2253_v61 = vadd.f32 %v2252_v55, %v2251_v51  ;;  %v2292_v62 = vpop.f32.mrb[43].mxu1  ;;  %v1418_v9 = vmax.f32 %v3030_v32, 0.0 }
 0x1b8   :  { %v2293_v63 = vadd.f32 %v2292_v62, %v2291_v54 }
 0x1b9   :  { %v3039_v30 = vadd.f32 %v2290_v53, %v1340_v56  ;;  %v1343_v3 = vadd.f32 %v2253_v61, %v2986_v28 }
 0x1bb   :  { %v3042_v5 = vadd.f32 %v2293_v63, %v1343_v3  ;;  %v2254_v13 = vpop.f32.mrb[44].mxu0 }
 0x1bc   :  { %v2294_v14 = vpop.f32.mrb[44].mxu1  ;;  %v2255_v15 = vpop.f32.mrb[45].mxu0 }
 0x1bd   :  { %v2256_v31 = vadd.f32 %v2255_v15, %v2254_v13  ;;  %v2295_v16 = vpop.f32.mrb[45].mxu1  ;;  %v2257_v18 = vpop.f32.mrb[46].mxu0 }
 0x1be   :  { %v2296_v50 = vadd.f32 %v2295_v16, %v2294_v14  ;;  %v2297_v20 = vpop.f32.mrb[46].mxu1  ;;  %v2258_v21 = vpop.f32.mrb[47].mxu0  ;;  %v1419_v16 = vmax.f32 %v3033_v57, 0.0 }
 0x1bf   :  { %v1348_v23 = vadd.f32 %v2256_v31, %v2993_v37  ;;  %v2298_v24 = vpop.f32.mrb[47].mxu1 }
 0x1c1   :  { %v3045_v25 = vadd.f32 %v2296_v50, %v1348_v23  ;;  %v1420_v23 = vmax.f32 %v3036_v59, 0.0 }
 0x1c3   :  { %v2316_v26 = vpop.f32.mrb[48].mxu0 }
 0x1c4   :  { %v2356_v1 = vpop.f32.mrb[48].mxu1  ;;  %v2317_v27 = vpop.f32.mrb[49].mxu0 }
 0x1c5   :  { %v2318_v36 = vadd.f32 %v2317_v27, %v2316_v26  ;;  %v2357_v38 = vpop.f32.mrb[49].mxu1  ;;  %v2319_v40 = vpop.f32.mrb[50].mxu0 }
 0x1c6   :  { %v2358_v41 = vadd.f32 %v2357_v38, %v2356_v1  ;;  %v2359_v42 = vpop.f32.mrb[50].mxu1  ;;  %v2320_v43 = vpop.f32.mrb[51].mxu0 }
 0x1c7   :  { %v1714_v44 = vadd.f32 %v2318_v36, %v2963_v6  ;;  %v2321_v33 = vadd.f32 %v2320_v43, %v2319_v40  ;;  %v2360_v34 = vpop.f32.mrb[51].mxu1 }
 0x1c8   :  { %v2361_v35 = vadd.f32 %v2360_v34, %v2359_v42 }
 0x1c9   :  { %v1778_v7 = vadd.f32 %v2358_v41, %v1714_v44  ;;  %v1717_v46 = vadd.f32 %v2321_v33, %v2968_v10 }
 0x1cb   :  { %v1807_v48 = vmax.f32 %v1778_v7, 0.0  ;;  %v1781_v58 = vadd.f32 %v2361_v35, %v1717_v46  ;;  %v2322_v22 = vpop.f32.mrb[52].mxu0  ;;  %v1421_v7 = vmax.f32 %v3039_v30, 0.0 }
 0x1cc   :  { %v2362_v60 = vpop.f32.mrb[52].mxu1  ;;  %v2323_v49 = vpop.f32.mrb[53].mxu0 }
 0x1cd   :  { %v1814_v8 = vmax.f32 %v1417_v47, %v1807_v48  ;;  %v1808_v51 = vmax.f32 %v1781_v58, 0.0  ;;  %v2324_v53 = vadd.f32 %v2323_v49, %v2322_v22  ;;  %v2363_v54 = vpop.f32.mrb[53].mxu1  ;;  %v2325_v6 = vpop.f32.mrb[54].mxu0 }
 0x1ce   :  { %v2364_v55 = vadd.f32 %v2363_v54, %v2362_v60  ;;  %v2365_v56 = vpop.f32.mrb[54].mxu1  ;;  %v2326_v61 = vpop.f32.mrb[55].mxu0 }
 0x1cf   :  { %v1821_v62 = vmax.f32 %v3001_v2, %v1814_v8  ;;  %v1815_v10 = vmax.f32 %v1418_v9, %v1808_v51  ;;  %v1722_v29 = vadd.f32 %v2324_v53, %v2973_v4  ;;  %v2327_v63 = vadd.f32 %v2326_v61, %v2325_v6  ;;  %v2366_v3 = vpop.f32.mrb[55].mxu1 }
 0x1d0   :  { %v2367_v13 = vadd.f32 %v2366_v3, %v2365_v56 }
 0x1d1   :  { %v2053_v14 = vpack.c.bf16 %v1821_v62, %v1821_v62  ;;  %v1822_v32 = vmax.f32 %v3004_v19, %v1815_v10  ;;  %v1786_v15 = vadd.f32 %v2364_v55, %v1722_v29  ;;  %v1725_v31 = vadd.f32 %v2327_v63, %v2978_v11 }
 0x1d2   :  { %v1423_v62 = vmax.f32 %v3045_v25, 0.0 }
 0x1d3   :  { %1858 = vst.msk [vmem:[#allocation13] sm:$0xf] %vm1857_vm2, %v2053_v14  ;;  %v2054_v18 = vpack.c.bf16 %v1822_v32, %v1822_v32  ;;  %v1809_v50 = vmax.f32 %v1786_v15, 0.0  ;;  %v1789_v2 = vadd.f32 %v2367_v13, %v1725_v31  ;;  %v2328_v20 = vpop.f32.mrb[56].mxu0 }
 0x1d4   :  { %v2368_v21 = vpop.f32.mrb[56].mxu1  ;;  %v2329_v4 = vpop.f32.mrb[57].mxu0 }
 0x1d5   :  { %1859 = vst.msk [vmem:[#allocation13 + $0x4] sm:$0xf] %vm1857_vm2, %v2054_v18  ;;  %v1816_v24 = vmax.f32 %v1419_v16, %v1809_v50  ;;  %v1810_v26 = vmax.f32 %v1789_v2, 0.0  ;;  %v2330_v19 = vadd.f32 %v2329_v4, %v2328_v20  ;;  %v2369_v1 = vpop.f32.mrb[57].mxu1  ;;  %v2331_v27 = vpop.f32.mrb[58].mxu0 }
 0x1d6   :  { %v2370_v11 = vadd.f32 %v2369_v1, %v2368_v21  ;;  %v2371_v36 = vpop.f32.mrb[58].mxu1  ;;  %v2332_v57 = vpop.f32.mrb[59].mxu0 }
 0x1d7   :  { %v1823_v38 = vmax.f32 %v3009_v39, %v1816_v24  ;;  %v1817_v40 = vmax.f32 %v1420_v23, %v1810_v26  ;;  %v1730_v41 = vadd.f32 %v2330_v19, %v2980_v12  ;;  %v2333_v42 = vadd.f32 %v2332_v57, %v2331_v27  ;;  %v2372_v43 = vpop.f32.mrb[59].mxu1 }
 0x1d8   :  { %v2373_v44 = vadd.f32 %v2372_v43, %v2371_v36  ;;  %v1422_v12 = vmax.f32 %v3042_v5, 0.0 }
 0x1d9   :  { %v2055_v33 = vpack.c.bf16 %v1823_v38, %v1823_v38  ;;  %v1824_v59 = vmax.f32 %v3012_v45, %v1817_v40  ;;  %v1794_v34 = vadd.f32 %v2370_v11, %v1730_v41  ;;  %v1733_v35 = vadd.f32 %v2333_v42, %v2986_v28 }
 0x1db   :  { %1860 = vst.msk [vmem:[#allocation13 + $0x8] sm:$0xf] %vm1857_vm2, %v2055_v33  ;;  %v2056_v46 = vpack.c.bf16 %v1824_v59, %v1824_v59  ;;  %v1811_v47 = vmax.f32 %v1794_v34, 0.0  ;;  %v1797_v48 = vadd.f32 %v2373_v44, %v1733_v35  ;;  %v2334_v39 = vpop.f32.mrb[60].mxu0 }
 0x1dc   :  { %v2374_v58 = vpop.f32.mrb[60].mxu1  ;;  %v2335_v22 = vpop.f32.mrb[61].mxu0 }
 0x1dd   :  { %1861 = vst.msk [vmem:[#allocation13 + $0xc] sm:$0xf] %vm1857_vm2, %v2056_v46  ;;  %v1818_v60 = vmax.f32 %v1421_v7, %v1811_v47  ;;  %v1812_v49 = vmax.f32 %v1797_v48, 0.0  ;;  %v2336_v45 = vadd.f32 %v2335_v22, %v2334_v39  ;;  %v2375_v9 = vpop.f32.mrb[61].mxu1  ;;  %v2337_v8 = vpop.f32.mrb[62].mxu0 }
 0x1de   :  { %v2376_v28 = vadd.f32 %v2375_v9, %v2374_v58  ;;  %v2377_v51 = vpop.f32.mrb[62].mxu1  ;;  %v2338_v30 = vpop.f32.mrb[63].mxu0 }
 0x1df   :  { %v1825_v53 = vmax.f32 %v3018_v52, %v1818_v60  ;;  %v1819_v54 = vmax.f32 %v1422_v12, %v1812_v49  ;;  %v1738_v6 = vadd.f32 %v2336_v45, %v2993_v37  ;;  %v2378_v55 = vpop.f32.mrb[63].mxu1 }
 0x1e1   :  { %v2057_v56 = vpack.c.bf16 %v1825_v53, %v1825_v53  ;;  %v1826_v61 = vmax.f32 %v3020_v0, %v1819_v54  ;;  %v1802_v5 = vadd.f32 %v2376_v28, %v1738_v6 }
 0x1e3   :  { %1862 = vst.msk [vmem:[#allocation13 + $0x10] sm:$0xf] %vm1857_vm2, %v2057_v56  ;;  %v2058_v10 = vpack.c.bf16 %v1826_v61, %v1826_v61  ;;  %v1813_v29 = vmax.f32 %v1802_v5, 0.0 }
 0x1e5   :  { %1863 = vst.msk [vmem:[#allocation13 + $0x14] sm:$0xf] %vm1857_vm2, %v2058_v10  ;;  %v1820_v63 = vmax.f32 %v1423_v62, %v1813_v29 }
 0x1e7   :  { %v1827_v52 = vmax.f32 %v3024_v17, %v1820_v63 }
 0x1e9   :  { %v2059_v37 = vpack.c.bf16 %v1827_v52, %v1827_v52 }
 0x1eb   :  { %1865 = vst.msk [vmem:[#allocation13 + $0x18] sm:$0x1] %vm1864_vm3, %v2059_v37 }
 0x1ec   :  { %2693 = shalt.err (!%p2690_p10)
}
 0x1ed   :  { %s2694_s26 = scalar_lea.hbm %s3095_s6, 448 }
 0x1ee   :  { %p2695_p11 = scmp.ne.s32.totalorder %s3095_s6, %s2694_s26  ;;  %p2698_p12 = scmp.lt.u32.totalorder %s2694_s26, %s3095_s6 }
 0x1f0   :  { %p2700_p13 = pnand %p2698_p12, %p2695_p11 }
 0x1f2   :  { %2703 = shalt.err (!%p2700_p13)
}
 0x1f3   :  { %1877 = dma.vmem_to_hbm [thread:$0]  %s1872_s24, 448, %s3095_s6, [#allocation4], %s2719_s22, %s2719_s22, %s2720_s23  }
 0x1f4   :  { %2712 = dma.done.wait [#allocation4], 448  }
 0x1f5   :  { %2713 = vsyncadd [#allocation4], 4294966848 }
 0x1f6   :  { %1881 = vsyncpa [#allocation3], 1 }
 0x1f7   :  { %1882 = vsyncpa [#allocation6], 1 }
 0x1f8   :  { %1883 = vsyncpa [#allocation9], 1 }
 0x1f9   :  { %1884 = vsyncpa [#allocation12], 1 }
 0x1fa   :  { %1885 = vsyncpa [#allocation4], 1 }

// kernel: net_forward.5
= control target key start
LH: loop header
LB: loop body
LE: loop exit
PB: predicated region body
PF: predicated region fallthrough
CT: control target
= control target key end

     0   :  { %10 = vsyncpa [#allocation3], 0  ;;  %s5828_s0 = inlined_call_operand.hbm [shape: bf16[800,2], index: 0, kind: input, shape index: {}]   ;;  %s5829_s1 = inlined_call_operand.hbm [shape: bf16[500,800], index: 1, kind: input, shape index: {}]   ;;  %s5830_s2 = inlined_call_operand.hbm [shape: f32[500,1], index: 2, kind: input, shape index: {}]   ;;  %s5831_s3 = inlined_call_operand.hbm [shape: bf16[10,500], index: 3, kind: input, shape index: {}]   ;;  %s5832_s4 = inlined_call_operand.hbm [shape: f32[10,1], index: 4, kind: input, shape index: {}]   ;;  %s5833_s5 = inlined_call_operand.hbm [shape: f32[10,2], index: 5, kind: output, shape index: {}]  }
   0x1   :  { %11 = vsyncpa [#allocation6], 0 }
   0x2   :  { %12 = vsyncpa [#allocation9], 0 }
   0x3   :  { %13 = vsyncpa [#allocation4], 0  ;;  %s5023_s18 = smov [#allocation5]   ;;  %s4883_s22 = scalar_lea.hbm %s5829_s1, 28224 }
   0x4   :  { %s31_s19 = sshll.u32 %s5023_s18, 4  ;;  %p4884_p0 = scmp.ne.s32.totalorder %s5829_s1, %s4883_s22  ;;  %s32_s19 = int_to_ptr.vmem [resolvable:$true] %s31_s19 }
   0x5   :  { %p4887_p1 = scmp.lt.u32.totalorder %s4883_s22, %s5829_s1 }
   0x7   :  { %p4889_p2 = pnand %p4887_p1, %p4884_p0 }
   0x9   :  { %4892 = shalt.err (!%p4889_p2)
}
   0xa   :  { %s4893_s27 = scalar_lea.vmem %s32_s19, 28224  ;;  %p4898_p4 = scmp.lt.s32.totalorder %s32_s19, %s32_s19 }
   0xb   :  { %p4894_p3 = scmp.ne.s32.totalorder %s32_s19, %s4893_s27  ;;  %p4899_p5 = scmp.lt.s32.totalorder %s4893_s27, %s4893_s27 }
   0xd   :  { %p4900_p6 = por %p4899_p5, %p4898_p4 }
   0xf   :  { %p4901_p7 = pnand %p4900_p6, %p4894_p3 }
  0x11   :  { %4904 = shalt.err (!%p4901_p7)
}
  0x12   :  { %s5024_s28 = smov 448   ;;  %s5025_s29 = smov 28  }
  0x13   :  { %37 = dma.hbm_to_vmem [thread:$0]  %s5829_s1, 28224, %s32_s19, [#allocation6], %s5024_s28, %s5024_s28, %s5025_s29  }
  0x14   :  { %s5026_s7 = smov [#allocation8]   ;;  %s4905_s11 = scalar_lea.hbm %s5831_s3, 512 }
  0x15   :  { %s55_s8 = sshll.u32 %s5026_s7, 4  ;;  %p4906_p8 = scmp.ne.s32.totalorder %s5831_s3, %s4905_s11  ;;  %s56_s8 = int_to_ptr.vmem [resolvable:$true] %s55_s8 }
  0x16   :  { %p4909_p9 = scmp.lt.u32.totalorder %s4905_s11, %s5831_s3 }
  0x18   :  { %p4911_p10 = pnand %p4909_p9, %p4906_p8 }
  0x1a   :  { %4914 = shalt.err (!%p4911_p10)
}
  0x1b   :  { %s4915_s16 = scalar_lea.vmem %s56_s8, 512  ;;  %p4920_p12 = scmp.lt.s32.totalorder %s56_s8, %s56_s8 }
  0x1c   :  { %p4916_p11 = scmp.ne.s32.totalorder %s56_s8, %s4915_s16  ;;  %p4921_p13 = scmp.lt.s32.totalorder %s4915_s16, %s4915_s16 }
  0x1e   :  { %p4922_p0 = por %p4921_p13, %p4920_p12 }
  0x20   :  { %p4923_p1 = pnand %p4922_p0, %p4916_p11 }
  0x22   :  { %4926 = shalt.err (!%p4923_p1)
}
  0x23   :  { %s5027_s1 = smov 256   ;;  %s5028_s17 = smov 16  }
  0x24   :  { %61 = dma.hbm_to_vmem [thread:$0]  %s5831_s3, 512, %s56_s8, [#allocation9], %s5027_s1, %s5027_s1, %s5028_s17  }
  0x25   :  { %s5029_s20 = smov [#allocation2]   ;;  %s4927_s24 = scalar_lea.hbm %s5828_s0, 6400 }
  0x26   :  { %s19_s21 = sshll.u32 %s5029_s20, 4  ;;  %p4928_p2 = scmp.ne.s32.totalorder %s5828_s0, %s4927_s24  ;;  %s20_s21 = int_to_ptr.vmem [resolvable:$true] %s19_s21 }
  0x27   :  { %p4931_p3 = scmp.lt.u32.totalorder %s4927_s24, %s5828_s0 }
  0x29   :  { %p4933_p4 = pnand %p4931_p3, %p4928_p2 }
  0x2b   :  { %4936 = shalt.err (!%p4933_p4)
}
  0x2c   :  { %s4937_s29 = scalar_lea.vmem %s20_s21, 6400  ;;  %p4942_p6 = scmp.lt.s32.totalorder %s20_s21, %s20_s21 }
  0x2d   :  { %p4938_p5 = scmp.ne.s32.totalorder %s20_s21, %s4937_s29  ;;  %p4943_p7 = scmp.lt.s32.totalorder %s4937_s29, %s4937_s29 }
  0x2f   :  { %p4944_p8 = por %p4943_p7, %p4942_p6 }
  0x31   :  { %p4945_p9 = pnand %p4944_p8, %p4938_p5 }
  0x33   :  { %4948 = shalt.err (!%p4945_p9)
}
  0x34   :  { %s5030_s3 = smov 64   ;;  %s5031_s30 = smov 4  }
  0x35   :  { %25 = dma.hbm_to_vmem [thread:$0]  %s5828_s0, 6400, %s20_s21, [#allocation3], %s5030_s3, %s5030_s3, %s5031_s30  }
  0x36   :  { %s5032_s8 = smov [#allocation7]   ;;  %s4949_s12 = scalar_lea.hbm %s5830_s2, 8064 }
  0x37   :  { %s43_s9 = sshll.u32 %s5032_s8, 4  ;;  %p4950_p10 = scmp.ne.s32.totalorder %s5830_s2, %s4949_s12  ;;  %s44_s9 = int_to_ptr.vmem [resolvable:$true] %s43_s9 }
  0x38   :  { %p4953_p11 = scmp.lt.u32.totalorder %s4949_s12, %s5830_s2 }
  0x3a   :  { %p4955_p12 = pnand %p4953_p11, %p4950_p10 }
  0x3c   :  { %4958 = shalt.err (!%p4955_p12)
}
  0x3d   :  { %s4959_s1 = scalar_lea.vmem %s44_s9, 8064  ;;  %p4964_p0 = scmp.lt.s32.totalorder %s44_s9, %s44_s9 }
  0x3e   :  { %p4960_p13 = scmp.ne.s32.totalorder %s44_s9, %s4959_s1  ;;  %p4965_p1 = scmp.lt.s32.totalorder %s4959_s1, %s4959_s1 }
  0x40   :  { %p4966_p2 = por %p4965_p1, %p4964_p0 }
  0x42   :  { %p4967_p3 = pnand %p4966_p2, %p4960_p13 }
  0x44   :  { %4970 = shalt.err (!%p4967_p3)
}
  0x45   :  { %s5033_s0 = smov 128   ;;  %s5034_s17 = smov 8  }
  0x46   :  { %49 = dma.hbm_to_vmem [thread:$0]  %s5830_s2, 8064, %s44_s9, [#allocation6], %s5033_s0, %s5033_s0, %s5034_s17  }
  0x47   :  { %s5035_s20 = smov [#allocation10]   ;;  %s4971_s24 = scalar_lea.hbm %s5832_s4, 256 }
  0x48   :  { %s67_s21 = sshll.u32 %s5035_s20, 4  ;;  %p4972_p4 = scmp.ne.s32.totalorder %s5832_s4, %s4971_s24  ;;  %s68_s21 = int_to_ptr.vmem [resolvable:$true] %s67_s21 }
  0x49   :  { %p4975_p5 = scmp.lt.u32.totalorder %s4971_s24, %s5832_s4 }
  0x4b   :  { %p4977_p6 = pnand %p4975_p5, %p4972_p4 }
  0x4d   :  { %4980 = shalt.err (!%p4977_p6)
}
  0x4e   :  { %s4981_s29 = scalar_lea.vmem %s68_s21, 256  ;;  %p4986_p8 = scmp.lt.s32.totalorder %s68_s21, %s68_s21 }
  0x4f   :  { %p4982_p7 = scmp.ne.s32.totalorder %s68_s21, %s4981_s29  ;;  %p4987_p9 = scmp.lt.s32.totalorder %s4981_s29, %s4981_s29 }
  0x51   :  { %p4988_p10 = por %p4987_p9, %p4986_p8 }
  0x53   :  { %p4989_p11 = pnand %p4988_p10, %p4982_p7 }
  0x55   :  { %4992 = shalt.err (!%p4989_p11)
}
  0x56   :  { %73 = dma.hbm_to_vmem [thread:$0]  %s5832_s4, 256, %s68_s21, [#allocation9], %s5033_s0, %s5033_s0, %s5034_s17  }
  0x57   :  { %5015 = dma.done.wait [#allocation3], 6400  }
  0x58   :  { %5016 = vsyncadd [#allocation3], 4294960896 }
  0x59   :  { %5017 = dma.done.wait [#allocation6], 36288  }
  0x5a   :  { %5018 = vsyncadd [#allocation6], 4294931008 }
  0x5b   :  { %5019 = dma.done.wait [#allocation9], 768  }
  0x5c   :  { %5020 = vsyncadd [#allocation9], 4294966528  ;;  %v5036_v0 = vmov 0   ;;  %v4504_v1 = vld [vmem:[#allocation2] sm:$0xff]   ;;  %v4506_v3 = vld [vmem:[#allocation2 + $0x8] sm:$0xff]   ;;  %vm2229_vm0 = vcmask 261120  }
  0x5d   :  { %2326 = vmatprep.subr.bf16.mxu1 %v5036_v0  ;;  %2614 = vmatprep.subr.bf16.mxu0 %v5036_v0  ;;  %v5138_v2 = vld [vmem:[#allocation2 + $0x80] sm:$0xff]   ;;  %v5142_v4 = vld [vmem:[#allocation2 + $0x88] sm:$0xff]   ;;  %v4508_v5 = vld [vmem:[#allocation2 + $0x10] sm:$0xff]   ;;  %vm3608_vm1 = vcmask 949248   ;;  %vm3612_vm2 = vcmask 1041408   ;;  %vm3698_vm3 = vcmask 15360  }
  0x5e   :  { %4502 = vset.pattern.permute.xlu0 %v5036_v0  ;;  %4503 = vset.pattern.permute.xlu1 %v5036_v0  ;;  %v5147_v6 = vld [vmem:[#allocation2 + $0x90] sm:$0xff]   ;;  %v4510_v7 = vld [vmem:[#allocation2 + $0x18] sm:$0xff]   ;;  %v4512_v9 = vld [vmem:[#allocation2 + $0x20] sm:$0xff]   ;;  %vm3700_vm4 = vcmask 9216   ;;  %s5037_s4 = smov [#allocation11]  }
  0x5f   :  { %2327 = vmatpush1.bf16.msra.mxu1 %v4504_v1  ;;  %2615 = vmatpush1.bf16.msra.mxu0 %v5138_v2  ;;  %v5152_v8 = vld [vmem:[#allocation2 + $0x98] sm:$0xff]   ;;  %v5157_v10 = vld [vmem:[#allocation2 + $0xa0] sm:$0xff]   ;;  %v4514_v11 = vld [vmem:[#allocation2 + $0x28] sm:$0xff]   ;;  %s3735_s30 = sshll.u32 %s5037_s4, 4  ;;  %s3736_s30 = int_to_ptr.vmem [resolvable:$true] %s3735_s30 }
  0x60   :  { %2328 = vmatprep.subr.bf16.mxu1 %v5036_v0  ;;  %2616 = vmatprep.subr.bf16.mxu0 %v5036_v0  ;;  %v5162_v12 = vld [vmem:[#allocation2 + $0xa8] sm:$0xff]   ;;  %v4516_v13 = vld [vmem:[#allocation2 + $0x30] sm:$0xff]   ;;  %v4518_v15 = vld [vmem:[#allocation2 + $0x38] sm:$0xff]   ;;  %s4993_s6 = scalar_lea.vmem %s3736_s30, 256  ;;  %p4998_p13 = scmp.lt.s32.totalorder %s3736_s30, %s3736_s30 }
  0x61   :  { %v5167_v14 = vld [vmem:[#allocation2 + $0xb0] sm:$0xff]   ;;  %v5172_v16 = vld [vmem:[#allocation2 + $0xb8] sm:$0xff]   ;;  %v4520_v17 = vld [vmem:[#allocation2 + $0x40] sm:$0xff]   ;;  %p4994_p12 = scmp.ne.s32.totalorder %s3736_s30, %s4993_s6  ;;  %p4999_p0 = scmp.lt.s32.totalorder %s4993_s6, %s4993_s6 }
  0x62   :  { %v5177_v18 = vld [vmem:[#allocation2 + $0xc0] sm:$0xff]   ;;  %v4538_v19 = vld [vmem:[#allocation5 + $0x4] ss:$28 sps:$4 sm:$0xff]   ;;  %v4522_v20 = vld [vmem:[#allocation2 + $0x48] sm:$0xff]  }
  0x63   :  { %2329 = vmatpush1.bf16.msra.mxu1 %v4506_v3  ;;  %2617 = vmatpush1.bf16.msra.mxu0 %v5142_v4  ;;  %v4541_v21 = vld [vmem:[#allocation5 + $0xc] ss:$28 sps:$4 sm:$0xff]   ;;  %v5182_v22 = vld [vmem:[#allocation2 + $0xc8] sm:$0xff]   ;;  %v4524_v23 = vld [vmem:[#allocation2 + $0x50] sm:$0xff]   ;;  %p5000_p1 = por %p4999_p0, %p4998_p13 }
  0x64   :  { %2330 = vmatprep.subr.bf16.mxu1 %v5036_v0  ;;  %2618 = vmatprep.subr.bf16.mxu0 %v5036_v0  ;;  %v5187_v24 = vld [vmem:[#allocation2 + $0xd0] sm:$0xff]   ;;  %v4526_v25 = vld [vmem:[#allocation2 + $0x58] sm:$0xff]   ;;  %v4528_v27 = vld [vmem:[#allocation2 + $0x60] sm:$0xff]  }
  0x65   :  { %2358 = vmatprep.mubr.bf16.mxu1 %v4538_v19  ;;  %2646 = vmatprep.mubr.bf16.mxu0 %v4541_v21  ;;  %v5192_v26 = vld [vmem:[#allocation2 + $0xd8] sm:$0xff]   ;;  %v5197_v28 = vld [vmem:[#allocation2 + $0xe0] sm:$0xff]   ;;  %v4530_v29 = vld [vmem:[#allocation2 + $0x68] sm:$0xff]   ;;  %p5001_p2 = pnand %p5000_p1, %p4994_p12 }
  0x66   :  { %v5202_v30 = vld [vmem:[#allocation2 + $0xe8] sm:$0xff]   ;;  %v4532_v31 = vld [vmem:[#allocation2 + $0x70] sm:$0xff]   ;;  %v4534_v33 = vld [vmem:[#allocation2 + $0x78] sm:$0xff]  }
  0x67   :  { %2331 = vmatpush1.bf16.msra.mxu1 %v4508_v5  ;;  %2619 = vmatpush1.bf16.msra.mxu0 %v5147_v6  ;;  %v5207_v32 = vld [vmem:[#allocation2 + $0xf0] sm:$0xff]   ;;  %v5212_v34 = vld [vmem:[#allocation2 + $0xf8] sm:$0xff]   ;;  %v4542_v37 = vld [vmem:[#allocation5 + $0x3c] ss:$28 sps:$4 sm:$0xff]  }
  0x68   :  { %2332 = vmatprep.subr.bf16.mxu1 %v5036_v0  ;;  %2620 = vmatprep.subr.bf16.mxu0 %v5036_v0  ;;  %v4536_v35 = vld [vmem:[#allocation5] ss:$28 sps:$4 sm:$0xff]   ;;  %v4539_v36 = vld [vmem:[#allocation5 + $0x8] ss:$28 sps:$4 sm:$0xff]   ;;  %v4554_v39 = vld [vmem:[#allocation2 + $0x100] sm:$0xff]  }
  0x69   :  { %v4544_v38 = vld [vmem:[#allocation5 + $0x44] ss:$28 sps:$4 sm:$0xff]   ;;  %v4567_v41 = vld [vmem:[#allocation2 + $0x108] sm:$0xff]   ;;  %v4548_v45 = vld [vmem:[#allocation5 + $0x74] ss:$28 sps:$4 sm:$0xff]  }
  0x6a   :  { %v458_v40 = vld [vmem:[#allocation7 + $0x80] sm:$0xff]  ;;  %v4546_v43 = vld [vmem:[#allocation5 + $0x38] ss:$28 sps:$4 sm:$0xff]   ;;  %v4547_v44 = vld [vmem:[#allocation5 + $0x40] ss:$28 sps:$4 sm:$0xff]  }
  0x6b   :  { %2333 = vmatpush1.bf16.msra.mxu1 %v4510_v7  ;;  %2621 = vmatpush1.bf16.msra.mxu0 %v5152_v8  ;;  %v442_v42 = vld [vmem:[#allocation7] sm:$0xff]  ;;  %v459_v46 = vld [vmem:[#allocation7 + $0x88] sm:$0xff]  ;;  %v4550_v47 = vld [vmem:[#allocation5 + $0x7c] ss:$28 sps:$4 sm:$0xff]  }
  0x6c   :  { %2334 = vmatprep.subr.bf16.mxu1 %v5036_v0  ;;  %2622 = vmatprep.subr.bf16.mxu0 %v5036_v0  ;;  %v4580_v48 = vld [vmem:[#allocation2 + $0x110] sm:$0xff]   ;;  %v443_v49 = vld [vmem:[#allocation7 + $0x8] sm:$0xff]  ;;  %v460_v50 = vld [vmem:[#allocation7 + $0x90] sm:$0xff] }
  0x6d   :  { %587 = vperm.xlu0 %4502, %v458_v40   ;;  %507 = vperm.xlu1 %4503, %v442_v42   ;;  %v4552_v51 = vld [vmem:[#allocation5 + $0x70] ss:$28 sps:$4 sm:$0xff]   ;;  %v4553_v53 = vld [vmem:[#allocation5 + $0x78] ss:$28 sps:$4 sm:$0xff]   ;;  %v461_v55 = vld [vmem:[#allocation7 + $0x98] sm:$0xff] }
  0x6e   :  { %v4587_v52 = vld [vmem:[#allocation2 + $0x118] sm:$0xff]   ;;  %v444_v56 = vld [vmem:[#allocation7 + $0x10] sm:$0xff]  ;;  %v445_v59 = vld [vmem:[#allocation7 + $0x18] sm:$0xff] }
  0x6f   :  { %2335 = vmatpush1.bf16.msra.mxu1 %v4512_v9  ;;  %2623 = vmatpush1.bf16.msra.mxu0 %v5157_v10  ;;  %v4555_v54 = vld [vmem:[#allocation5 + $0xac] ss:$28 sps:$4 sm:$0xff]   ;;  %v4557_v57 = vld [vmem:[#allocation5 + $0xb4] ss:$28 sps:$4 sm:$0xff]   ;;  %v4613_v61 = vld [vmem:[#allocation2 + $0x128] sm:$0xff]  }
  0x70   :  { %2336 = vmatprep.subr.bf16.mxu1 %v5036_v0  ;;  %2624 = vmatprep.subr.bf16.mxu0 %v5036_v0  ;;  %v4600_v58 = vld [vmem:[#allocation2 + $0x120] sm:$0xff]   ;;  %v462_v60 = vld [vmem:[#allocation7 + $0xa0] sm:$0xff]  ;;  %v449_v21 = vld [vmem:[#allocation7 + $0x38] sm:$0xff] }
  0x71   :  { %592 = vperm.xlu0 %4502, %v459_v46   ;;  %512 = vperm.xlu1 %4503, %v443_v49   ;;  %v4559_v62 = vld [vmem:[#allocation5 + $0xa8] ss:$28 sps:$4 sm:$0xff]   ;;  %v4560_v63 = vld [vmem:[#allocation5 + $0xb0] ss:$28 sps:$4 sm:$0xff]   ;;  %v464_v7 = vld [vmem:[#allocation7 + $0xb0] sm:$0xff] }
  0x72   :  { %v4561_v1 = vld [vmem:[#allocation5 + $0xe4] ss:$28 sps:$4 sm:$0xff]   ;;  %v4563_v3 = vld [vmem:[#allocation5 + $0xec] ss:$28 sps:$4 sm:$0xff]   ;;  %v4579_v40 = vld [vmem:[#allocation5 + $0x158] ss:$28 sps:$4 sm:$0xff]  }
  0x73   :  { %2337 = vmatpush1.bf16.msra.mxu1 %v4514_v11  ;;  %2625 = vmatpush1.bf16.msra.mxu0 %v5162_v12  ;;  %v4620_v5 = vld [vmem:[#allocation2 + $0x130] sm:$0xff]   ;;  %v4633_v9 = vld [vmem:[#allocation2 + $0x138] sm:$0xff]   ;;  %v452_v42 = vld [vmem:[#allocation7 + $0x50] sm:$0xff] }
  0x74   :  { %2338 = vmatprep.subr.bf16.mxu1 %v5036_v0  ;;  %2626 = vmatprep.subr.bf16.mxu0 %v5036_v0  ;;  %v4565_v11 = vld [vmem:[#allocation5 + $0xe0] ss:$28 sps:$4 sm:$0xff]   ;;  %v470_v46 = vld [vmem:[#allocation7 + $0xe0] sm:$0xff] }
  0x75   :  { %597 = vperm.xlu0 %4502, %v460_v50   ;;  %602 = vperm.xlu1 %4503, %v461_v55   ;;  %v4570_v19 = vld [vmem:[#allocation5 + $0x124] ss:$28 sps:$4 sm:$0xff]  }
  0x76   :  { %v4588_v49 = vld [vmem:[#allocation5 + $0x1c4] ss:$28 sps:$4 sm:$0xff]  }
  0x77   :  { %2339 = vmatpush1.bf16.msra.mxu1 %v4516_v13  ;;  %2627 = vmatpush1.bf16.msra.mxu0 %v5167_v14  ;;  %v465_v13 = vld [vmem:[#allocation7 + $0xb8] sm:$0xff]  ;;  %v454_v50 = vld [vmem:[#allocation7 + $0x60] sm:$0xff] }
  0x78   :  { %2340 = vmatprep.subr.bf16.mxu1 %v5036_v0  ;;  %2628 = vmatprep.subr.bf16.mxu0 %v5036_v0  ;;  %v4592_v55 = vld [vmem:[#allocation5 + $0x1c0] ss:$28 sps:$4 sm:$0xff]  }
  0x79   :  { %517 = vperm.xlu0 %4502, %v444_v56   ;;  %522 = vperm.xlu1 %4503, %v445_v59   ;;  %v473_v56 = vld [vmem:[#allocation7 + $0xf8] sm:$0xff] }
  0x7a   :  { %v4596_v59 = vld [vmem:[#allocation5 + $0x204] ss:$28 sps:$4 sm:$0xff]  }
  0x7b   :  { %2341 = vmatpush1.bf16.msra.mxu1 %v4518_v15  ;;  %2629 = vmatpush1.bf16.msra.mxu0 %v5172_v16  ;;  %v4568_v15 = vld [vmem:[#allocation5 + $0x11c] ss:$28 sps:$4 sm:$0xff]  }
  0x7c   :  { %2342 = vmatprep.subr.bf16.mxu1 %v5036_v0  ;;  %2630 = vmatprep.subr.bf16.mxu0 %v5036_v0 }
  0x7d   :  { %607 = vperm.xlu0 %4502, %v462_v60   ;;  %v457_v60 = vld [vmem:[#allocation7 + $0x78] sm:$0xff] }
  0x7f   :  { %2343 = vmatpush1.bf16.msra.mxu1 %v4520_v17  ;;  %2631 = vmatpush1.bf16.msra.mxu0 %v5177_v18  ;;  %v448_v17 = vld [vmem:[#allocation7 + $0x30] sm:$0xff] }
  0x80   :  { %2344 = vmatprep.subr.bf16.mxu1 %v5036_v0  ;;  %2632 = vmatprep.subr.bf16.mxu0 %v5036_v0 }
  0x83   :  { %2345 = vmatpush1.bf16.msra.mxu1 %v4522_v20  ;;  %2633 = vmatpush1.bf16.msra.mxu0 %v5182_v22  ;;  %v4646_v20 = vld [vmem:[#allocation2 + $0x140] sm:$0xff]  }
  0x84   :  { %2346 = vmatprep.subr.bf16.mxu1 %v5036_v0  ;;  %2634 = vmatprep.subr.bf16.mxu0 %v5036_v0 }
  0x87   :  { %2347 = vmatpush1.bf16.msra.mxu1 %v4524_v23  ;;  %2635 = vmatpush1.bf16.msra.mxu0 %v5187_v24  ;;  %v466_v23 = vld [vmem:[#allocation7 + $0xc0] sm:$0xff] }
  0x88   :  { %2348 = vmatprep.subr.bf16.mxu1 %v5036_v0  ;;  %2636 = vmatprep.subr.bf16.mxu0 %v5036_v0 }
  0x8b   :  { %2349 = vmatpush1.bf16.msra.mxu1 %v4526_v25  ;;  %2637 = vmatpush1.bf16.msra.mxu0 %v5192_v26  ;;  %v4572_v25 = vld [vmem:[#allocation5 + $0x118] ss:$28 sps:$4 sm:$0xff]  }
  0x8c   :  { %2350 = vmatprep.subr.bf16.mxu1 %v5036_v0  ;;  %2638 = vmatprep.subr.bf16.mxu0 %v5036_v0 }
  0x8f   :  { %2351 = vmatpush1.bf16.msra.mxu1 %v4528_v27  ;;  %2639 = vmatpush1.bf16.msra.mxu0 %v5197_v28  ;;  %v4574_v27 = vld [vmem:[#allocation5 + $0x154] ss:$28 sps:$4 sm:$0xff]  }
  0x90   :  { %2352 = vmatprep.subr.bf16.mxu1 %v5036_v0  ;;  %2640 = vmatprep.subr.bf16.mxu0 %v5036_v0 }
  0x93   :  { %2353 = vmatpush1.bf16.msra.mxu1 %v4530_v29  ;;  %2641 = vmatpush1.bf16.msra.mxu0 %v5202_v30  ;;  %v467_v29 = vld [vmem:[#allocation7 + $0xc8] sm:$0xff] }
  0x94   :  { %2354 = vmatprep.subr.bf16.mxu1 %v5036_v0  ;;  %2642 = vmatprep.subr.bf16.mxu0 %v5036_v0 }
  0x97   :  { %2355 = vmatpush1.bf16.msra.mxu1 %v4532_v31  ;;  %2643 = vmatpush1.bf16.msra.mxu0 %v5207_v32  ;;  %v450_v31 = vld [vmem:[#allocation7 + $0x40] sm:$0xff] }
  0x98   :  { %2356 = vmatprep.subr.bf16.mxu1 %v5036_v0  ;;  %2644 = vmatprep.subr.bf16.mxu0 %v5036_v0 }
  0x9b   :  { %2357 = vmatpush1.bf16.msra.mxu1 %v4534_v33  ;;  %2645 = vmatpush1.bf16.msra.mxu0 %v5212_v34  ;;  %v4657_v33 = vld [vmem:[#allocation2 + $0x148] sm:$0xff]  }
  0x9c   :  { %4206 = vmatprep.subr.bf16.mxu1 %v5036_v0  ;;  %2902 = vmatprep.subr.bf16.mxu0 %v5036_v0 }
  0x9e   :  { %2359 = vmatmul.mubr.bf16.vlgmr.msra.gmra.mrb[0].mxu1 %v4536_v35  ;;  %2647 = vmatmul.mubr.bf16.vlgmr.msra.gmra.mrb[0].mxu0 %v4539_v36  ;;  %v4576_v35 = vld [vmem:[#allocation5 + $0x15c] ss:$28 sps:$4 sm:$0xff]   ;;  %v451_v36 = vld [vmem:[#allocation7 + $0x48] sm:$0xff] }
  0x9f   :  { %2366 = vmatprep.mubr.bf16.mxu1 %v4542_v37  ;;  %2654 = vmatprep.mubr.bf16.mxu0 %v4544_v38  ;;  %v468_v37 = vld [vmem:[#allocation7 + $0xd0] sm:$0xff]  ;;  %v4666_v38 = vld [vmem:[#allocation2 + $0x150] sm:$0xff]  }
  0xa0   :  { %2903 = vmatpush1.bf16.msra.mxu0 %v4554_v39  ;;  %4222 = vmatpush1.bf16.msra.mxu1 %v5138_v2  ;;  %v463_v2 = vld [vmem:[#allocation7 + $0xa8] sm:$0xff] }
  0xa1   :  { %2904 = vmatprep.subr.bf16.mxu0 %v5036_v0  ;;  %4207 = vmatprep.subr.bf16.mxu1 %v5036_v0  ;;  %v4578_v39 = vld [vmem:[#allocation5 + $0x150] ss:$28 sps:$4 sm:$0xff]  }
  0xa2   :  { %612 = vperm.xlu1 %4503, %v463_v2   ;;  %v490_v2 = vld [vmem:[#allocation7 + $0x180] sm:$0xff] }
  0xa4   :  { %2905 = vmatpush1.bf16.msra.mxu0 %v4567_v41  ;;  %4223 = vmatpush1.bf16.msra.mxu1 %v5142_v4  ;;  %v446_v4 = vld [vmem:[#allocation7 + $0x20] sm:$0xff]  ;;  %v469_v41 = vld [vmem:[#allocation7 + $0xd8] sm:$0xff] }
  0xa5   :  { %2906 = vmatprep.subr.bf16.mxu0 %v5036_v0  ;;  %4208 = vmatprep.subr.bf16.mxu1 %v5036_v0 }
  0xa6   :  { %2367 = vmatmul.mubr.bf16.gmra.mrb[4].mxu1 %v4546_v43  ;;  %2655 = vmatmul.mubr.bf16.gmra.mrb[4].mxu0 %v4547_v44  ;;  %v4583_v43 = vld [vmem:[#allocation5 + $0x194] ss:$28 sps:$4 sm:$0xff]   ;;  %v453_v44 = vld [vmem:[#allocation7 + $0x58] sm:$0xff] }
  0xa7   :  { %2374 = vmatprep.mubr.bf16.mxu1 %v4548_v45  ;;  %2662 = vmatprep.mubr.bf16.mxu0 %v4550_v47  ;;  %v4679_v45 = vld [vmem:[#allocation2 + $0x158] sm:$0xff]  }
  0xa8   :  { %2907 = vmatpush1.bf16.msra.mxu0 %v4580_v48  ;;  %4224 = vmatpush1.bf16.msra.mxu1 %v5147_v6  ;;  %v447_v6 = vld [vmem:[#allocation7 + $0x28] sm:$0xff]  ;;  %v4585_v47 = vld [vmem:[#allocation5 + $0x188] ss:$28 sps:$4 sm:$0xff]  }
  0xa9   :  { %2908 = vmatprep.subr.bf16.mxu0 %v5036_v0  ;;  %4209 = vmatprep.subr.bf16.mxu1 %v5036_v0  ;;  %v4586_v48 = vld [vmem:[#allocation5 + $0x190] ss:$28 sps:$4 sm:$0xff]  }
  0xaa   :  { %527 = vperm.xlu0 %4502, %v446_v4   ;;  %532 = vperm.xlu1 %4503, %v447_v6   ;;  %v4609_v4 = vld [vmem:[#allocation5 + $0x274] ss:$28 sps:$4 sm:$0xff]   ;;  %v4611_v6 = vld [vmem:[#allocation5 + $0x268] ss:$28 sps:$4 sm:$0xff]  }
  0xac   :  { %2909 = vmatpush1.bf16.msra.mxu0 %v4587_v52  ;;  %4225 = vmatpush1.bf16.msra.mxu1 %v5152_v8  ;;  %v4566_v8 = vld [vmem:[#allocation5 + $0xe8] ss:$28 sps:$4 sm:$0xff]  }
  0xad   :  { %2910 = vmatprep.subr.bf16.mxu0 %v5036_v0  ;;  %4210 = vmatprep.subr.bf16.mxu1 %v5036_v0  ;;  %v4590_v52 = vld [vmem:[#allocation5 + $0x1cc] ss:$28 sps:$4 sm:$0xff]  }
  0xae   :  { %2375 = vmatmul.mubr.bf16.gmra.mrb[8].mxu1 %v4552_v51  ;;  %2663 = vmatmul.mubr.bf16.gmra.mrb[8].mxu0 %v4553_v53  ;;  %v4690_v51 = vld [vmem:[#allocation2 + $0x160] sm:$0xff]  }
  0xaf   :  { %2382 = vmatprep.mubr.bf16.mxu1 %v4555_v54  ;;  %2670 = vmatprep.mubr.bf16.mxu0 %v4557_v57  ;;  %v455_v53 = vld [vmem:[#allocation7 + $0x68] sm:$0xff]  ;;  %v472_v54 = vld [vmem:[#allocation7 + $0xf0] sm:$0xff] }
  0xb0   :  { %2911 = vmatpush1.bf16.msra.mxu0 %v4600_v58  ;;  %617 = vperm.xlu0 %4502, %v464_v7   ;;  %v4594_v57 = vld [vmem:[#allocation5 + $0x1fc] ss:$28 sps:$4 sm:$0xff]   ;;  %v4612_v7 = vld [vmem:[#allocation5 + $0x270] ss:$28 sps:$4 sm:$0xff]  }
  0xb1   :  { %2912 = vmatprep.subr.bf16.mxu0 %v5036_v0  ;;  %4226 = vmatpush1.bf16.msra.mxu1 %v5157_v10  ;;  %v4573_v10 = vld [vmem:[#allocation5 + $0x120] ss:$28 sps:$4 sm:$0xff]   ;;  %v456_v58 = vld [vmem:[#allocation7 + $0x70] sm:$0xff] }
  0xb2   :  { %4211 = vmatprep.subr.bf16.mxu1 %v5036_v0  ;;  %622 = vperm.xlu1 %4503, %v465_v13   ;;  %v492_v13 = vld [vmem:[#allocation7 + $0x190] sm:$0xff] }
  0xb4   :  { %2913 = vmatpush1.bf16.msra.mxu0 %v4613_v61  ;;  %537 = vperm.xlu0 %4502, %v448_v17   ;;  %v4598_v61 = vld [vmem:[#allocation5 + $0x1f8] ss:$28 sps:$4 sm:$0xff]   ;;  %v4618_v17 = vld [vmem:[#allocation5 + $0x2a0] ss:$28 sps:$4 sm:$0xff]  }
  0xb5   :  { %2914 = vmatprep.subr.bf16.mxu0 %v5036_v0  ;;  %4227 = vmatpush1.bf16.msra.mxu1 %v5162_v12  ;;  %v4581_v12 = vld [vmem:[#allocation5 + $0x18c] ss:$28 sps:$4 sm:$0xff]  }
  0xb6   :  { %2383 = vmatmul.mubr.bf16.gmra.mrb[12].mxu1 %v4559_v62  ;;  %2671 = vmatmul.mubr.bf16.gmra.mrb[12].mxu0 %v4560_v63  ;;  %v4599_v62 = vld [vmem:[#allocation5 + $0x200] ss:$28 sps:$4 sm:$0xff]   ;;  %v4601_v63 = vld [vmem:[#allocation5 + $0x234] ss:$28 sps:$4 sm:$0xff]  }
  0xb7   :  { %2390 = vmatprep.mubr.bf16.mxu1 %v4561_v1  ;;  %2678 = vmatprep.mubr.bf16.mxu0 %v4563_v3  ;;  %v4603_v1 = vld [vmem:[#allocation5 + $0x23c] ss:$28 sps:$4 sm:$0xff]   ;;  %v4607_v3 = vld [vmem:[#allocation5 + $0x26c] ss:$28 sps:$4 sm:$0xff]  }
  0xb8   :  { %2915 = vmatpush1.bf16.msra.mxu0 %v4620_v5  ;;  %542 = vperm.xlu1 %4503, %v449_v21   ;;  %v491_v5 = vld [vmem:[#allocation7 + $0x188] sm:$0xff]  ;;  %v4623_v21 = vld [vmem:[#allocation5 + $0x2e4] ss:$28 sps:$4 sm:$0xff]  }
  0xb9   :  { %2916 = vmatprep.subr.bf16.mxu0 %v5036_v0  ;;  %627 = vperm.xlu0 %4502, %v466_v23   ;;  %v494_v23 = vld [vmem:[#allocation7 + $0x1a0] sm:$0xff] }
  0xba   :  { %4212 = vmatprep.subr.bf16.mxu1 %v5036_v0 }
  0xbb   :  { %4228 = vmatpush1.bf16.msra.mxu1 %v5167_v14  ;;  %v471_v14 = vld [vmem:[#allocation7 + $0xe8] sm:$0xff] }
  0xbc   :  { %2917 = vmatpush1.bf16.msra.mxu0 %v4633_v9  ;;  %632 = vperm.xlu1 %4503, %v467_v29   ;;  %v474_v9 = vld [vmem:[#allocation7 + $0x100] sm:$0xff]  ;;  %v4627_v29 = vld [vmem:[#allocation5 + $0x314] ss:$28 sps:$4 sm:$0xff]  }
  0xbd   :  { %2918 = vmatprep.subr.bf16.mxu0 %v5036_v0  ;;  %547 = vperm.xlu0 %4502, %v450_v31   ;;  %v478_v31 = vld [vmem:[#allocation7 + $0x120] sm:$0xff] }
  0xbe   :  { %2391 = vmatmul.mubr.bf16.gmra.mrb[16].mxu1 %v4565_v11  ;;  %2679 = vmatmul.mubr.bf16.gmra.mrb[16].mxu0 %v4566_v8  ;;  %v4713_v11 = vld [vmem:[#allocation2 + $0x178] sm:$0xff]  }
  0xbf   :  { %2398 = vmatprep.mubr.bf16.mxu1 %v4568_v15  ;;  %2686 = vmatprep.mubr.bf16.mxu0 %v4570_v19  ;;  %v475_v8 = vld [vmem:[#allocation7 + $0x108] sm:$0xff]  ;;  %v493_v15 = vld [vmem:[#allocation7 + $0x198] sm:$0xff]  ;;  %v4619_v19 = vld [vmem:[#allocation5 + $0x2a8] ss:$28 sps:$4 sm:$0xff]  }
  0xc0   :  { %2919 = vmatpush1.bf16.msra.mxu0 %v4646_v20  ;;  %552 = vperm.xlu1 %4503, %v451_v36   ;;  %v4621_v20 = vld [vmem:[#allocation5 + $0x2dc] ss:$28 sps:$4 sm:$0xff]  }
  0xc1   :  { %2920 = vmatprep.subr.bf16.mxu0 %v5036_v0  ;;  %637 = vperm.xlu0 %4502, %v468_v37   ;;  %v497_v36 = vld [vmem:[#allocation7 + $0x1b8] sm:$0xff]  ;;  %v4631_v37 = vld [vmem:[#allocation5 + $0x310] ss:$28 sps:$4 sm:$0xff]  }
  0xc2   :  { %4213 = vmatprep.subr.bf16.mxu1 %v5036_v0 }
  0xc3   :  { %4229 = vmatpush1.bf16.msra.mxu1 %v5172_v16  ;;  %v4593_v16 = vld [vmem:[#allocation5 + $0x1c8] ss:$28 sps:$4 sm:$0xff]  }
  0xc4   :  { %2921 = vmatpush1.bf16.msra.mxu0 %v4657_v33  ;;  %642 = vperm.xlu1 %4503, %v469_v41   ;;  %v4629_v33 = vld [vmem:[#allocation5 + $0x31c] ss:$28 sps:$4 sm:$0xff]  }
  0xc5   :  { %2922 = vmatprep.subr.bf16.mxu0 %v5036_v0  ;;  %557 = vperm.xlu0 %4502, %v452_v42   ;;  %v481_v41 = vld [vmem:[#allocation7 + $0x138] sm:$0xff]  ;;  %v498_v42 = vld [vmem:[#allocation7 + $0x1c0] sm:$0xff] }
  0xc6   :  { %2399 = vmatmul.mubr.bf16.gmra.mrb[20].mxu1 %v4572_v25  ;;  %2687 = vmatmul.mubr.bf16.gmra.mrb[20].mxu0 %v4573_v10  ;;  %v495_v25 = vld [vmem:[#allocation7 + $0x1a8] sm:$0xff]  ;;  %v4625_v10 = vld [vmem:[#allocation5 + $0x2d8] ss:$28 sps:$4 sm:$0xff]  }
  0xc7   :  { %2406 = vmatprep.mubr.bf16.mxu1 %v4574_v27  ;;  %2694 = vmatprep.mubr.bf16.mxu0 %v4576_v35  ;;  %v4626_v27 = vld [vmem:[#allocation5 + $0x2e0] ss:$28 sps:$4 sm:$0xff]   ;;  %v496_v35 = vld [vmem:[#allocation7 + $0x1b0] sm:$0xff] }
  0xc8   :  { %2923 = vmatpush1.bf16.msra.mxu0 %v4666_v38  ;;  %562 = vperm.xlu1 %4503, %v453_v44   ;;  %v4632_v38 = vld [vmem:[#allocation5 + $0x318] ss:$28 sps:$4 sm:$0xff]   ;;  %v4638_v44 = vld [vmem:[#allocation5 + $0x348] ss:$28 sps:$4 sm:$0xff]  }
  0xc9   :  { %2924 = vmatprep.subr.bf16.mxu0 %v5036_v0  ;;  %647 = vperm.xlu0 %4502, %v470_v46   ;;  %v482_v46 = vld [vmem:[#allocation7 + $0x140] sm:$0xff] }
  0xca   :  { %4214 = vmatprep.subr.bf16.mxu1 %v5036_v0 }
  0xcb   :  { %4230 = vmatpush1.bf16.msra.mxu1 %v5177_v18  ;;  %v4699_v18 = vld [vmem:[#allocation2 + $0x168] sm:$0xff]  }
  0xcc   :  { %2925 = vmatpush1.bf16.msra.mxu0 %v4679_v45  ;;  %652 = vperm.xlu1 %4503, %v471_v14   ;;  %v4639_v45 = vld [vmem:[#allocation5 + $0x350] ss:$28 sps:$4 sm:$0xff]   ;;  %v500_v14 = vld [vmem:[#allocation7 + $0x1d0] sm:$0xff] }
  0xcd   :  { %2926 = vmatprep.subr.bf16.mxu0 %v5036_v0  ;;  %567 = vperm.xlu0 %4502, %v454_v50   ;;  %v501_v50 = vld [vmem:[#allocation7 + $0x1d8] sm:$0xff] }
  0xce   :  { %2407 = vmatmul.mubr.bf16.gmra.mrb[24].mxu1 %v4578_v39  ;;  %2695 = vmatmul.mubr.bf16.gmra.mrb[24].mxu0 %v4579_v40  ;;  %v4634_v39 = vld [vmem:[#allocation5 + $0x34c] ss:$28 sps:$4 sm:$0xff]   ;;  %v480_v40 = vld [vmem:[#allocation7 + $0x130] sm:$0xff] }
  0xcf   :  { %2414 = vmatprep.mubr.bf16.mxu1 %v4581_v12  ;;  %2702 = vmatprep.mubr.bf16.mxu0 %v4583_v43  ;;  %v4636_v12 = vld [vmem:[#allocation5 + $0x354] ss:$28 sps:$4 sm:$0xff]  }
  0xd0   :  { %2927 = vmatpush1.bf16.msra.mxu0 %v4690_v51  ;;  %572 = vperm.xlu1 %4503, %v455_v53   ;;  %v499_v43 = vld [vmem:[#allocation7 + $0x1c8] sm:$0xff]  ;;  %v4644_v51 = vld [vmem:[#allocation5 + $0x380] ss:$28 sps:$4 sm:$0xff]  }
  0xd1   :  { %2928 = vmatprep.subr.bf16.mxu0 %v5036_v0  ;;  %657 = vperm.xlu0 %4502, %v472_v54   ;;  %v4647_v53 = vld [vmem:[#allocation5 + $0x3bc] ss:$28 sps:$4 sm:$0xff]  }
  0xd2   :  { %4215 = vmatprep.subr.bf16.mxu1 %v5036_v0  ;;  %v484_v54 = vld [vmem:[#allocation7 + $0x150] sm:$0xff] }
  0xd3   :  { %4231 = vmatpush1.bf16.msra.mxu1 %v5182_v22  ;;  %v4605_v22 = vld [vmem:[#allocation5 + $0x230] ss:$28 sps:$4 sm:$0xff]  }
  0xd4   :  { %662 = vperm.xlu1 %4503, %v473_v56   ;;  %4216 = vmatprep.subr.bf16.mxu1 %v5036_v0  ;;  %v485_v56 = vld [vmem:[#allocation7 + $0x158] sm:$0xff] }
  0xd5   :  { %577 = vperm.xlu0 %4502, %v456_v58   ;;  %2929 = vmatpush1.bf16.msra.mxu0 %v4699_v18  ;;  %v4651_v58 = vld [vmem:[#allocation5 + $0x3b8] ss:$28 sps:$4 sm:$0xff]  }
  0xd6   :  { %2415 = vmatmul.mubr.bf16.gmra.mrb[28].mxu1 %v4585_v47  ;;  %2703 = vmatmul.mubr.bf16.gmra.mrb[28].mxu0 %v4586_v48  ;;  %v4640_v47 = vld [vmem:[#allocation5 + $0x384] ss:$28 sps:$4 sm:$0xff]   ;;  %v4642_v48 = vld [vmem:[#allocation5 + $0x38c] ss:$28 sps:$4 sm:$0xff]   ;;  %v4653_v18 = vld [vmem:[#allocation5 + $0x3f4] ss:$28 sps:$4 sm:$0xff]  }
  0xd7   :  { %2422 = vmatprep.mubr.bf16.mxu1 %v4588_v49  ;;  %2710 = vmatprep.mubr.bf16.mxu0 %v4590_v52  ;;  %v483_v49 = vld [vmem:[#allocation7 + $0x148] sm:$0xff]  ;;  %v4645_v52 = vld [vmem:[#allocation5 + $0x388] ss:$28 sps:$4 sm:$0xff]  }
  0xd8   :  { %4232 = vmatpush1.bf16.msra.mxu1 %v5187_v24  ;;  %582 = vperm.xlu1 %4503, %v457_v60   ;;  %v4606_v24 = vld [vmem:[#allocation5 + $0x238] ss:$28 sps:$4 sm:$0xff]   ;;  %v4652_v60 = vld [vmem:[#allocation5 + $0x3c0] ss:$28 sps:$4 sm:$0xff]  }
  0xd9   :  { %2930 = vmatprep.subr.bf16.mxu0 %v5036_v0  ;;  %4217 = vmatprep.subr.bf16.mxu1 %v5036_v0 }
  0xda   :  { %747 = vperm.xlu0 %4502, %v490_v2   ;;  %v4659_v2 = vld [vmem:[#allocation5 + $0x3f8] ss:$28 sps:$4 sm:$0xff]  }
  0xdc   :  { %4233 = vmatpush1.bf16.msra.mxu1 %v5192_v26  ;;  %v4712_v26 = vld [vmem:[#allocation2 + $0x170] sm:$0xff]   ;;  %752 = vperm.xlu1 %4503, %v491_v5   ;;  %v4665_v5 = vld [vmem:[#allocation5 + $0x430] ss:$28 sps:$4 sm:$0xff]  }
  0xdd   :  { %4218 = vmatprep.subr.bf16.mxu1 %v5036_v0  ;;  %2931 = vmatpush1.bf16.msra.mxu0 %v4712_v26  ;;  %v4664_v26 = vld [vmem:[#allocation5 + $0x428] ss:$28 sps:$4 sm:$0xff]  }
  0xde   :  { %2423 = vmatmul.mubr.bf16.gmra.mrb[32].mxu1 %v4592_v55  ;;  %2711 = vmatmul.mubr.bf16.gmra.mrb[32].mxu0 %v4593_v16  ;;  %v4649_v55 = vld [vmem:[#allocation5 + $0x3c4] ss:$28 sps:$4 sm:$0xff]  }
  0xdf   :  { %2430 = vmatprep.mubr.bf16.mxu1 %v4594_v57  ;;  %2718 = vmatprep.mubr.bf16.mxu0 %v4596_v59  ;;  %v502_v16 = vld [vmem:[#allocation7 + $0x1e0] sm:$0xff]  ;;  %v503_v57 = vld [vmem:[#allocation7 + $0x1e8] sm:$0xff] }
  0xe0   :  { %4234 = vmatpush1.bf16.msra.mxu1 %v5197_v28  ;;  %v4614_v28 = vld [vmem:[#allocation5 + $0x2a4] ss:$28 sps:$4 sm:$0xff]   ;;  %2932 = vmatprep.subr.bf16.mxu0 %v5036_v0 }
  0xe1   :  { %4219 = vmatprep.subr.bf16.mxu1 %v5036_v0  ;;  %667 = vperm.xlu0 %4502, %v474_v9   ;;  %v486_v59 = vld [vmem:[#allocation7 + $0x160] sm:$0xff] }
  0xe2   :  { %2933 = vmatpush1.bf16.msra.mxu0 %v4713_v11  ;;  %672 = vperm.xlu1 %4503, %v475_v8   ;;  %v4672_v9 = vld [vmem:[#allocation5 + $0x468] ss:$28 sps:$4 sm:$0xff]   ;;  %v4673_v11 = vld [vmem:[#allocation5 + $0x49c] ss:$28 sps:$4 sm:$0xff]   ;;  %v5264_v8 = vld [vmem:[#allocation2 + $0x180] sm:$0xff]  }
  0xe4   :  { %4235 = vmatpush1.bf16.msra.mxu1 %v5202_v30  ;;  %v4616_v30 = vld [vmem:[#allocation5 + $0x2ac] ss:$28 sps:$4 sm:$0xff]  }
  0xe5   :  { %4220 = vmatprep.subr.bf16.mxu1 %v5036_v0  ;;  %757 = vperm.xlu0 %4502, %v492_v13   ;;  %v4677_v13 = vld [vmem:[#allocation5 + $0x498] ss:$28 sps:$4 sm:$0xff]  }
  0xe6   :  { %2431 = vmatmul.mubr.bf16.gmra.mrb[36].mxu1 %v4598_v61  ;;  %2719 = vmatmul.mubr.bf16.gmra.mrb[36].mxu0 %v4599_v62  ;;  %v4655_v61 = vld [vmem:[#allocation5 + $0x3fc] ss:$28 sps:$4 sm:$0xff]   ;;  %v487_v62 = vld [vmem:[#allocation7 + $0x168] sm:$0xff] }
  0xe7   :  { %2438 = vmatprep.mubr.bf16.mxu1 %v4601_v63  ;;  %2726 = vmatprep.mubr.bf16.mxu0 %v4603_v1  ;;  %v504_v63 = vld [vmem:[#allocation7 + $0x1f0] sm:$0xf]  ;;  %v4658_v1 = vld [vmem:[#allocation5 + $0x3f0] ss:$28 sps:$4 sm:$0xff]  }
  0xe8   :  { %4236 = vmatpush1.bf16.msra.mxu1 %v5207_v32  ;;  %762 = vperm.xlu1 %4503, %v493_v15   ;;  %v476_v32 = vld [vmem:[#allocation7 + $0x110] sm:$0xff]  ;;  %v4678_v15 = vld [vmem:[#allocation5 + $0x4a0] ss:$28 sps:$4 sm:$0xff]  }
  0xe9   :  { %4221 = vmatprep.subr.bf16.mxu1 %v5036_v0  ;;  %677 = vperm.xlu0 %4502, %v476_v32   ;;  %v477_v0 = vld [vmem:[#allocation7 + $0x118] sm:$0xff]  ;;  %v4685_v32 = vld [vmem:[#allocation5 + $0x4d8] ss:$28 sps:$4 sm:$0xff]  }
  0xec   :  { %4237 = vmatpush1.bf16.msra.mxu1 %v5212_v34  ;;  %682 = vperm.xlu1 %4503, %v477_v0   ;;  %v479_v34 = vld [vmem:[#allocation7 + $0x128] sm:$0xff] }
  0xed   :  { %767 = vperm.xlu0 %4502, %v494_v23   ;;  %4138 = vmatprep.subr.bf16.mxu1 %v5264_v8  ;;  %v4688_v0 = vld [vmem:[#allocation5 + $0x514] ss:$28 sps:$4 sm:$0xff]   ;;  %v4691_v23 = vld [vmem:[#allocation5 + $0x508] ss:$28 sps:$4 sm:$0xff]  }
  0xee   :  { %2439 = vmatmul.mubr.bf16.gmra.mrb[40].mxu1 %v4605_v22  ;;  %2727 = vmatmul.mubr.bf16.gmra.mrb[40].mxu0 %v4606_v24  ;;  %v488_v22 = vld [vmem:[#allocation7 + $0x170] sm:$0xff]  ;;  %v4660_v24 = vld [vmem:[#allocation5 + $0x42c] ss:$28 sps:$4 sm:$0xff]  }
  0xef   :  { %2446 = vmatprep.mubr.bf16.mxu1 %v4607_v3  ;;  %2734 = vmatprep.mubr.bf16.mxu0 %v4609_v4  ;;  %v4662_v3 = vld [vmem:[#allocation5 + $0x434] ss:$28 sps:$4 sm:$0xff]   ;;  %v489_v4 = vld [vmem:[#allocation7 + $0x178] sm:$0xff] }
  0xf0   :  { %772 = vperm.xlu1 %4503, %v495_v25   ;;  %v4692_v25 = vld [vmem:[#allocation5 + $0x510] ss:$28 sps:$4 sm:$0xff]  }
  0xf1   :  { %687 = vperm.xlu0 %4502, %v478_v31   ;;  %v4698_v31 = vld [vmem:[#allocation5 + $0x548] ss:$28 sps:$4 sm:$0xff]  }
  0xf4   :  { %692 = vperm.xlu1 %4503, %v479_v34   ;;  %v4702_v34 = vld [vmem:[#allocation5 + $0x584] ss:$28 sps:$4 sm:$0xff]  }
  0xf5   :  { %777 = vperm.xlu0 %4502, %v496_v35   ;;  %v4704_v35 = vld [vmem:[#allocation5 + $0x578] ss:$28 sps:$4 sm:$0xff]  }
  0xf6   :  { %2447 = vmatmul.mubr.bf16.gmra.mrb[44].mxu1 %v4611_v6  ;;  %2735 = vmatmul.mubr.bf16.gmra.mrb[44].mxu0 %v4612_v7  ;;  %v4667_v6 = vld [vmem:[#allocation5 + $0x464] ss:$28 sps:$4 sm:$0xff]   ;;  %v4669_v7 = vld [vmem:[#allocation5 + $0x46c] ss:$28 sps:$4 sm:$0xff]  }
  0xf7   :  { %2454 = vmatprep.mubr.bf16.mxu1 %v4614_v28  ;;  %2742 = vmatprep.mubr.bf16.mxu0 %v4616_v30  ;;  %v4671_v28 = vld [vmem:[#allocation5 + $0x460] ss:$28 sps:$4 sm:$0xff]  }
  0xf8   :  { %782 = vperm.xlu1 %4503, %v497_v36   ;;  %v4675_v30 = vld [vmem:[#allocation5 + $0x4a4] ss:$28 sps:$4 sm:$0xff]  }
  0xf9   :  { %697 = vperm.xlu0 %4502, %v480_v40   ;;  %v4705_v36 = vld [vmem:[#allocation5 + $0x580] ss:$28 sps:$4 sm:$0xff]   ;;  %v4711_v40 = vld [vmem:[#allocation5 + $0x5b8] ss:$28 sps:$4 sm:$0xff]  }
  0xfc   :  { %702 = vperm.xlu1 %4503, %v481_v41   ;;  %v4718_v41 = vld [vmem:[#allocation5 + $0x14] ss:$28 sps:$4 sm:$0xff]  }
  0xfd   :  { %787 = vperm.xlu0 %4502, %v498_v42  }
  0xfe   :  { %2455 = vmatmul.mubr.bf16.gmra.mrb[48].mxu1 %v4618_v17  ;;  %2743 = vmatmul.mubr.bf16.gmra.mrb[48].mxu0 %v4619_v19  ;;  %v4680_v17 = vld [vmem:[#allocation5 + $0x4d4] ss:$28 sps:$4 sm:$0xff]   ;;  %v4682_v19 = vld [vmem:[#allocation5 + $0x4dc] ss:$28 sps:$4 sm:$0xff]  }
  0xff   :  { %2462 = vmatprep.mubr.bf16.mxu1 %v4621_v20  ;;  %2750 = vmatprep.mubr.bf16.mxu0 %v4623_v21  ;;  %v4684_v20 = vld [vmem:[#allocation5 + $0x4d0] ss:$28 sps:$4 sm:$0xff]  }
 0x100   :  { %792 = vperm.xlu1 %4503, %v499_v43   ;;  %v4686_v21 = vld [vmem:[#allocation5 + $0x50c] ss:$28 sps:$4 sm:$0xff]  }
 0x101   :  { %707 = vperm.xlu0 %4502, %v482_v46   ;;  %v4716_v46 = vld [vmem:[#allocation5 + $0x10] ss:$28 sps:$4 sm:$0xff]  }
 0x104   :  { %712 = vperm.xlu1 %4503, %v483_v49   ;;  %v4722_v49 = vld [vmem:[#allocation5 + $0x4c] ss:$28 sps:$4 sm:$0xff]  }
 0x105   :  { %797 = vperm.xlu0 %4502, %v500_v14  }
 0x106   :  { %2463 = vmatmul.mubr.bf16.gmra.mrb[52].mxu1 %v4625_v10  ;;  %2751 = vmatmul.mubr.bf16.gmra.mrb[52].mxu0 %v4626_v27  ;;  %v4693_v10 = vld [vmem:[#allocation5 + $0x544] ss:$28 sps:$4 sm:$0xff]   ;;  %v4695_v27 = vld [vmem:[#allocation5 + $0x54c] ss:$28 sps:$4 sm:$0xff]  }
 0x107   :  { %2470 = vmatprep.mubr.bf16.mxu1 %v4627_v29  ;;  %2758 = vmatprep.mubr.bf16.mxu0 %v4629_v33  ;;  %v4697_v29 = vld [vmem:[#allocation5 + $0x540] ss:$28 sps:$4 sm:$0xff]  }
 0x108   :  { %802 = vperm.xlu1 %4503, %v501_v50   ;;  %v4700_v33 = vld [vmem:[#allocation5 + $0x57c] ss:$28 sps:$4 sm:$0xff]  }
 0x109   :  { %717 = vperm.xlu0 %4502, %v484_v54   ;;  %v4726_v54 = vld [vmem:[#allocation5 + $0x65c] ss:$28 sps:$4 sm:$0xff]  }
 0x10c   :  { %722 = vperm.xlu1 %4503, %v485_v56   ;;  %v4728_v56 = vld [vmem:[#allocation5 + $0x84] ss:$28 sps:$4 sm:$0xff]  }
 0x10d   :  { %807 = vperm.xlu0 %4502, %v502_v16  }
 0x10e   :  { %2471 = vmatmul.mubr.bf16.gmra.mrb[56].mxu1 %v4631_v37  ;;  %2759 = vmatmul.mubr.bf16.gmra.mrb[56].mxu0 %v4632_v38  ;;  %v4706_v37 = vld [vmem:[#allocation5 + $0x5b4] ss:$28 sps:$4 sm:$0xff]   ;;  %v4708_v38 = vld [vmem:[#allocation5 + $0x5bc] ss:$28 sps:$4 sm:$0xff]  }
 0x10f   :  { %2478 = vmatprep.mubr.bf16.mxu1 %v4634_v39  ;;  %2766 = vmatprep.mubr.bf16.mxu0 %v4636_v12  ;;  %v4710_v39 = vld [vmem:[#allocation5 + $0x5b0] ss:$28 sps:$4 sm:$0xff]  }
 0x110   :  { %812 = vperm.xlu1 %4503, %v503_v57   ;;  %v4714_v12 = vld [vmem:[#allocation5 + $0x5ec] ss:$28 sps:$4 sm:$0xff]  }
 0x111   :  { %727 = vperm.xlu0 %4502, %v486_v59  }
 0x114   :  { %732 = vperm.xlu1 %4503, %v487_v62   ;;  %v4734_v62 = vld [vmem:[#allocation5 + $0xbc] ss:$28 sps:$4 sm:$0xff]  }
 0x115   :  { %817 = vperm.xlu0 %4502, %v504_v63   ;;  %v338_v63 = vld [vmem:[#allocation5 + $0x6c8] sm:$0x33] }
 0x116   :  { %2479 = vmatmul.mubr.bf16.gmra.mrb[60].mxu1 %v4638_v44  ;;  %2767 = vmatmul.mubr.bf16.gmra.mrb[60].mxu0 %v4639_v45  ;;  %v4719_v44 = vld [vmem:[#allocation5 + $0x5e8] ss:$28 sps:$4 sm:$0xff]  }
 0x117   :  { %2486 = vmatprep.mubr.bf16.mxu1 %v4640_v47  ;;  %2774 = vmatprep.mubr.bf16.mxu0 %v4642_v48  ;;  %v4720_v47 = vld [vmem:[#allocation5 + $0x624] ss:$28 sps:$4 sm:$0xff]  }
 0x118   :  { %737 = vperm.xlu1 %4503, %v488_v22  }
 0x119   :  { %742 = vperm.xlu0 %4502, %v489_v4   ;;  %v3967_v4 = vcombine.high %v338_v63, %v338_v63 }
 0x11e   :  { %2487 = vmatmul.mubr.bf16.gmra.mrb[64].mxu1 %v4644_v51  ;;  %2775 = vmatmul.mubr.bf16.gmra.mrb[64].mxu0 %v4645_v52  ;;  %v4724_v51 = vld [vmem:[#allocation5 + $0x620] ss:$28 sps:$4 sm:$0xff]  }
 0x11f   :  { %2494 = vmatprep.mubr.bf16.mxu1 %v4647_v53  ;;  %2782 = vmatprep.mubr.bf16.mxu0 %v4649_v55  ;;  %v4725_v53 = vld [vmem:[#allocation5 + $0x48] ss:$28 sps:$4 sm:$0xff]  }
 0x126   :  { %2495 = vmatmul.mubr.bf16.gmra.mrb[68].mxu1 %v4651_v58  ;;  %2783 = vmatmul.mubr.bf16.gmra.mrb[68].mxu0 %v4652_v60  ;;  %v4730_v58 = vld [vmem:[#allocation5 + $0x658] ss:$28 sps:$4 sm:$0xff]   ;;  %v4731_v60 = vld [vmem:[#allocation5 + $0x80] ss:$28 sps:$4 sm:$0xff]  }
 0x127   :  { %2502 = vmatprep.mubr.bf16.mxu1 %v4653_v18  ;;  %2790 = vmatprep.mubr.bf16.mxu0 %v4655_v61  ;;  %v4732_v18 = vld [vmem:[#allocation5 + $0x694] ss:$28 sps:$4 sm:$0xff]  }
 0x12e   :  { %2503 = vmatmul.mubr.bf16.gmra.mrb[72].mxu1 %v4658_v1  ;;  %2791 = vmatmul.mubr.bf16.gmra.mrb[72].mxu0 %v4659_v2  ;;  %v4736_v2 = vld [vmem:[#allocation5 + $0x690] ss:$28 sps:$4 sm:$0xff]  }
 0x12f   :  { %2510 = vmatprep.mubr.bf16.mxu1 %v4660_v24  ;;  %2798 = vmatprep.mubr.bf16.mxu0 %v4662_v3  ;;  %v4737_v3 = vld [vmem:[#allocation5 + $0xb8] ss:$28 sps:$4 sm:$0xff]  }
 0x136   :  { %2511 = vmatmul.mubr.bf16.gmra.mrb[76].mxu1 %v4664_v26  ;;  %2799 = vmatmul.mubr.bf16.gmra.mrb[76].mxu0 %v4665_v5  ;;  %v4739_v5 = vld [vmem:[#allocation5 + $0xf4] ss:$28 sps:$4 sm:$0xff]  }
 0x137   :  { %2518 = vmatprep.mubr.bf16.mxu1 %v4667_v6  ;;  %2806 = vmatprep.mubr.bf16.mxu0 %v4669_v7 }
 0x13e   :  { %2519 = vmatmul.mubr.bf16.gmra.mrb[80].mxu1 %v4671_v28  ;;  %2807 = vmatmul.mubr.bf16.gmra.mrb[80].mxu0 %v4672_v9  ;;  %v3966_v28 = vcombine.low %v338_v63, %v338_v63  ;;  %v4776_v63 = vld [vmem:[#allocation5 + $0x18] ss:$28 sps:$4 sm:$0xff]  }
 0x13f   :  { %2526 = vmatprep.mubr.bf16.mxu1 %v4673_v11  ;;  %2814 = vmatprep.mubr.bf16.mxu0 %v4675_v30  ;;  %v4742_v11 = vld [vmem:[#allocation5 + $0xf0] ss:$28 sps:$4 sm:$0xff]  }
 0x140   :  { %v4745_v30 = vld [vmem:[#allocation5 + $0x5f4] ss:$28 sps:$4 sm:$0xff]  }
 0x146   :  { %2527 = vmatmul.mubr.bf16.gmra.mrb[84].mxu1 %v4677_v13  ;;  %2815 = vmatmul.mubr.bf16.gmra.mrb[84].mxu0 %v4678_v15  ;;  %v4746_v15 = vld [vmem:[#allocation5 + $0x12c] ss:$28 sps:$4 sm:$0xff]  }
 0x147   :  { %2534 = vmatprep.mubr.bf16.mxu1 %v4680_v17  ;;  %2822 = vmatprep.mubr.bf16.mxu0 %v4682_v19 }
 0x14e   :  { %2535 = vmatmul.mubr.bf16.gmra.mrb[88].mxu1 %v4684_v20  ;;  %2823 = vmatmul.mubr.bf16.gmra.mrb[88].mxu0 %v4685_v32  ;;  %v4743_v20 = vld [vmem:[#allocation5 + $0x5f0] ss:$28 sps:$4 sm:$0xff]  }
 0x14f   :  { %2542 = vmatprep.mubr.bf16.mxu1 %v4686_v21  ;;  %2830 = vmatprep.mubr.bf16.mxu0 %v4688_v0  ;;  %v4748_v21 = vld [vmem:[#allocation5 + $0x128] ss:$28 sps:$4 sm:$0xff]  }
 0x150   :  { %v4749_v0 = vld [vmem:[#allocation5 + $0x62c] ss:$28 sps:$4 sm:$0xff]  }
 0x156   :  { %2543 = vmatmul.mubr.bf16.gmra.mrb[92].mxu1 %v4691_v23  ;;  %2831 = vmatmul.mubr.bf16.gmra.mrb[92].mxu0 %v4692_v25  ;;  %v4751_v25 = vld [vmem:[#allocation5 + $0x164] ss:$28 sps:$4 sm:$0xff]  }
 0x157   :  { %2550 = vmatprep.mubr.bf16.mxu1 %v4693_v10  ;;  %2838 = vmatprep.mubr.bf16.mxu0 %v4695_v27  ;;  %v4773_v10 = vld [vmem:[#allocation2 + $0x188] sm:$0xff]  }
 0x15e   :  { %2551 = vmatmul.mubr.bf16.gmra.mrb[96].mxu1 %v4697_v29  ;;  %2839 = vmatmul.mubr.bf16.gmra.mrb[96].mxu0 %v4698_v31  ;;  %v4753_v31 = vld [vmem:[#allocation5 + $0x628] ss:$28 sps:$4 sm:$0xff]  }
 0x15f   :  { %2558 = vmatprep.mubr.bf16.mxu1 %v4700_v33  ;;  %2846 = vmatprep.mubr.bf16.mxu0 %v4702_v34  ;;  %v4754_v34 = vld [vmem:[#allocation5 + $0x160] ss:$28 sps:$4 sm:$0xff]  }
 0x166   :  { %2559 = vmatmul.mubr.bf16.gmra.mrb[100].mxu1 %v4704_v35  ;;  %2847 = vmatmul.mubr.bf16.gmra.mrb[100].mxu0 %v4705_v36  ;;  %v4755_v35 = vld [vmem:[#allocation5 + $0x664] ss:$28 sps:$4 sm:$0xff]  }
 0x167   :  { %2566 = vmatprep.mubr.bf16.mxu1 %v4706_v37  ;;  %2854 = vmatprep.mubr.bf16.mxu0 %v4708_v38  ;;  %v4757_v37 = vld [vmem:[#allocation5 + $0x19c] ss:$28 sps:$4 sm:$0xff]  }
 0x16e   :  { %2567 = vmatmul.mubr.bf16.gmra.mrb[104].mxu1 %v4710_v39  ;;  %2855 = vmatmul.mubr.bf16.gmra.mrb[104].mxu0 %v4711_v40 }
 0x16f   :  { %2574 = vmatprep.mubr.bf16.mxu1 %v4714_v12  ;;  %2934 = vmatprep.mubr.bf16.mxu0 %v4718_v41  ;;  %v4760_v12 = vld [vmem:[#allocation5 + $0x198] ss:$28 sps:$4 sm:$0xff]  }
 0x170   :  { %v4761_v41 = vld [vmem:[#allocation5 + $0x69c] ss:$28 sps:$4 sm:$0xff]  }
 0x171   :  { %v5267_v42 = vpop.f32.mrb[0].mxu1 }
 0x172   :  { %v2362_v43 = vpop.f32.mrb[1].mxu1 }
 0x173   :  { %v5269_v45 = vpop.f32.mrb[2].mxu1 }
 0x174   :  { %v2365_v48 = vpop.f32.mrb[3].mxu1 }
 0x176   :  { %2575 = vmatmul.mubr.bf16.gmra.mrb[108].mxu1 %v4719_v44  ;;  %2935 = vmatmul.mubr.bf16.vlgmr.msra.gmra.mrb[0].mxu0 %v4716_v46  ;;  %v4763_v44 = vld [vmem:[#allocation5 + $0x1d4] ss:$28 sps:$4 sm:$0xff]  }
 0x177   :  { %2582 = vmatprep.mubr.bf16.mxu1 %v4720_v47  ;;  %2942 = vmatprep.mubr.bf16.mxu0 %v4722_v49  ;;  %v339_v46 = vld [vmem:[#allocation5 + $0x6d0] sm:$0x33] }
 0x178   :  { %v4765_v49 = vld [vmem:[#allocation5 + $0x698] ss:$28 sps:$4 sm:$0xff]  }
 0x179   :  { %v5271_v14 = vpop.f32.mrb[4].mxu1 }
 0x17a   :  { %v2370_v50 = vpop.f32.mrb[5].mxu1 }
 0x17b   :  { %v5273_v52 = vpop.f32.mrb[6].mxu1 }
 0x17c   :  { %v2373_v55 = vpop.f32.mrb[7].mxu1 }
 0x17d   :  { %v4768_v55 = vld [vmem:[#allocation5 + $0x20c] ss:$28 sps:$4 sm:$0xff]  }
 0x17e   :  { %2583 = vmatmul.mubr.bf16.gmra.mrb[112].mxu1 %v4724_v51  ;;  %2943 = vmatmul.mubr.bf16.gmra.mrb[4].mxu0 %v4725_v53  ;;  %v4766_v51 = vld [vmem:[#allocation5 + $0x1d0] ss:$28 sps:$4 sm:$0xff]   ;;  %v3969_v53 = vcombine.high %v339_v46, %v339_v46 }
 0x17f   :  { %2590 = vmatprep.mubr.bf16.mxu1 %v4726_v54  ;;  %2950 = vmatprep.mubr.bf16.mxu0 %v4728_v56  ;;  %v3578_v56 = vld [vmem:[#allocation10 + $0x8] sm:$0x3] }
 0x180   :  { %3586 = vperm.xlu0 %4502, %v3578_v56  }
 0x181   :  { %v5275_v16 = vpop.f32.mrb[8].mxu1 }
 0x182   :  { %v2378_v57 = vpop.f32.mrb[9].mxu1 }
 0x183   :  { %v5277_v59 = vpop.f32.mrb[10].mxu1  ;;  %v3577_v57 = vld [vmem:[#allocation10] sm:$0xff] }
 0x184   :  { %v2381_v61 = vpop.f32.mrb[11].mxu1  ;;  %3581 = vperm.xlu1 %4503, %v3577_v57   ;;  %v4798_v57 = vld [vmem:[#allocation5 + $0x210] ss:$28 sps:$4 sm:$0xff]  }
 0x186   :  { %2591 = vmatmul.mubr.bf16.gmra.mrb[116].mxu1 %v4730_v58  ;;  %2951 = vmatmul.mubr.bf16.gmra.mrb[8].mxu0 %v4731_v60 }
 0x187   :  { %2598 = vmatprep.mubr.bf16.mxu1 %v4732_v18  ;;  %2958 = vmatprep.mubr.bf16.mxu0 %v4734_v62  ;;  %v3968_v18 = vcombine.low %v339_v46, %v339_v46  ;;  %v4771_v62 = vld [vmem:[#allocation5 + $0x208] ss:$28 sps:$4 sm:$0xff]  }
 0x189   :  { %v5279_v1 = vpop.f32.mrb[12].mxu1 }
 0x18a   :  { %v2386_v22 = vpop.f32.mrb[13].mxu1 }
 0x18b   :  { %v5281_v24 = vpop.f32.mrb[14].mxu1 }
 0x18c   :  { %v2389_v26 = vpop.f32.mrb[15].mxu1 }
 0x18d   :  { %v4778_v26 = vld [vmem:[#allocation5 + $0x50] ss:$28 sps:$4 sm:$0xff]  }
 0x18e   :  { %2599 = vmatmul.mubr.bf16.gmra.mrb[120].mxu1 %v4736_v2  ;;  %2959 = vmatmul.mubr.bf16.gmra.mrb[12].mxu0 %v4737_v3  ;;  %v4774_v2 = vld [vmem:[#allocation5 + $0x244] ss:$28 sps:$4 sm:$0xff]  }
 0x18f   :  { %2606 = vmatprep.mubr.bf16.mxu1 %v3967_v4  ;;  %2966 = vmatprep.mubr.bf16.mxu0 %v4739_v5 }
 0x191   :  { %v5283_v6 = vpop.f32.mrb[16].mxu1 }
 0x192   :  { %v2394_v7 = vpop.f32.mrb[17].mxu1 }
 0x193   :  { %v5285_v9 = vpop.f32.mrb[18].mxu1  ;;  %v4777_v7 = vld [vmem:[#allocation5 + $0x240] ss:$28 sps:$4 sm:$0xff]  }
 0x194   :  { %v2397_v13 = vpop.f32.mrb[19].mxu1 }
 0x196   :  { %2607 = vmatmul.mubr.bf16.gmra.mrb[124].mxu1 %v3966_v28  ;;  %2967 = vmatmul.mubr.bf16.gmra.mrb[16].mxu0 %v4742_v11  ;;  %v4781_v28 = vld [vmem:[#allocation5 + $0x88] ss:$28 sps:$4 sm:$0xff]  }
 0x197   :  { %2862 = vmatprep.mubr.bf16.mxu1 %v4745_v30  ;;  %2974 = vmatprep.mubr.bf16.mxu0 %v4746_v15  ;;  %v4779_v30 = vld [vmem:[#allocation5 + $0x27c] ss:$28 sps:$4 sm:$0xff]  }
 0x199   :  { %v5287_v17 = vpop.f32.mrb[20].mxu1 }
 0x19a   :  { %v2402_v19 = vpop.f32.mrb[21].mxu1 }
 0x19b   :  { %v5289_v32 = vpop.f32.mrb[22].mxu1  ;;  %v4783_v19 = vld [vmem:[#allocation5 + $0xc0] ss:$28 sps:$4 sm:$0xff]  }
 0x19c   :  { %v2405_v23 = vpop.f32.mrb[23].mxu1 }
 0x19e   :  { %2863 = vmatmul.mubr.bf16.vlgmr.msra.gmra.mrb[108].mxu1 %v4743_v20  ;;  %2975 = vmatmul.mubr.bf16.gmra.mrb[20].mxu0 %v4748_v21  ;;  %v4782_v21 = vld [vmem:[#allocation5 + $0x278] ss:$28 sps:$4 sm:$0xff]  }
 0x19f   :  { %2870 = vmatprep.mubr.bf16.mxu1 %v4749_v0  ;;  %2982 = vmatprep.mubr.bf16.mxu0 %v4751_v25  ;;  %v4786_v0 = vld [vmem:[#allocation5 + $0xf8] ss:$28 sps:$4 sm:$0xff]  }
 0x1a0   :  { %4139 = vmatpush3.bf16.msra.mxu1 %v5264_v8  ;;  %v4759_v8 = vld [vmem:[#allocation5 + $0x660] ss:$28 sps:$4 sm:$0xff]   ;;  %v4784_v25 = vld [vmem:[#allocation5 + $0x2b4] ss:$28 sps:$4 sm:$0xff]  }
 0x1a1   :  { %v5292_v27 = vpop.f32.mrb[24].mxu1  ;;  %4140 = vmatprep.subr.bf16.mxu1 %v4773_v10 }
 0x1a2   :  { %v2410_v29 = vpop.f32.mrb[25].mxu1 }
 0x1a3   :  { %v5294_v33 = vpop.f32.mrb[26].mxu1 }
 0x1a4   :  { %v2413_v36 = vpop.f32.mrb[27].mxu1  ;;  %4141 = vmatpush3.bf16.msra.mxu1 %v4773_v10 }
 0x1a5   :  { %v4791_v36 = vld [vmem:[#allocation5 + $0x168] ss:$28 sps:$4 sm:$0xff]  }
 0x1a6   :  { %2871 = vmatmul.mubr.bf16.gmra.mrb[112].mxu1 %v4753_v31  ;;  %2983 = vmatmul.mubr.bf16.gmra.mrb[24].mxu0 %v4754_v34  ;;  %v4788_v31 = vld [vmem:[#allocation5 + $0x130] ss:$28 sps:$4 sm:$0xff]  }
 0x1a7   :  { %2878 = vmatprep.mubr.bf16.mxu1 %v4755_v35  ;;  %2990 = vmatprep.mubr.bf16.mxu0 %v4757_v37  ;;  %v4787_v35 = vld [vmem:[#allocation5 + $0x2b0] ss:$28 sps:$4 sm:$0xff]  }
 0x1a9   :  { %v5296_v38 = vpop.f32.mrb[28].mxu1 }
 0x1aa   :  { %v2418_v39 = vpop.f32.mrb[29].mxu1 }
 0x1ab   :  { %v5298_v40 = vpop.f32.mrb[30].mxu1  ;;  %v4789_v39 = vld [vmem:[#allocation5 + $0x2ec] ss:$28 sps:$4 sm:$0xff]  }
 0x1ac   :  { %v2421_v43 = vpop.f32.mrb[31].mxu1 }
 0x1ad   :  { %v4793_v43 = vld [vmem:[#allocation5 + $0x1a0] ss:$28 sps:$4 sm:$0xff]  }
 0x1ae   :  { %2879 = vmatmul.mubr.bf16.gmra.mrb[116].mxu1 %v4759_v8  ;;  %2991 = vmatmul.mubr.bf16.gmra.mrb[28].mxu0 %v4760_v12  ;;  %v5325_v8 = vpop.permute.xlu0 %587 }
 0x1af   :  { %2886 = vmatprep.mubr.bf16.mxu1 %v4761_v41  ;;  %2998 = vmatprep.mubr.bf16.mxu0 %v4763_v44 }
 0x1b1   :  { %v5300_v47 = vpop.f32.mrb[32].mxu1 }
 0x1b2   :  { %v2426_v48 = vpop.f32.mrb[33].mxu1  ;;  %v5331_v44 = vpop.permute.xlu0 %592 }
 0x1b3   :  { %v5302_v50 = vpop.f32.mrb[34].mxu1  ;;  %v4792_v48 = vld [vmem:[#allocation5 + $0x2e8] ss:$28 sps:$4 sm:$0xff]  }
 0x1b4   :  { %v2429_v54 = vpop.f32.mrb[35].mxu1 }
 0x1b6   :  { %2887 = vmatmul.mubr.bf16.gmra.mrb[120].mxu1 %v4765_v49  ;;  %2999 = vmatmul.mubr.bf16.gmra.mrb[32].mxu0 %v4766_v51  ;;  %v4796_v49 = vld [vmem:[#allocation5 + $0x1d8] ss:$28 sps:$4 sm:$0xff]   ;;  %v5337_v54 = vpop.permute.xlu0 %597 }
 0x1b7   :  { %2894 = vmatprep.mubr.bf16.mxu1 %v3969_v53  ;;  %3006 = vmatprep.mubr.bf16.mxu0 %v4768_v55  ;;  %v4794_v53 = vld [vmem:[#allocation5 + $0x324] ss:$28 sps:$4 sm:$0xff]  }
 0x1b9   :  { %v5304_v58 = vpop.f32.mrb[36].mxu1 }
 0x1ba   :  { %v2434_v60 = vpop.f32.mrb[37].mxu1 }
 0x1bb   :  { %v5306_v61 = vpop.f32.mrb[38].mxu1 }
 0x1bc   :  { %v2437_v22 = vpop.f32.mrb[39].mxu1 }
 0x1bd   :  { %v4799_v22 = vld [vmem:[#allocation5 + $0x35c] ss:$28 sps:$4 sm:$0xff]  }
 0x1be   :  { %2895 = vmatmul.mubr.bf16.gmra.mrb[128].mxu1 %v3968_v18  ;;  %3007 = vmatmul.mubr.bf16.gmra.mrb[36].mxu0 %v4771_v62  ;;  %v4797_v18 = vld [vmem:[#allocation5 + $0x320] ss:$28 sps:$4 sm:$0xff]   ;;  %v4801_v62 = vld [vmem:[#allocation5 + $0x248] ss:$28 sps:$4 sm:$0xff]  }
 0x1bf   :  { %4142 = vmatprep.mubr.msk.bf16.mxu1 %vm2229_vm0, %v4776_v63  ;;  %3014 = vmatprep.mubr.bf16.mxu0 %v4774_v2  ;;  %v5344_v2 = vpop.permute.xlu0 %517 }
 0x1c1   :  { %v5309_v3 = vpop.f32.mrb[40].mxu1 }
 0x1c2   :  { %v2442_v4 = vpop.f32.mrb[41].mxu1 }
 0x1c3   :  { %v5311_v5 = vpop.f32.mrb[42].mxu1 }
 0x1c4   :  { %v2445_v11 = vpop.f32.mrb[43].mxu1 }
 0x1c5   :  { %v4802_v11 = vld [vmem:[#allocation5 + $0x358] ss:$28 sps:$4 sm:$0xff]  }
 0x1c6   :  { %4143 = vmatmul.mubr.msk.bf16.vlgmr.msra.gmra.mrb[132].mxu1 %vm2229_vm0, %v4778_v26  ;;  %3015 = vmatmul.mubr.bf16.gmra.mrb[40].mxu0 %v4777_v7  ;;  %v4803_v7 = vld [vmem:[#allocation5 + $0x280] ss:$28 sps:$4 sm:$0xff]  }
 0x1c7   :  { %4146 = vmatprep.mubr.msk.bf16.mxu1 %vm2229_vm0, %v4781_v28  ;;  %3022 = vmatprep.mubr.bf16.mxu0 %v4779_v30  ;;  %v4806_v30 = vld [vmem:[#allocation5 + $0x2b8] ss:$28 sps:$4 sm:$0xff]  }
 0x1c9   :  { %v5315_v13 = vpop.f32.mrb[44].mxu1 }
 0x1ca   :  { %v2450_v15 = vpop.f32.mrb[45].mxu1 }
 0x1cb   :  { %v5317_v20 = vpop.f32.mrb[46].mxu1 }
 0x1cc   :  { %v2453_v23 = vpop.f32.mrb[47].mxu1 }
 0x1ce   :  { %4147 = vmatmul.mubr.msk.bf16.gmra.mrb[136].mxu1 %vm2229_vm0, %v4783_v19  ;;  %3023 = vmatmul.mubr.bf16.gmra.mrb[44].mxu0 %v4782_v21  ;;  %v4804_v19 = vld [vmem:[#allocation5 + $0x394] ss:$28 sps:$4 sm:$0xff]   ;;  %v5351_v21 = vpop.permute.xlu0 %607 }
 0x1cf   :  { %4150 = vmatprep.mubr.msk.bf16.mxu1 %vm2229_vm0, %v4786_v0  ;;  %3030 = vmatprep.mubr.bf16.mxu0 %v4784_v25  ;;  %v4808_v25 = vld [vmem:[#allocation5 + $0x2f0] ss:$28 sps:$4 sm:$0xff]  }
 0x1d1   :  { %v5321_v10 = vpop.f32.mrb[48].mxu1 }
 0x1d2   :  { %v2458_v29 = vpop.f32.mrb[49].mxu1 }
 0x1d3   :  { %v5323_v34 = vpop.f32.mrb[50].mxu1  ;;  %v5357_v29 = vpop.permute.xlu0 %527 }
 0x1d4   :  { %v2461_v37 = vpop.f32.mrb[51].mxu1 }
 0x1d6   :  { %4151 = vmatmul.mubr.msk.bf16.gmra.mrb[140].mxu1 %vm2229_vm0, %v4788_v31  ;;  %3031 = vmatmul.mubr.bf16.gmra.mrb[48].mxu0 %v4787_v35  ;;  %v4807_v35 = vld [vmem:[#allocation5 + $0x390] ss:$28 sps:$4 sm:$0xff]  }
 0x1d7   :  { %4154 = vmatprep.mubr.msk.bf16.mxu1 %vm2229_vm0, %v4791_v36  ;;  %3038 = vmatprep.mubr.bf16.mxu0 %v4789_v39  ;;  %v4811_v36 = vld [vmem:[#allocation5 + $0x328] ss:$28 sps:$4 sm:$0xff]  }
 0x1d8   :  { %v4809_v39 = vld [vmem:[#allocation5 + $0x3cc] ss:$28 sps:$4 sm:$0xff]  }
 0x1d9   :  { %v5329_v12 = vpop.f32.mrb[52].mxu1 }
 0x1da   :  { %v2466_v41 = vpop.f32.mrb[53].mxu1 }
 0x1db   :  { %v5333_v46 = vpop.f32.mrb[54].mxu1  ;;  %v5363_v41 = vpop.permute.xlu0 %617 }
 0x1dc   :  { %v2469_v51 = vpop.f32.mrb[55].mxu1 }
 0x1de   :  { %4155 = vmatmul.mubr.msk.bf16.gmra.mrb[144].mxu1 %vm2229_vm0, %v4793_v43  ;;  %3039 = vmatmul.mubr.bf16.gmra.mrb[52].mxu0 %v4792_v48 }
 0x1df   :  { %4158 = vmatprep.mubr.msk.bf16.mxu1 %vm2229_vm0, %v4796_v49  ;;  %3046 = vmatprep.mubr.bf16.mxu0 %v4794_v53  ;;  %v4813_v49 = vld [vmem:[#allocation5 + $0x360] ss:$28 sps:$4 sm:$0xff]   ;;  %v4812_v53 = vld [vmem:[#allocation5 + $0x3c8] ss:$28 sps:$4 sm:$0xff]  }
 0x1e1   :  { %v5339_v55 = vpop.f32.mrb[56].mxu1 }
 0x1e2   :  { %5834 = vst [vmem:[#allocation16_spill] sm:$0xff] %v5339_v55  ;;  %v2474_v56 = vpop.f32.mrb[57].mxu1 }
 0x1e3   :  { %v5341_v60 = vpop.f32.mrb[58].mxu1  ;;  %v4816_v56 = vld [vmem:[#allocation5 + $0x398] ss:$28 sps:$4 sm:$0xff]  }
 0x1e4   :  { %5835 = vst [vmem:[#allocation17_spill] sm:$0xff] %v5341_v60  ;;  %v2477_v63 = vpop.f32.mrb[59].mxu1 }
 0x1e6   :  { %4159 = vmatmul.mubr.msk.bf16.gmra.mrb[148].mxu1 %vm2229_vm0, %v4798_v57  ;;  %3047 = vmatmul.mubr.bf16.gmra.mrb[56].mxu0 %v4797_v18  ;;  %v4814_v18 = vld [vmem:[#allocation5 + $0x404] ss:$28 sps:$4 sm:$0xff]  }
 0x1e7   :  { %4162 = vmatprep.mubr.msk.bf16.mxu1 %vm2229_vm0, %v4801_v62  ;;  %3054 = vmatprep.mubr.bf16.mxu0 %v4799_v22  ;;  %v5370_v62 = vpop.permute.xlu0 %537 }
 0x1e9   :  { %v5347_v4 = vpop.f32.mrb[60].mxu1 }
 0x1ea   :  { %5836 = vst [vmem:[#allocation18_spill] sm:$0xff] %v5347_v4  ;;  %v2482_v26 = vpop.f32.mrb[61].mxu1 }
 0x1eb   :  { %v5349_v28 = vpop.f32.mrb[62].mxu1  ;;  %v4818_v26 = vld [vmem:[#allocation5 + $0x3d0] ss:$28 sps:$4 sm:$0xff]  }
 0x1ec   :  { %5837 = vst [vmem:[#allocation19_spill] sm:$0xff] %v5349_v28  ;;  %v2485_v15 = vpop.f32.mrb[63].mxu1  ;;  %v4845_v28 = vld [vmem:[#allocation5 + $0x58c] ss:$28 sps:$4 sm:$0xff]  }
 0x1ee   :  { %4163 = vmatmul.mubr.msk.bf16.gmra.mrb[152].mxu1 %vm2229_vm0, %v4803_v7  ;;  %3055 = vmatmul.mubr.bf16.gmra.mrb[60].mxu0 %v4802_v11  ;;  %v4817_v11 = vld [vmem:[#allocation5 + $0x400] ss:$28 sps:$4 sm:$0xff]  }
 0x1ef   :  { %4166 = vmatprep.mubr.msk.bf16.mxu1 %vm2229_vm0, %v4806_v30  ;;  %3062 = vmatprep.mubr.bf16.mxu0 %v4804_v19  ;;  %v4821_v30 = vld [vmem:[#allocation5 + $0x408] ss:$28 sps:$4 sm:$0xff]   ;;  %v4819_v19 = vld [vmem:[#allocation5 + $0x43c] ss:$28 sps:$4 sm:$0xff]  }
 0x1f1   :  { %v5355_v0 = vpop.f32.mrb[64].mxu1 }
 0x1f2   :  { %5838 = vst [vmem:[#allocation20_spill] sm:$0xff] %v5355_v0  ;;  %v2490_v23 = vpop.f32.mrb[65].mxu1 }
 0x1f3   :  { %v5359_v31 = vpop.f32.mrb[66].mxu1  ;;  %v5377_v23 = vpop.permute.xlu0 %627 }
 0x1f4   :  { %5839 = vst [vmem:[#allocation21_spill] sm:$0xff] %v5359_v31  ;;  %v2493_v37 = vpop.f32.mrb[67].mxu1  ;;  %v4842_v31 = vld [vmem:[#allocation5 + $0x550] ss:$28 sps:$4 sm:$0xff]  }
 0x1f6   :  { %4167 = vmatmul.mubr.msk.bf16.gmra.mrb[156].mxu1 %vm2229_vm0, %v4808_v25  ;;  %3063 = vmatmul.mubr.bf16.gmra.mrb[64].mxu0 %v4807_v35 }
 0x1f7   :  { %4170 = vmatprep.mubr.msk.bf16.mxu1 %vm2229_vm0, %v4811_v36  ;;  %3070 = vmatprep.mubr.bf16.mxu0 %v4809_v39  ;;  %v4823_v36 = vld [vmem:[#allocation5 + $0x440] ss:$28 sps:$4 sm:$0xff]   ;;  %v5383_v37 = vpop.permute.xlu0 %547 }
 0x1f9   :  { %v5365_v43 = vpop.f32.mrb[68].mxu1 }
 0x1fa   :  { %5840 = vst [vmem:[#allocation22_spill] sm:$0xff] %v5365_v43  ;;  %v2498_v48 = vpop.f32.mrb[69].mxu1  ;;  %v4840_v43 = vld [vmem:[#allocation5 + $0x554] ss:$28 sps:$4 sm:$0xff]  }
 0x1fb   :  { %v5367_v51 = vpop.f32.mrb[70].mxu1  ;;  %v4822_v48 = vld [vmem:[#allocation5 + $0x438] ss:$28 sps:$4 sm:$0xff]  }
 0x1fc   :  { %5841 = vst [vmem:[#allocation23_spill] sm:$0xff] %v5367_v51  ;;  %v2501_v57 = vpop.f32.mrb[71].mxu1 }
 0x1fd   :  { %v5389_v57 = vpop.permute.xlu0 %637 }
 0x1fe   :  { %4171 = vmatmul.mubr.msk.bf16.gmra.mrb[160].mxu1 %vm2229_vm0, %v4813_v49  ;;  %3071 = vmatmul.mubr.bf16.gmra.mrb[68].mxu0 %v4812_v53  ;;  %v4827_v49 = vld [vmem:[#allocation5 + $0x478] ss:$28 sps:$4 sm:$0xff]  }
 0x1ff   :  { %4174 = vmatprep.mubr.msk.bf16.mxu1 %vm2229_vm0, %v4816_v56  ;;  %3078 = vmatprep.mubr.bf16.mxu0 %v4814_v18  ;;  %v4824_v56 = vld [vmem:[#allocation5 + $0x474] ss:$28 sps:$4 sm:$0xff]  }
 0x201   :  { %v5373_v63 = vpop.f32.mrb[72].mxu1 }
 0x202   :  { %5842 = vst [vmem:[#allocation24_spill] sm:$0xff] %v5373_v63  ;;  %v2506_v22 = vpop.f32.mrb[73].mxu1 }
 0x203   :  { %v5375_v7 = vpop.f32.mrb[74].mxu1 }
 0x204   :  { %5843 = vst [vmem:[#allocation25_spill] sm:$0xff] %v5375_v7  ;;  %v2509_v15 = vpop.f32.mrb[75].mxu1  ;;  %v4837_v7 = vld [vmem:[#allocation5 + $0x51c] ss:$28 sps:$4 sm:$0xff]  }
 0x205   :  { %v4835_v15 = vld [vmem:[#allocation5 + $0x4e8] ss:$28 sps:$4 sm:$0xff]  }
 0x206   :  { %4175 = vmatmul.mubr.msk.bf16.gmra.mrb[164].mxu1 %vm2229_vm0, %v4818_v26  ;;  %3079 = vmatmul.mubr.bf16.gmra.mrb[72].mxu0 %v4817_v11  ;;  %v4828_v26 = vld [vmem:[#allocation5 + $0x4b0] ss:$28 sps:$4 sm:$0xff]  }
 0x207   :  { %4178 = vmatprep.mubr.msk.bf16.mxu1 %vm2229_vm0, %v4821_v30  ;;  %3086 = vmatprep.mubr.bf16.mxu0 %v4819_v19  ;;  %v4826_v30 = vld [vmem:[#allocation5 + $0x470] ss:$28 sps:$4 sm:$0xff]  }
 0x209   :  { %v5381_v25 = vpop.f32.mrb[76].mxu1 }
 0x20a   :  { %5844 = vst [vmem:[#allocation26_spill] sm:$0xff] %v5381_v25  ;;  %v2514_v35 = vpop.f32.mrb[77].mxu1 }
 0x20b   :  { %v5385_v39 = vpop.f32.mrb[78].mxu1  ;;  %v4829_v35 = vld [vmem:[#allocation5 + $0x4ac] ss:$28 sps:$4 sm:$0xff]  }
 0x20c   :  { %5845 = vst [vmem:[#allocation27_spill] sm:$0xff] %v5385_v39  ;;  %v2517_v53 = vpop.f32.mrb[79].mxu1  ;;  %v4832_v39 = vld [vmem:[#allocation5 + $0x4e4] ss:$28 sps:$4 sm:$0xff]  }
 0x20d   :  { %v5396_v53 = vpop.permute.xlu0 %557 }
 0x20e   :  { %4179 = vmatmul.mubr.msk.bf16.gmra.mrb[168].mxu1 %vm2229_vm0, %v4823_v36  ;;  %3087 = vmatmul.mubr.bf16.gmra.mrb[76].mxu0 %v4822_v48 }
 0x20f   :  { %4182 = vmatprep.mubr.msk.bf16.mxu1 %vm2229_vm0, %v4827_v49  ;;  %3094 = vmatprep.mubr.bf16.mxu0 %v4824_v56  ;;  %v4836_v49 = vld [vmem:[#allocation5 + $0x520] ss:$28 sps:$4 sm:$0xff]  }
 0x211   :  { %v5391_v18 = vpop.f32.mrb[80].mxu1 }
 0x212   :  { %5846 = vst [vmem:[#allocation28_spill] sm:$0xff] %v5391_v18  ;;  %v2522_v22 = vpop.f32.mrb[81].mxu1 }
 0x213   :  { %v5393_v11 = vpop.f32.mrb[82].mxu1  ;;  %v4831_v22 = vld [vmem:[#allocation5 + $0x4a8] ss:$28 sps:$4 sm:$0xff]  }
 0x214   :  { %5847 = vst [vmem:[#allocation29_spill] sm:$0xff] %v5393_v11  ;;  %v2525_v19 = vpop.f32.mrb[83].mxu1  ;;  %v4843_v11 = vld [vmem:[#allocation5 + $0x558] ss:$28 sps:$4 sm:$0xff]  }
 0x215   :  { %v5403_v19 = vpop.permute.xlu0 %647 }
 0x216   :  { %4183 = vmatmul.mubr.msk.bf16.gmra.mrb[172].mxu1 %vm2229_vm0, %v4828_v26  ;;  %3095 = vmatmul.mubr.bf16.gmra.mrb[80].mxu0 %v4826_v30  ;;  %v5407_v26 = vpop.permute.xlu1 %507 }
 0x217   :  { %4186 = vmatprep.mubr.msk.bf16.mxu1 %vm2229_vm0, %v4835_v15  ;;  %3102 = vmatprep.mubr.bf16.mxu0 %v4829_v35  ;;  %v4844_v35 = vld [vmem:[#allocation5 + $0x590] ss:$28 sps:$4 sm:$0xff]  }
 0x219   :  { %v5399_v36 = vpop.f32.mrb[84].mxu1 }
 0x21a   :  { %5848 = vst [vmem:[#allocation30_spill] sm:$0xff] %v5399_v36  ;;  %v2530_v48 = vpop.f32.mrb[85].mxu1  ;;  %v4851_v36 = vld [vmem:[#allocation5 + $0x5c8] ss:$28 sps:$4 sm:$0xff]   ;;  %v513_v63 = vpop.permute.xlu1 %512 }
 0x21b   :  { %v5401_v56 = vpop.f32.mrb[86].mxu1  ;;  %v5411_v48 = vpop.permute.xlu0 %567 }
 0x21c   :  { %5849 = vst [vmem:[#allocation31_spill] sm:$0xff] %v5401_v56  ;;  %v2533_v18 = vpop.f32.mrb[87].mxu1 }
 0x21d   :  { %v4834_v18 = vld [vmem:[#allocation5 + $0x4e0] ss:$28 sps:$4 sm:$0xff]  }
 0x21e   :  { %4187 = vmatmul.mubr.msk.bf16.gmra.mrb[176].mxu1 %vm2229_vm0, %v4836_v49  ;;  %3103 = vmatmul.mubr.bf16.gmra.mrb[84].mxu0 %v4831_v22  ;;  %v4852_v22 = vld [vmem:[#allocation5 + $0x600] ss:$28 sps:$4 sm:$0xff]   ;;  %v5423_v51 = vpop.permute.xlu1 %602 }
 0x21f   :  { %4190 = vmatprep.mubr.msk.bf16.mxu1 %vm2229_vm0, %v4843_v11  ;;  %3110 = vmatprep.mubr.bf16.mxu0 %v4832_v39  ;;  %v5417_v39 = vpop.permute.xlu0 %657 }
 0x220   :  { %5852 = vst [vmem:[#allocation34_spill] sm:$0xff] %v5417_v39 }
 0x221   :  { %v5409_v30 = vpop.f32.mrb[88].mxu1 }
 0x222   :  { %5850 = vst [vmem:[#allocation32_spill] sm:$0xff] %v5409_v30  ;;  %v2538_v15 = vpop.f32.mrb[89].mxu1  ;;  %v4859_v30 = vld [vmem:[#allocation5 + $0x638] ss:$28 sps:$4 sm:$0xff]  }
 0x223   :  { %v5413_v56 = vpop.f32.mrb[90].mxu1 }
 0x224   :  { %5851 = vst [vmem:[#allocation33_spill] sm:$0xff] %v5413_v56  ;;  %v2541_v25 = vpop.f32.mrb[91].mxu1  ;;  %v4839_v56 = vld [vmem:[#allocation5 + $0x518] ss:$28 sps:$4 sm:$0xff]  }
 0x226   :  { %4191 = vmatmul.mubr.msk.bf16.gmra.mrb[180].mxu1 %vm2229_vm0, %v4844_v35  ;;  %3111 = vmatmul.mubr.bf16.gmra.mrb[88].mxu0 %v4834_v18  ;;  %v5426_v35 = vpop.permute.xlu0 %577 }
 0x227   :  { %4194 = vmatprep.mubr.msk.bf16.mxu1 %vm2229_vm0, %v4851_v36  ;;  %3118 = vmatprep.mubr.bf16.mxu0 %v4837_v7  ;;  %v523_v36 = vpop.permute.xlu1 %522 }
 0x229   :  { %v5419_v11 = vpop.f32.mrb[92].mxu1 }
 0x22a   :  { %5853 = vst [vmem:[#allocation35_spill] sm:$0xff] %v5419_v11  ;;  %v2546_v49 = vpop.f32.mrb[93].mxu1 }
 0x22b   :  { %v5421_v15 = vpop.f32.mrb[94].mxu1  ;;  %v4860_v49 = vld [vmem:[#allocation5 + $0x670] ss:$28 sps:$4 sm:$0xff]  }
 0x22c   :  { %5854 = vst [vmem:[#allocation36_spill] sm:$0xff] %v5421_v15  ;;  %v2549_v25 = vpop.f32.mrb[95].mxu1  ;;  %v5431_v15 = vpop.permute.xlu0 %747 }
 0x22d   :  { %5856 = vst [vmem:[#allocation38_spill] sm:$0xff] %v5431_v15  ;;  %v4867_v25 = vld [vmem:[#allocation5 + $0x6a8] ss:$28 sps:$4 sm:$0xff]  }
 0x22e   :  { %4195 = vmatmul.mubr.msk.bf16.gmra.mrb[184].mxu1 %vm2229_vm0, %v4852_v22  ;;  %3119 = vmatmul.mubr.bf16.gmra.mrb[92].mxu0 %v4839_v56  ;;  %v5437_v56 = vpop.permute.xlu1 %612 }
 0x22f   :  { %4198 = vmatprep.mubr.msk.bf16.mxu1 %vm2229_vm0, %v4859_v30  ;;  %3126 = vmatprep.mubr.bf16.mxu0 %v4840_v43 }
 0x230   :  { %v5439_v43 = vpop.permute.xlu0 %667 }
 0x231   :  { %v5429_v7 = vpop.f32.mrb[96].mxu1  ;;  %5858 = vst [vmem:[#allocation40_spill] sm:$0xff] %v5439_v43 }
 0x232   :  { %5855 = vst [vmem:[#allocation37_spill] sm:$0xff] %v5429_v7  ;;  %v2554_v18 = vpop.f32.mrb[97].mxu1  ;;  %v533_v4 = vpop.permute.xlu1 %532 }
 0x233   :  { %v5433_v11 = vpop.f32.mrb[98].mxu1  ;;  %v4868_v18 = vld [vmem:[#allocation5 + $0x6e0] ss:$0 sps:$4 sm:$0x33]  }
 0x234   :  { %5857 = vst [vmem:[#allocation39_spill] sm:$0xff] %v5433_v11  ;;  %v2557_v0 = vpop.f32.mrb[99].mxu1  ;;  %v4847_v11 = vld [vmem:[#allocation5 + $0x588] ss:$28 sps:$4 sm:$0xff]  }
 0x235   :  { %v4848_v0 = vld [vmem:[#allocation5 + $0x5c4] ss:$28 sps:$4 sm:$0xff]  }
 0x236   :  { %4199 = vmatmul.mubr.msk.bf16.gmra.mrb[188].mxu1 %vm2229_vm0, %v4860_v49  ;;  %3127 = vmatmul.mubr.bf16.gmra.mrb[96].mxu0 %v4842_v31  ;;  %v5446_v31 = vpop.permute.xlu0 %757 }
 0x237   :  { %4202 = vmatprep.mubr.msk.bf16.mxu1 %vm2229_vm0, %v4867_v25  ;;  %3134 = vmatprep.mubr.bf16.mxu0 %v4845_v28  ;;  %5861 = vst [vmem:[#allocation43_spill] sm:$0xff] %v5446_v31  ;;  %v4855_v31 = vld [vmem:[#allocation5 + $0x5f8] ss:$28 sps:$4 sm:$0xff]  }
 0x239   :  { %v5441_v30 = vpop.f32.mrb[100].mxu1 }
 0x23a   :  { %5859 = vst [vmem:[#allocation41_spill] sm:$0xff] %v5441_v30  ;;  %v2562_v22 = vpop.f32.mrb[101].mxu1  ;;  %v4850_v30 = vld [vmem:[#allocation5 + $0x5c0] ss:$28 sps:$4 sm:$0xff]   ;;  %v5454_v39 = vpop.permute.xlu0 %677 }
 0x23b   :  { %v5443_v7 = vpop.f32.mrb[102].mxu1  ;;  %v5452_v22 = vpop.permute.xlu1 %622  ;;  %5864 = vst [vmem:[#allocation46_spill] sm:$0xff] %v5454_v39 }
 0x23c   :  { %5860 = vst [vmem:[#allocation42_spill] sm:$0xff] %v5443_v7  ;;  %v2565_v15 = vpop.f32.mrb[103].mxu1  ;;  %v4853_v7 = vld [vmem:[#allocation5 + $0x5fc] ss:$28 sps:$4 sm:$0xff]  }
 0x23d   :  { %v2361_v15 = vadd.f32 %v5267_v42, %v5407_v26  ;;  %v2369_v42 = vadd.f32 %v5271_v14, %v5344_v2  ;;  %v2377_v14 = vadd.f32 %v5275_v16, %v5357_v29  ;;  %v2385_v16 = vadd.f32 %v5279_v1, %v5370_v62  ;;  %v340_v29 = vld [vmem:[#allocation5 + $0x6d8] sm:$0x33] }
 0x23e   :  { %4203 = vmatmul.mubr.msk.bf16.gmra.mrb[192].mxu1 %vm2229_vm0, %v4868_v18  ;;  %3135 = vmatmul.mubr.bf16.gmra.mrb[100].mxu0 %v4847_v11  ;;  %v2393_v62 = vadd.f32 %v5283_v6, %v5383_v37  ;;  %v2401_v37 = vadd.f32 %v5287_v17, %v5396_v53  ;;  %v2409_v17 = vadd.f32 %v5292_v27, %v5411_v48 }
 0x23f   :  { %3142 = vmatprep.mubr.bf16.mxu0 %v4848_v0  ;;  %v543_v18 = vpop.permute.xlu1 %542  ;;  %v2364_v0 = vadd.f32 %v5269_v45, %v513_v63  ;;  %v2372_v63 = vadd.f32 %v5273_v52, %v523_v36  ;;  %v2380_v52 = vadd.f32 %v5277_v59, %v533_v4  ;;  %v4873_v59 = vld [vmem:[#allocation8 + $0x4] ss:$16 sps:$4 sm:$0x1f]   ;;  %v2417_v27 = vadd.f32 %v5296_v38, %v5426_v35 }
 0x240   :  { %3648 = vmatprep.mubr.bf16.mxu1 %v4873_v59  ;;  %v2425_v38 = vadd.f32 %v5300_v47, %v5325_v8  ;;  %v2433_v8 = vadd.f32 %v5304_v58, %v5337_v54  ;;  %v2441_v58 = vadd.f32 %v5309_v3, %v5351_v21 }
 0x241   :  { %v5448_v49 = vpop.f32.mrb[104].mxu1 }
 0x242   :  { %5862 = vst [vmem:[#allocation44_spill] sm:$0xff] %v5448_v49  ;;  %v2570_v28 = vpop.f32.mrb[105].mxu1  ;;  %v5459_v49 = vpop.permute.xlu0 %767 }
 0x243   :  { %v5450_v25 = vpop.f32.mrb[106].mxu1  ;;  %5865 = vst [vmem:[#allocation47_spill] sm:$0xff] %v5459_v49 }
 0x244   :  { %5863 = vst [vmem:[#allocation45_spill] sm:$0xff] %v5450_v25  ;;  %v2573_v43 = vpop.f32.mrb[107].mxu1 }
 0x245   :  { %v4856_v43 = vld [vmem:[#allocation5 + $0x634] ss:$28 sps:$4 sm:$0xff]  }
 0x246   :  { %3143 = vmatmul.mubr.bf16.gmra.mrb[104].mxu0 %v4850_v30  ;;  %v5469_v26 = vpop.permute.xlu0 %687 }
 0x247   :  { %3150 = vmatprep.mubr.bf16.mxu0 %v4853_v7  ;;  %v5465_v7 = vpop.permute.xlu1 %632 }
 0x249   :  { %v2936_v11 = vpop.f32.mrb[0].mxu0 }
 0x24a   :  { %v5461_v28 = vadd.f32 %v2936_v11, %v2361_v15  ;;  %v2938_v25 = vpop.f32.mrb[1].mxu0  ;;  %v4858_v15 = vld [vmem:[#allocation5 + $0x630] ss:$28 sps:$4 sm:$0xff]   ;;  %v5476_v49 = vpop.permute.xlu0 %777 }
 0x24b   :  { %v2939_v60 = vpop.f32.mrb[2].mxu0  ;;  %5866 = vst [vmem:[#allocation48_spill] sm:$0xff] %v5476_v49 }
 0x24c   :  { %v5463_v55 = vadd.f32 %v2939_v60, %v2364_v0  ;;  %v2941_v39 = vpop.f32.mrb[3].mxu0  ;;  %v4861_v60 = vld [vmem:[#allocation5 + $0x66c] ss:$28 sps:$4 sm:$0xff]  }
 0x24e   :  { %3151 = vmatmul.mubr.bf16.gmra.mrb[108].mxu0 %v4855_v31  ;;  %v553_v31 = vpop.permute.xlu1 %552 }
 0x24f   :  { %3158 = vmatprep.mubr.bf16.mxu0 %v4856_v43 }
 0x251   :  { %v2944_v45 = vpop.f32.mrb[4].mxu0 }
 0x252   :  { %v5472_v30 = vadd.f32 %v2944_v45, %v2369_v42  ;;  %v2946_v25 = vpop.f32.mrb[5].mxu0  ;;  %v4863_v42 = vld [vmem:[#allocation5 + $0x668] ss:$28 sps:$4 sm:$0xff]   ;;  %v5483_v45 = vpop.permute.xlu1 %642 }
 0x253   :  { %v2947_v11 = vpop.f32.mrb[6].mxu0  ;;  %v4864_v25 = vld [vmem:[#allocation5 + $0x6a4] ss:$28 sps:$4 sm:$0xff]  }
 0x254   :  { %v5474_v0 = vadd.f32 %v2947_v11, %v2372_v63  ;;  %v2949_v39 = vpop.f32.mrb[7].mxu0  ;;  %v5485_v11 = vpop.permute.xlu0 %697 }
 0x255   :  { %5867 = vst [vmem:[#allocation49_spill] sm:$0xff] %v5485_v11  ;;  %v4866_v11 = vld [vmem:[#allocation5 + $0x6a0] ss:$28 sps:$4 sm:$0xff]  }
 0x256   :  { %3159 = vmatmul.mubr.bf16.gmra.mrb[112].mxu0 %v4858_v15  ;;  %v563_v4 = vpop.permute.xlu1 %562 }
 0x257   :  { %3166 = vmatprep.mubr.bf16.mxu0 %v4861_v60 }
 0x259   :  { %v2952_v2 = vpop.f32.mrb[8].mxu0 }
 0x25a   :  { %v5481_v36 = vadd.f32 %v2952_v2, %v2377_v14  ;;  %v2954_v43 = vpop.f32.mrb[9].mxu0  ;;  %v2388_v14 = vadd.f32 %v5281_v24, %v543_v18  ;;  %v5492_v2 = vpop.permute.xlu0 %787 }
 0x25b   :  { %v2955_v63 = vpop.f32.mrb[10].mxu0  ;;  %5868 = vst [vmem:[#allocation50_spill] sm:$0xff] %v5492_v2  ;;  %v5498_v1 = vpop.permute.xlu1 %652 }
 0x25c   :  { %v5487_v39 = vadd.f32 %v2955_v63, %v2380_v52  ;;  %v2957_v15 = vpop.f32.mrb[11].mxu0  ;;  %v3971_v63 = vcombine.high %v340_v29, %v340_v29 }
 0x25e   :  { %3167 = vmatmul.mubr.bf16.gmra.mrb[116].mxu0 %v4863_v42  ;;  %v5502_v24 = vpop.permute.xlu0 %707 }
 0x25f   :  { %3174 = vmatprep.mubr.bf16.mxu0 %v4864_v25  ;;  %5869 = vst [vmem:[#allocation51_spill] sm:$0xff] %v5502_v24  ;;  %v573_v6 = vpop.permute.xlu1 %572 }
 0x261   :  { %v2960_v60 = vpop.f32.mrb[12].mxu0 }
 0x262   :  { %v5494_v43 = vadd.f32 %v2960_v60, %v2385_v16  ;;  %v2962_v49 = vpop.f32.mrb[13].mxu0  ;;  %v2396_v16 = vadd.f32 %v5285_v9, %v553_v31  ;;  %v5513_v24 = vpop.permute.xlu0 %797 }
 0x263   :  { %v2963_v52 = vpop.f32.mrb[14].mxu0  ;;  %5870 = vst [vmem:[#allocation52_spill] sm:$0xff] %v5513_v24 }
 0x264   :  { %v5496_v42 = vadd.f32 %v2963_v52, %v2388_v14  ;;  %v2965_v25 = vpop.f32.mrb[15].mxu0  ;;  %v3970_v52 = vcombine.low %v340_v29, %v340_v29 }
 0x266   :  { %3175 = vmatmul.mubr.bf16.gmra.mrb[120].mxu0 %v4866_v11  ;;  %v5528_v53 = vpop.permute.xlu0 %717 }
 0x267   :  { %3182 = vmatprep.mubr.bf16.mxu0 %v3971_v63 }
 0x269   :  { %v5504_v18 = vpop.f32.mrb[124].mxu1  ;;  %v2968_v15 = vpop.f32.mrb[16].mxu0 }
 0x26a   :  { %v2610_v49 = vpop.f32.mrb[125].mxu1  ;;  %v5507_v59 = vadd.f32 %v2968_v15, %v2393_v62  ;;  %v2970_v60 = vpop.f32.mrb[17].mxu0  ;;  %v2404_v62 = vadd.f32 %v5289_v32, %v563_v4 }
 0x26b   :  { %v2611_v14 = vpop.f32.mrb[126].mxu1  ;;  %v2971_v11 = vpop.f32.mrb[18].mxu0 }
 0x26c   :  { %v2612_v25 = vpop.f32.mrb[127].mxu1  ;;  %v5509_v2 = vadd.f32 %v2971_v11, %v2396_v16  ;;  %v2973_v63 = vpop.f32.mrb[19].mxu0 }
 0x26d   :  { %v5524_v25 = vpop.permute.xlu1 %662  ;;  %v5541_v48 = vpop.permute.xlu0 %807 }
 0x26e   :  { %3183 = vmatmul.mubr.bf16.gmra.mrb[124].mxu0 %v3970_v52  ;;  %5873 = vst [vmem:[#allocation55_spill] sm:$0xff] %v5541_v48 }
 0x271   :  { %v5515_v49 = vpop.f32.mrb[108].mxu1  ;;  %v2976_v9 = vpop.f32.mrb[20].mxu0 }
 0x272   :  { %v2866_v31 = vpop.f32.mrb[109].mxu1  ;;  %v5518_v15 = vadd.f32 %v2976_v9, %v2401_v37  ;;  %v2978_v29 = vpop.f32.mrb[21].mxu0  ;;  %v2412_v37 = vadd.f32 %v5294_v33, %v573_v6 }
 0x273   :  { %v5520_v60 = vpop.f32.mrb[110].mxu1  ;;  %v2979_v16 = vpop.f32.mrb[22].mxu0 }
 0x274   :  { %v2869_v14 = vpop.f32.mrb[111].mxu1  ;;  %v5522_v52 = vadd.f32 %v2979_v16, %v2404_v62  ;;  %v2981_v11 = vpop.f32.mrb[23].mxu0 }
 0x275   :  { %v583_v24 = vpop.permute.xlu1 %582 }
 0x276   :  { %v2420_v6 = vadd.f32 %v5298_v40, %v583_v24  ;;  %v2428_v40 = vadd.f32 %v5302_v50, %v5331_v44 }
 0x279   :  { %v5530_v63 = vpop.f32.mrb[112].mxu1  ;;  %v2984_v32 = vpop.f32.mrb[24].mxu0 }
 0x27a   :  { %5871 = vst [vmem:[#allocation53_spill] sm:$0xff] %v5530_v63  ;;  %v2874_v4 = vpop.f32.mrb[113].mxu1  ;;  %v5533_v9 = vadd.f32 %v2984_v32, %v2409_v17  ;;  %v2986_v31 = vpop.f32.mrb[25].mxu0 }
 0x27b   :  { %v5535_v29 = vpop.f32.mrb[114].mxu1  ;;  %v2987_v62 = vpop.f32.mrb[26].mxu0 }
 0x27c   :  { %5872 = vst [vmem:[#allocation54_spill] sm:$0xff] %v5535_v29  ;;  %v2877_v16 = vpop.f32.mrb[115].mxu1  ;;  %v5537_v14 = vadd.f32 %v2987_v62, %v2412_v37  ;;  %v2989_v11 = vpop.f32.mrb[27].mxu0 }
 0x27d   :  { %v5552_v29 = vpop.permute.xlu0 %727 }
 0x281   :  { %v5543_v63 = vpop.f32.mrb[116].mxu1  ;;  %v2992_v4 = vpop.f32.mrb[28].mxu0 }
 0x282   :  { %v2882_v33 = vpop.f32.mrb[117].mxu1  ;;  %v5546_v17 = vadd.f32 %v2992_v4, %v2417_v27  ;;  %v2994_v32 = vpop.f32.mrb[29].mxu0 }
 0x283   :  { %v5548_v31 = vpop.f32.mrb[118].mxu1  ;;  %v2995_v37 = vpop.f32.mrb[30].mxu0 }
 0x284   :  { %v2885_v62 = vpop.f32.mrb[119].mxu1  ;;  %v5550_v16 = vadd.f32 %v2995_v37, %v2420_v6  ;;  %v2997_v11 = vpop.f32.mrb[31].mxu0 }
 0x285   :  { %v818_v37 = vpop.permute.xlu0 %817 }
 0x286   :  { %v2609_v47 = vadd.f32 %v5504_v18, %v818_v37 }
 0x289   :  { %v5556_v35 = vpop.f32.mrb[120].mxu1  ;;  %v3000_v33 = vpop.f32.mrb[32].mxu0 }
 0x28a   :  { %5874 = vst [vmem:[#allocation56_spill] sm:$0xff] %v5556_v35  ;;  %v2890_v48 = vpop.f32.mrb[121].mxu1  ;;  %v5560_v24 = vadd.f32 %v3000_v33, %v2425_v38  ;;  %v3002_v27 = vpop.f32.mrb[33].mxu0  ;;  %v2436_v33 = vadd.f32 %v5306_v61, %v5423_v51  ;;  %v2444_v61 = vadd.f32 %v5311_v5, %v5437_v56  ;;  %v2449_v56 = vadd.f32 %v5315_v13, %v5363_v41 }
 0x28b   :  { %v5562_v4 = vpop.f32.mrb[122].mxu1  ;;  %v3003_v6 = vpop.f32.mrb[34].mxu0 }
 0x28c   :  { %5875 = vst [vmem:[#allocation57_spill] sm:$0xff] %v5562_v4  ;;  %v2893_v32 = vpop.f32.mrb[123].mxu1  ;;  %v5564_v62 = vadd.f32 %v3003_v6, %v2428_v40  ;;  %v3005_v11 = vpop.f32.mrb[35].mxu0 }
 0x28d   :  { %v5569_v48 = vpop.permute.xlu1 %752 }
 0x291   :  { %v2896_v35 = vpop.f32.mrb[128].mxu1  ;;  %v3008_v44 = vpop.f32.mrb[36].mxu0 }
 0x292   :  { %v5571_v50 = vadd.f32 %v2896_v35, %v2609_v47  ;;  %v2898_v38 = vpop.f32.mrb[129].mxu1  ;;  %v5575_v27 = vadd.f32 %v3008_v44, %v2433_v8  ;;  %v3010_v40 = vpop.f32.mrb[37].mxu0 }
 0x293   :  { %v2899_v6 = vpop.f32.mrb[130].mxu1  ;;  %v3011_v32 = vpop.f32.mrb[38].mxu0 }
 0x294   :  { %5876 = vst [vmem:[#allocation58_spill] sm:$0xff] %v5571_v50  ;;  %v2900_v11 = vpop.f32.mrb[131].mxu1  ;;  %v5577_v18 = vadd.f32 %v3011_v32, %v2436_v33  ;;  %v3013_v37 = vpop.f32.mrb[39].mxu0 }
 0x295   :  { %v5581_v54 = vpop.permute.xlu1 %672 }
 0x299   :  { %v4144_v35 = vpop.f32.mrb[132].mxu1  ;;  %v3016_v47 = vpop.f32.mrb[40].mxu0 }
 0x29a   :  { %v3233_v38 = vadd.f32 %v5472_v30, %v4144_v35  ;;  %v3224_v50 = vpop.f32.mrb[133].mxu1  ;;  %v5586_v51 = vadd.f32 %v3016_v47, %v2441_v58  ;;  %v3018_v8 = vpop.f32.mrb[41].mxu0 }
 0x29b   :  { %v3225_v44 = vadd.f32 %v5461_v28, %v3224_v50  ;;  %v4145_v33 = vpop.f32.mrb[134].mxu1  ;;  %v3019_v40 = vpop.f32.mrb[42].mxu0 }
 0x29c   :  { %v3236_v6 = vadd.f32 %v5474_v0, %v4145_v33  ;;  %v3227_v3 = vpop.f32.mrb[135].mxu1  ;;  %v5590_v21 = vadd.f32 %v3019_v40, %v2444_v61  ;;  %v3021_v32 = vpop.f32.mrb[43].mxu0  ;;  %v3480_v30 = vmax.f32 %v3233_v38, 0.0 }
 0x29d   :  { %v3228_v11 = vadd.f32 %v5463_v55, %v3227_v3  ;;  %v3478_v35 = vmax.f32 %v3225_v44, 0.0  ;;  %v5597_v28 = vpop.permute.xlu1 %762  ;;  %v2452_v55 = vadd.f32 %v5317_v20, %v5452_v22  ;;  %v2457_v22 = vadd.f32 %v5321_v10, %v5377_v23 }
 0x29e   :  { %v3481_v37 = vmax.f32 %v3236_v6, 0.0 }
 0x29f   :  { %v3479_v4 = vmax.f32 %v3228_v11, 0.0 }
 0x2a0   :  { %v5593_v5 = vpack.c.bf16 %v3481_v37, %v3480_v30 }
 0x2a1   :  { %v5599_v50 = vpack.c.bf16 %v3479_v4, %v3478_v35  ;;  %v4148_v0 = vpop.f32.mrb[136].mxu1  ;;  %v3024_v58 = vpop.f32.mrb[44].mxu0 }
 0x2a2   :  { %v3249_v47 = vadd.f32 %v5494_v43, %v4148_v0  ;;  %v3240_v61 = vpop.f32.mrb[137].mxu1  ;;  %v5604_v38 = vadd.f32 %v3024_v58, %v2449_v56  ;;  %v3026_v8 = vpop.f32.mrb[45].mxu0 }
 0x2a3   :  { %v3241_v44 = vadd.f32 %v5481_v36, %v3240_v61  ;;  %v4149_v33 = vpop.f32.mrb[138].mxu1  ;;  %v3027_v40 = vpop.f32.mrb[46].mxu0 }
 0x2a4   :  { %v3252_v13 = vadd.f32 %v5496_v42, %v4149_v33  ;;  %v3243_v41 = vpop.f32.mrb[139].mxu1  ;;  %v5608_v4 = vadd.f32 %v3027_v40, %v2452_v55  ;;  %v3029_v6 = vpop.f32.mrb[47].mxu0  ;;  %v3484_v43 = vmax.f32 %v3249_v47, 0.0 }
 0x2a5   :  { %v3244_v3 = vadd.f32 %v5487_v39, %v3243_v41  ;;  %v3482_v11 = vmax.f32 %v3241_v44, 0.0  ;;  %v5615_v36 = vpop.permute.xlu1 %682  ;;  %v2460_v39 = vadd.f32 %v5323_v34, %v5465_v7  ;;  %v2465_v7 = vadd.f32 %v5329_v12, %v5389_v57 }
 0x2a6   :  { %v3485_v32 = vmax.f32 %v3252_v13, 0.0 }
 0x2a7   :  { %v3483_v30 = vmax.f32 %v3244_v3, 0.0 }
 0x2a8   :  { %v5611_v20 = vpack.c.bf16 %v3485_v32, %v3484_v43 }
 0x2a9   :  { %v5617_v37 = vpack.c.bf16 %v3483_v30, %v3482_v11  ;;  %v4152_v42 = vpop.f32.mrb[140].mxu1  ;;  %v3032_v35 = vpop.f32.mrb[48].mxu0 }
 0x2aa   :  { %v3265_v56 = vadd.f32 %v5518_v15, %v4152_v42  ;;  %v3256_v0 = vpop.f32.mrb[141].mxu1  ;;  %v5622_v58 = vadd.f32 %v3032_v35, %v2457_v22  ;;  %v3034_v47 = vpop.f32.mrb[49].mxu0 }
 0x2ab   :  { %v3257_v61 = vadd.f32 %v5507_v59, %v3256_v0  ;;  %v4153_v55 = vpop.f32.mrb[142].mxu1  ;;  %v3035_v8 = vpop.f32.mrb[50].mxu0 }
 0x2ac   :  { %v3268_v10 = vadd.f32 %v5522_v52, %v4153_v55  ;;  %v3259_v23 = vpop.f32.mrb[143].mxu1  ;;  %v5626_v44 = vadd.f32 %v3035_v8, %v2460_v39  ;;  %v3037_v33 = vpop.f32.mrb[51].mxu0  ;;  %v3488_v15 = vmax.f32 %v3265_v56, 0.0 }
 0x2ad   :  { %v3260_v40 = vadd.f32 %v5509_v2, %v3259_v23  ;;  %v3486_v41 = vmax.f32 %v3257_v61, 0.0  ;;  %v5633_v59 = vpop.permute.xlu1 %772  ;;  %v2468_v2 = vadd.f32 %v5333_v46, %v5483_v45  ;;  %v5877_v45 = vld [vmem:[#allocation16_spill] sm:$0xff] }
 0x2ae   :  { %v3489_v13 = vmax.f32 %v3268_v10, 0.0  ;;  %v2473_v10 = vadd.f32 %v5877_v45, %v5403_v19 }
 0x2af   :  { %v3487_v6 = vmax.f32 %v3260_v40, 0.0 }
 0x2b0   :  { %v5629_v34 = vpack.c.bf16 %v3489_v13, %v3488_v15 }
 0x2b1   :  { %v5635_v3 = vpack.c.bf16 %v3487_v6, %v3486_v41  ;;  %v4156_v52 = vpop.f32.mrb[144].mxu1  ;;  %v3040_v43 = vpop.f32.mrb[52].mxu0 }
 0x2b2   :  { %v3281_v32 = vadd.f32 %v5546_v17, %v4156_v52  ;;  %v3272_v11 = vpop.f32.mrb[145].mxu1  ;;  %v5640_v30 = vadd.f32 %v3040_v43, %v2465_v7  ;;  %v3042_v22 = vpop.f32.mrb[53].mxu0 }
 0x2b3   :  { %v3273_v42 = vadd.f32 %v5533_v9, %v3272_v11  ;;  %v4157_v35 = vpop.f32.mrb[146].mxu1  ;;  %v3043_v56 = vpop.f32.mrb[54].mxu0 }
 0x2b4   :  { %v3284_v12 = vadd.f32 %v5550_v16, %v4157_v35  ;;  %v3275_v57 = vpop.f32.mrb[147].mxu1  ;;  %v5644_v0 = vadd.f32 %v3043_v56, %v2468_v2  ;;  %v3045_v39 = vpop.f32.mrb[55].mxu0  ;;  %v3492_v17 = vmax.f32 %v3281_v32, 0.0 }
 0x2b5   :  { %v3276_v47 = vadd.f32 %v5537_v14, %v3275_v57  ;;  %v3490_v55 = vmax.f32 %v3273_v42, 0.0  ;;  %v5651_v9 = vpop.permute.xlu1 %692  ;;  %v5878_v14 = vld [vmem:[#allocation17_spill] sm:$0xff]  ;;  %v5880_v57 = vld [vmem:[#allocation18_spill] sm:$0xff] }
 0x2b6   :  { %v3493_v61 = vmax.f32 %v3284_v12, 0.0  ;;  %v2476_v13 = vadd.f32 %v5878_v14, %v5498_v1  ;;  %v5879_v12 = vld [vmem:[#allocation34_spill] sm:$0xff] }
 0x2b7   :  { %v3491_v8 = vmax.f32 %v3276_v47, 0.0  ;;  %v2481_v39 = vadd.f32 %v5880_v57, %v5879_v12 }
 0x2b8   :  { %v5647_v46 = vpack.c.bf16 %v3493_v61, %v3492_v17 }
 0x2b9   :  { %v5653_v23 = vpack.c.bf16 %v3491_v8, %v3490_v55  ;;  %v4160_v16 = vpop.f32.mrb[148].mxu1  ;;  %v3048_v33 = vpop.f32.mrb[56].mxu0  ;;  %v5881_v8 = vld [vmem:[#allocation19_spill] sm:$0xff] }
 0x2ba   :  { %v3297_v40 = vadd.f32 %v5575_v27, %v4160_v16  ;;  %v3288_v15 = vpop.f32.mrb[149].mxu1  ;;  %v5658_v41 = vadd.f32 %v3048_v33, %v2473_v10  ;;  %v3050_v6 = vpop.f32.mrb[57].mxu0  ;;  %v2484_v45 = vadd.f32 %v5881_v8, %v5524_v25 }
 0x2bb   :  { %v3289_v7 = vadd.f32 %v5560_v24, %v3288_v15  ;;  %v4161_v52 = vpop.f32.mrb[150].mxu1  ;;  %v3051_v43 = vpop.f32.mrb[58].mxu0 }
 0x2bc   :  { %v3300_v19 = vadd.f32 %v5577_v18, %v4161_v52  ;;  %v3291_v32 = vpop.f32.mrb[151].mxu1  ;;  %v5662_v11 = vadd.f32 %v3051_v43, %v2476_v13  ;;  %v3053_v2 = vpop.f32.mrb[59].mxu0  ;;  %v3496_v27 = vmax.f32 %v3297_v40, 0.0 }
 0x2bd   :  { %v3292_v22 = vadd.f32 %v5564_v62, %v3291_v32  ;;  %v3494_v35 = vmax.f32 %v3289_v7, 0.0  ;;  %v5667_v47 = vpop.permute.xlu1 %782  ;;  %v5883_v32 = vld [vmem:[#allocation20_spill] sm:$0xff] }
 0x2be   :  { %v3497_v42 = vmax.f32 %v3300_v19, 0.0 }
 0x2bf   :  { %v3495_v56 = vmax.f32 %v3292_v22, 0.0 }
 0x2c0   :  { %v3554_v1 = vpack.c.bf16 %v3497_v42, %v3496_v27 }
 0x2c1   :  { %v3553_v24 = vpack.c.bf16 %v3495_v56, %v3494_v35  ;;  %v4164_v17 = vpop.f32.mrb[152].mxu1  ;;  %v3056_v61 = vpop.f32.mrb[60].mxu0 }
 0x2c2   :  { %v3313_v18 = vadd.f32 %v5604_v38, %v4164_v17  ;;  %v3304_v55 = vpop.f32.mrb[153].mxu1  ;;  %v4299_v62 = vadd.f32 %v3056_v61, %v2481_v39  ;;  %v3058_v10 = vpop.f32.mrb[61].mxu0 }
 0x2c3   :  { %v3305_v16 = vadd.f32 %v5586_v51, %v3304_v55  ;;  %v4165_v33 = vpop.f32.mrb[154].mxu1  ;;  %4094 = vmatprep.subr.bf16.mxu1 %v3553_v24  ;;  %v3059_v40 = vpop.f32.mrb[62].mxu0  ;;  %v5882_v51 = vld [vmem:[#allocation40_spill] sm:$0xff] }
 0x2c4   :  { %v3316_v15 = vadd.f32 %v5608_v4, %v4165_v33  ;;  %v3307_v14 = vpop.f32.mrb[155].mxu1  ;;  %4095 = vmatpush3.bf16.msra.mxu1 %v5599_v50  ;;  %v4301_v13 = vadd.f32 %v3059_v40, %v2484_v45  ;;  %v3061_v6 = vpop.f32.mrb[63].mxu0  ;;  %v3500_v7 = vmax.f32 %v3313_v18, 0.0  ;;  %v2489_v2 = vadd.f32 %v5883_v32, %v5882_v51 }
 0x2c5   :  { %v3308_v38 = vadd.f32 %v5590_v21, %v3307_v14  ;;  %4096 = vmatprep.subr.bf16.mxu1 %v3554_v1  ;;  %v3498_v25 = vmax.f32 %v3305_v16, 0.0  ;;  %v5679_v22 = vpop.permute.xlu1 %702  ;;  %v5884_v21 = vld [vmem:[#allocation21_spill] sm:$0xff]  ;;  %v5886_v16 = vld [vmem:[#allocation22_spill] sm:$0xff] }
 0x2c6   :  { %v3501_v52 = vmax.f32 %v3316_v15, 0.0  ;;  %v2492_v56 = vadd.f32 %v5884_v21, %v5581_v54 }
 0x2c7   :  { %v3499_v43 = vmax.f32 %v3308_v38, 0.0 }
 0x2c8   :  { %v3556_v19 = vpack.c.bf16 %v3501_v52, %v3500_v7  ;;  %4097 = vmatpush3.bf16.msra.mxu1 %v5593_v5 }
 0x2c9   :  { %v3555_v4 = vpack.c.bf16 %v3499_v43, %v3498_v25  ;;  %v4168_v27 = vpop.f32.mrb[156].mxu1  ;;  %v3064_v50 = vpop.f32.mrb[64].mxu0 }
 0x2ca   :  { %v3329_v42 = vadd.f32 %v5640_v30, %v4168_v27  ;;  %v3320_v35 = vpop.f32.mrb[157].mxu1  ;;  %v4303_v1 = vadd.f32 %v3064_v50, %v2489_v2  ;;  %v3066_v12 = vpop.f32.mrb[65].mxu0 }
 0x2cb   :  { %v3321_v57 = vadd.f32 %v5622_v58, %v3320_v35  ;;  %v4169_v39 = vpop.f32.mrb[158].mxu1  ;;  %4098 = vmatprep.subr.bf16.mxu1 %v3555_v4  ;;  %v3067_v5 = vpop.f32.mrb[66].mxu0  ;;  %v5885_v58 = vld [vmem:[#allocation46_spill] sm:$0xff] }
 0x2cc   :  { %v3332_v24 = vadd.f32 %v5644_v0, %v4169_v39  ;;  %v3323_v17 = vpop.f32.mrb[159].mxu1  ;;  %4099 = vmatpush3.bf16.msra.mxu1 %v5617_v37  ;;  %v4305_v61 = vadd.f32 %v3067_v5, %v2492_v56  ;;  %v3069_v18 = vpop.f32.mrb[67].mxu0  ;;  %v3504_v55 = vmax.f32 %v3329_v42, 0.0  ;;  %v2497_v33 = vadd.f32 %v5886_v16, %v5885_v58  ;;  %v5889_v39 = vld [vmem:[#allocation25_spill] sm:$0xff] }
 0x2cd   :  { %v3324_v30 = vadd.f32 %v5626_v44, %v3323_v17  ;;  %4100 = vmatprep.subr.bf16.mxu1 %v3556_v19  ;;  %v3502_v54 = vmax.f32 %v3321_v57, 0.0  ;;  %v5691_v40 = vpop.permute.xlu1 %792  ;;  %v5887_v44 = vld [vmem:[#allocation23_spill] sm:$0xff] }
 0x2ce   :  { %v3505_v8 = vmax.f32 %v3332_v24, 0.0  ;;  %v2500_v38 = vadd.f32 %v5887_v44, %v5615_v36 }
 0x2cf   :  { %v3503_v45 = vmax.f32 %v3324_v30, 0.0 }
 0x2d0   :  { %v3558_v10 = vpack.c.bf16 %v3505_v8, %v3504_v55  ;;  %4101 = vmatpush3.bf16.msra.mxu1 %v5611_v20 }
 0x2d1   :  { %v3557_v0 = vpack.c.bf16 %v3503_v45, %v3502_v54  ;;  %v4172_v15 = vpop.f32.mrb[160].mxu1  ;;  %v3072_v37 = vpop.f32.mrb[68].mxu0 }
 0x2d2   :  { %v3345_v14 = vadd.f32 %v4299_v62, %v4172_v15  ;;  %v3336_v6 = vpop.f32.mrb[161].mxu1  ;;  %v4307_v7 = vadd.f32 %v3072_v37, %v2497_v33  ;;  %v3074_v52 = vpop.f32.mrb[69].mxu0  ;;  %v4871_v33 = vld [vmem:[#allocation8] ss:$16 sps:$4 sm:$0x1f]  }
 0x2d3   :  { %v3337_v25 = vadd.f32 %v5658_v41, %v3336_v6  ;;  %v4173_v43 = vpop.f32.mrb[162].mxu1  ;;  %4102 = vmatprep.subr.bf16.mxu1 %v3557_v0  ;;  %v3075_v20 = vpop.f32.mrb[70].mxu0  ;;  %v5888_v41 = vld [vmem:[#allocation24_spill] sm:$0xff]  ;;  %v5890_v0 = vld [vmem:[#allocation49_spill] sm:$0xff]  ;;  %v5891_v15 = vld [vmem:[#allocation26_spill] sm:$0xff] }
 0x2d4   :  { %v3348_v19 = vadd.f32 %v4301_v13, %v4173_v43  ;;  %v3339_v51 = vpop.f32.mrb[163].mxu1  ;;  %4103 = vmatpush3.bf16.msra.mxu1 %v5635_v3  ;;  %v4309_v32 = vadd.f32 %v3075_v20, %v2500_v38  ;;  %v3077_v2 = vpop.f32.mrb[71].mxu0  ;;  %v3508_v62 = vmax.f32 %v3345_v14, 0.0  ;;  %v2505_v35 = vadd.f32 %v5888_v41, %v5469_v26  ;;  %v5892_v38 = vld [vmem:[#allocation27_spill] sm:$0xff] }
 0x2d5   :  { %v3340_v4 = vadd.f32 %v5662_v11, %v3339_v51  ;;  %4104 = vmatprep.subr.bf16.mxu1 %v3558_v10  ;;  %v3506_v50 = vmax.f32 %v3337_v25, 0.0  ;;  %v713_v21 = vpop.permute.xlu1 %712  ;;  %v2508_v11 = vadd.f32 %v5889_v39, %v5651_v9  ;;  %v2513_v37 = vadd.f32 %v5891_v15, %v5890_v0  ;;  %v5895_v39 = vld [vmem:[#allocation29_spill] sm:$0xff]  ;;  %v5897_v15 = vld [vmem:[#allocation31_spill] sm:$0xff] }
 0x2d6   :  { %v3509_v27 = vmax.f32 %v3348_v19, 0.0 }
 0x2d7   :  { %v3507_v36 = vmax.f32 %v3340_v4, 0.0 }
 0x2d8   :  { %v3560_v42 = vpack.c.bf16 %v3509_v27, %v3508_v62  ;;  %4105 = vmatpush3.bf16.msra.mxu1 %v5629_v34 }
 0x2d9   :  { %v3559_v13 = vpack.c.bf16 %v3507_v36, %v3506_v50  ;;  %v4176_v56 = vpop.f32.mrb[164].mxu1  ;;  %v3080_v12 = vpop.f32.mrb[72].mxu0  ;;  %v5893_v36 = vld [vmem:[#allocation51_spill] sm:$0xff] }
 0x2da   :  { %v3361_v3 = vadd.f32 %v4307_v7, %v4176_v56  ;;  %v3352_v57 = vpop.f32.mrb[165].mxu1  ;;  %v4311_v5 = vadd.f32 %v3080_v12, %v2505_v35  ;;  %v3082_v24 = vpop.f32.mrb[73].mxu0  ;;  %v2516_v7 = vadd.f32 %v5892_v38, %v5679_v22 }
 0x2db   :  { %v3353_v17 = vadd.f32 %v4303_v1, %v3352_v57  ;;  %v4177_v18 = vpop.f32.mrb[166].mxu1  ;;  %4106 = vmatprep.subr.bf16.mxu1 %v3559_v13  ;;  %v3083_v30 = vpop.f32.mrb[74].mxu0  ;;  %v4874_v1 = vld [vmem:[#allocation8 + $0xc] ss:$16 sps:$4 sm:$0x1f]  }
 0x2dc   :  { %v3364_v55 = vadd.f32 %v4309_v32, %v4177_v18  ;;  %v3355_v34 = vpop.f32.mrb[167].mxu1  ;;  %4107 = vmatpush3.bf16.msra.mxu1 %v5653_v23  ;;  %v4313_v26 = vadd.f32 %v3083_v30, %v2508_v11  ;;  %v3085_v8 = vpop.f32.mrb[75].mxu0  ;;  %v3512_v45 = vmax.f32 %v3361_v3, 0.0  ;;  %v2524_v11 = vadd.f32 %v5895_v39, %v713_v21 }
 0x2dd   :  { %v3356_v54 = vadd.f32 %v4305_v61, %v3355_v34  ;;  %4108 = vmatprep.subr.bf16.mxu1 %v3560_v42  ;;  %v3510_v58 = vmax.f32 %v3353_v17, 0.0  ;;  %v5709_v14 = vpop.permute.xlu1 %802  ;;  %v5894_v42 = vld [vmem:[#allocation28_spill] sm:$0xff] }
 0x2de   :  { %v3513_v10 = vmax.f32 %v3364_v55, 0.0  ;;  %v2521_v41 = vadd.f32 %v5894_v42, %v5893_v36 }
 0x2df   :  { %v3511_v16 = vmax.f32 %v3356_v54, 0.0 }
 0x2e0   :  { %v5704_v9 = vpack.c.bf16 %v3513_v10, %v3512_v45  ;;  %4109 = vmatpush3.bf16.msra.mxu1 %v5647_v46  ;;  %v5896_v45 = vld [vmem:[#allocation30_spill] sm:$0xff] }
 0x2e1   :  { %v5711_v23 = vpack.c.bf16 %v3511_v16, %v3510_v58  ;;  %v4180_v6 = vpop.f32.mrb[168].mxu1  ;;  %v3088_v61 = vpop.f32.mrb[76].mxu0  ;;  %v2529_v10 = vadd.f32 %v5896_v45, %v5528_v53 }
 0x2e2   :  { %v3368_v44 = vpop.f32.mrb[169].mxu1  ;;  %v4315_v52 = vadd.f32 %v3088_v61, %v2513_v37  ;;  %v3090_v25 = vpop.f32.mrb[77].mxu0 }
 0x2e3   :  { %v3369_v43 = vadd.f32 %v4311_v5, %v3368_v44  ;;  %v4181_v20 = vpop.f32.mrb[170].mxu1  ;;  %3649 = vmatmul.mubr.bf16.vlgmr.msra.gmra.mrb[196].mxu1 %v4871_v33  ;;  %v3091_v46 = vpop.f32.mrb[78].mxu0 }
 0x2e4   :  { %v3371_v19 = vpop.f32.mrb[171].mxu1  ;;  %4059 = vmatprep.mubr.msk.bf16.mxu1 %vm3608_vm1, %v4874_v1  ;;  %v3377_v51 = vadd.f32 %v4315_v52, %v4180_v6  ;;  %v4317_v32 = vadd.f32 %v3091_v46, %v2516_v7  ;;  %v3093_v2 = vpop.f32.mrb[79].mxu0 }
 0x2e5   :  { %v3372_v4 = vadd.f32 %v4313_v26, %v3371_v19  ;;  %v3514_v62 = vmax.f32 %v3369_v43, 0.0  ;;  %v723_v35 = vpop.permute.xlu1 %722  ;;  %v5898_v19 = vld [vmem:[#allocation32_spill] sm:$0xff] }
 0x2e6   :  { %v3380_v27 = vadd.f32 %v4317_v32, %v4181_v20  ;;  %v3516_v22 = vmax.f32 %v3377_v51, 0.0  ;;  %v2532_v37 = vadd.f32 %v5897_v15, %v723_v35  ;;  %v2537_v51 = vadd.f32 %v5898_v19, %v5552_v29 }
 0x2e7   :  { %v3515_v50 = vmax.f32 %v3372_v4, 0.0 }
 0x2e8   :  { %v3517_v13 = vmax.f32 %v3380_v27, 0.0 }
 0x2e9   :  { %v5717_v56 = vpack.c.bf16 %v3515_v50, %v3514_v62  ;;  %v4184_v12 = vpop.f32.mrb[172].mxu1  ;;  %v3096_v3 = vpop.f32.mrb[80].mxu0  ;;  %v5899_v50 = vld [vmem:[#allocation33_spill] sm:$0xff] }
 0x2ea   :  { %v3384_v57 = vpop.f32.mrb[173].mxu1  ;;  %v5720_v5 = vpack.c.bf16 %v3517_v13, %v3516_v22  ;;  %v4319_v24 = vadd.f32 %v3096_v3, %v2521_v41  ;;  %v3098_v17 = vpop.f32.mrb[81].mxu0 }
 0x2eb   :  { %v4185_v18 = vpop.f32.mrb[174].mxu1  ;;  %v3099_v30 = vpop.f32.mrb[82].mxu0  ;;  %v5900_v17 = vld [vmem:[#allocation35_spill] sm:$0xff] }
 0x2ec   :  { %v3387_v55 = vpop.f32.mrb[175].mxu1  ;;  %v4321_v34 = vadd.f32 %v3099_v30, %v2524_v11  ;;  %v3385_v26 = vadd.f32 %v4319_v24, %v3384_v57  ;;  %v3101_v8 = vpop.f32.mrb[83].mxu0 }
 0x2ed   :  { %v5724_v58 = vpop.permute.xlu1 %812  ;;  %v743_v24 = vpop.permute.xlu0 %742 }
 0x2ee   :  { %v3388_v54 = vadd.f32 %v4321_v34, %v3387_v55  ;;  %v3518_v16 = vmax.f32 %v3385_v26, 0.0 }
 0x2f0   :  { %v3519_v33 = vmax.f32 %v3388_v54, 0.0  ;;  %v5901_v54 = vld [vmem:[#allocation36_spill] sm:$0xff] }
 0x2f1   :  { %v4188_v1 = vpop.f32.mrb[176].mxu1  ;;  %v3104_v21 = vpop.f32.mrb[84].mxu0  ;;  %v2548_v45 = vadd.f32 %v5901_v54, %v743_v24 }
 0x2f2   :  { %v3400_v0 = vpop.f32.mrb[177].mxu1  ;;  %v5727_v6 = vpack.c.bf16 %v3519_v33, %v3518_v16  ;;  %v4323_v61 = vadd.f32 %v3104_v21, %v2529_v10  ;;  %v3106_v44 = vpop.f32.mrb[85].mxu0 }
 0x2f3   :  { %v4189_v38 = vpop.f32.mrb[178].mxu1  ;;  %v3107_v7 = vpop.f32.mrb[86].mxu0 }
 0x2f4   :  { %v3403_v52 = vpop.f32.mrb[179].mxu1  ;;  %v3393_v25 = vadd.f32 %v4323_v61, %v4184_v12  ;;  %v4325_v43 = vadd.f32 %v3107_v7, %v2532_v37  ;;  %v3109_v20 = vpop.f32.mrb[87].mxu0 }
 0x2f5   :  { %v733_v46 = vpop.permute.xlu1 %732 }
 0x2f6   :  { %v3396_v53 = vadd.f32 %v4325_v43, %v4185_v18  ;;  %v3520_v32 = vmax.f32 %v3393_v25, 0.0  ;;  %v2540_v36 = vadd.f32 %v5899_v50, %v733_v46  ;;  %v5903_v25 = vld [vmem:[#allocation37_spill] sm:$0xff] }
 0x2f8   :  { %v3521_v2 = vmax.f32 %v3396_v53, 0.0 }
 0x2f9   :  { %v5731_v4 = vpop.f32.mrb[180].mxu1  ;;  %v3112_v62 = vpop.f32.mrb[88].mxu0 }
 0x2fa   :  { %v3416_v27 = vpop.f32.mrb[181].mxu1  ;;  %v5734_v42 = vpack.c.bf16 %v3521_v2, %v3520_v32  ;;  %v4327_v41 = vadd.f32 %v3112_v62, %v2537_v51  ;;  %v3114_v35 = vpop.f32.mrb[89].mxu0  ;;  %v5904_v32 = vld [vmem:[#allocation39_spill] sm:$0xff] }
 0x2fb   :  { %v4193_v22 = vpop.f32.mrb[182].mxu1  ;;  %v3115_v13 = vpop.f32.mrb[90].mxu0  ;;  %v2556_v2 = vadd.f32 %v5904_v32, %v5569_v48 }
 0x2fc   :  { %v3419_v12 = vpop.f32.mrb[183].mxu1  ;;  %v4329_v3 = vadd.f32 %v3115_v13, %v2540_v36  ;;  %v3401_v57 = vadd.f32 %v4327_v41, %v3400_v0  ;;  %v3117_v39 = vpop.f32.mrb[91].mxu0 }
 0x2fd   :  { %v738_v11 = vpop.permute.xlu1 %737  ;;  %v5905_v39 = vld [vmem:[#allocation43_spill] sm:$0xff] }
 0x2fe   :  { %v3404_v29 = vadd.f32 %v4329_v3, %v3403_v52  ;;  %v2545_v18 = vadd.f32 %v5900_v17, %v738_v11  ;;  %v3522_v30 = vmax.f32 %v3401_v57, 0.0  ;;  %v5902_v52 = vld [vmem:[#allocation38_spill] sm:$0xff]  ;;  %v5906_v11 = vld [vmem:[#allocation41_spill] sm:$0xff] }
 0x2ff   :  { %v2553_v43 = vadd.f32 %v5903_v25, %v5902_v52  ;;  %v5909_v52 = vld [vmem:[#allocation44_spill] sm:$0xff] }
 0x300   :  { %v3523_v55 = vmax.f32 %v3404_v29, 0.0  ;;  %v2561_v29 = vadd.f32 %v5906_v11, %v5905_v39 }
 0x301   :  { %v5737_v34 = vpop.f32.mrb[184].mxu1  ;;  %v3120_v26 = vpop.f32.mrb[92].mxu0 }
 0x302   :  { %v3432_v8 = vpop.f32.mrb[185].mxu1  ;;  %v5740_v10 = vpack.c.bf16 %v3523_v55, %v3522_v30  ;;  %v4331_v16 = vadd.f32 %v3120_v26, %v2545_v18  ;;  %v3122_v33 = vpop.f32.mrb[93].mxu0  ;;  %v5907_v55 = vld [vmem:[#allocation42_spill] sm:$0xff] }
 0x303   :  { %v5742_v21 = vpop.f32.mrb[186].mxu1  ;;  %v3123_v0 = vpop.f32.mrb[94].mxu0  ;;  %v2564_v26 = vadd.f32 %v5907_v55, %v5597_v28 }
 0x304   :  { %v3435_v15 = vpop.f32.mrb[187].mxu1  ;;  %v3409_v37 = vadd.f32 %v4331_v16, %v4188_v1  ;;  %v4333_v61 = vadd.f32 %v3123_v0, %v2548_v45  ;;  %v3125_v44 = vpop.f32.mrb[95].mxu0 }
 0x306   :  { %v3412_v7 = vadd.f32 %v4333_v61, %v4189_v38  ;;  %v3524_v20 = vmax.f32 %v3409_v37, 0.0 }
 0x308   :  { %v3525_v53 = vmax.f32 %v3412_v7, 0.0  ;;  %v5908_v7 = vld [vmem:[#allocation47_spill] sm:$0xff] }
 0x309   :  { %v5746_v46 = vpop.f32.mrb[188].mxu1  ;;  %v3128_v19 = vpop.f32.mrb[96].mxu0  ;;  %v2569_v25 = vadd.f32 %v5909_v52, %v5908_v7 }
 0x30a   :  { %v5748_v51 = vpop.f32.mrb[189].mxu1  ;;  %v5752_v62 = vpack.c.bf16 %v3525_v53, %v3524_v20  ;;  %v4335_v50 = vadd.f32 %v3128_v19, %v2553_v43  ;;  %v3130_v1 = vpop.f32.mrb[97].mxu0  ;;  %v5910_v53 = vld [vmem:[#allocation45_spill] sm:$0xff] }
 0x30b   :  { %v5754_v36 = vpop.f32.mrb[190].mxu1  ;;  %v3131_v38 = vpop.f32.mrb[98].mxu0  ;;  %v2572_v19 = vadd.f32 %v5910_v53, %v5633_v59  ;;  %v4348_v59 = vadd.f32 %v5520_v60, %v5667_v47  ;;  %v5914_v60 = vld [vmem:[#allocation54_spill] sm:$0xff] }
 0x30c   :  { %v5756_v41 = vpop.f32.mrb[191].mxu1  ;;  %v4337_v35 = vadd.f32 %v3131_v38, %v2556_v2  ;;  %v3417_v13 = vadd.f32 %v4335_v50, %v3416_v27  ;;  %v3133_v3 = vpop.f32.mrb[99].mxu0  ;;  %v4352_v47 = vadd.f32 %v5914_v60, %v5691_v40  ;;  %v4356_v40 = vadd.f32 %v5548_v31, %v5709_v14  ;;  %v5918_v31 = vld [vmem:[#allocation57_spill] sm:$0xff] }
 0x30d   :  { %v4360_v14 = vadd.f32 %v5918_v31, %v5724_v58 }
 0x30e   :  { %v3420_v57 = vadd.f32 %v4337_v35, %v3419_v12  ;;  %v3526_v24 = vmax.f32 %v3417_v13, 0.0 }
 0x310   :  { %v3527_v17 = vmax.f32 %v3420_v57, 0.0 }
 0x311   :  { %v5760_v18 = vpop.f32.mrb[192].mxu1  ;;  %v3136_v48 = vpop.f32.mrb[100].mxu0 }
 0x312   :  { %v5762_v30 = vpop.f32.mrb[193].mxu1  ;;  %v3569_v54 = vpack.c.bf16 %v3527_v17, %v3526_v24  ;;  %v4339_v45 = vadd.f32 %v3136_v48, %v2561_v29  ;;  %v3138_v16 = vpop.f32.mrb[101].mxu0 }
 0x313   :  { %v4205_v33 = vpop.f32.mrb[194].mxu1  ;;  %v3139_v27 = vpop.f32.mrb[102].mxu0 }
 0x314   :  { %v5766_v0 = vpop.f32.mrb[195].mxu1  ;;  %v3425_v12 = vadd.f32 %v4339_v45, %v5731_v4  ;;  %v4341_v37 = vadd.f32 %v3139_v27, %v2564_v26  ;;  %v3141_v61 = vpop.f32.mrb[103].mxu0  ;;  %4116 = vmatprep.subr.bf16.mxu1 %v3569_v54 }
 0x315   :  { %4117 = vmatpush3.bf16.msra.mxu1 %v5711_v23 }
 0x316   :  { %v3428_v44 = vadd.f32 %v4341_v37, %v4193_v22  ;;  %v3528_v43 = vmax.f32 %v3425_v12, 0.0  ;;  %v5911_v22 = vld [vmem:[#allocation48_spill] sm:$0xff] }
 0x317   :  { %v4346_v13 = vadd.f32 %v5515_v49, %v5911_v22  ;;  %v5912_v49 = vld [vmem:[#allocation50_spill] sm:$0xff] }
 0x318   :  { %v3529_v28 = vmax.f32 %v3428_v44, 0.0  ;;  %v5915_v44 = vld [vmem:[#allocation52_spill] sm:$0xff] }
 0x319   :  { %v3144_v20 = vpop.f32.mrb[104].mxu0  ;;  %v4354_v7 = vadd.f32 %v5543_v63, %v5915_v44  ;;  %v5916_v63 = vld [vmem:[#allocation55_spill] sm:$0xff] }
 0x31a   :  { %v4343_v32 = vadd.f32 %v3144_v20, %v2569_v25  ;;  %v3146_v2 = vpop.f32.mrb[105].mxu0  ;;  %v3570_v50 = vpack.c.bf16 %v3529_v28, %v3528_v43 }
 0x31b   :  { %v3147_v1 = vpop.f32.mrb[106].mxu0  ;;  %v5917_v2 = vld [vmem:[#allocation56_spill] sm:$0xff] }
 0x31c   :  { %v4345_v4 = vadd.f32 %v3147_v1, %v2572_v19  ;;  %v3433_v38 = vadd.f32 %v4343_v32, %v3432_v8  ;;  %v3149_v35 = vpop.f32.mrb[107].mxu0  ;;  %4118 = vmatprep.subr.bf16.mxu1 %v3570_v50  ;;  %v4358_v50 = vadd.f32 %v5917_v2, %v5916_v63 }
 0x31d   :  { %4119 = vmatpush3.bf16.msra.mxu1 %v5704_v9 }
 0x31e   :  { %v3436_v23 = vadd.f32 %v4345_v4, %v3435_v15  ;;  %v3530_v3 = vmax.f32 %v3433_v38, 0.0  ;;  %v5913_v15 = vld [vmem:[#allocation53_spill] sm:$0xff] }
 0x31f   :  { %v4350_v26 = vadd.f32 %v5913_v15, %v5912_v49 }
 0x320   :  { %v3531_v57 = vmax.f32 %v3436_v23, 0.0 }
 0x321   :  { %v3152_v39 = vpop.f32.mrb[108].mxu0 }
 0x322   :  { %v3571_v11 = vpack.c.bf16 %v3531_v57, %v3530_v3  ;;  %v4347_v29 = vadd.f32 %v4346_v13, %v3152_v39  ;;  %v3154_v24 = vpop.f32.mrb[109].mxu0 }
 0x323   :  { %v3155_v17 = vpop.f32.mrb[110].mxu0 }
 0x324   :  { %v3441_v8 = vadd.f32 %v4347_v29, %v5737_v34  ;;  %v4349_v48 = vadd.f32 %v4348_v59, %v3155_v17  ;;  %4120 = vmatprep.subr.bf16.mxu1 %v3571_v11  ;;  %v3157_v55 = vpop.f32.mrb[111].mxu0  ;;  %v5919_v29 = vld [vmem:[#allocation58_spill] sm:$0xff] }
 0x325   :  { %4121 = vmatpush3.bf16.msra.mxu1 %v5717_v56 }
 0x326   :  { %v3444_v9 = vadd.f32 %v4349_v48, %v5742_v21  ;;  %v3532_v54 = vmax.f32 %v3441_v8, 0.0 }
 0x328   :  { %v3533_v45 = vmax.f32 %v3444_v9, 0.0 }
 0x329   :  { %v3160_v16 = vpop.f32.mrb[112].mxu0 }
 0x32a   :  { %v4351_v33 = vadd.f32 %v4350_v26, %v3160_v16  ;;  %v3162_v27 = vpop.f32.mrb[113].mxu0  ;;  %v3572_v12 = vpack.c.bf16 %v3533_v45, %v3532_v54 }
 0x32b   :  { %v3163_v34 = vpop.f32.mrb[114].mxu0 }
 0x32c   :  { %v4353_v37 = vadd.f32 %v4352_v47, %v3163_v34  ;;  %v3449_v61 = vadd.f32 %v4351_v33, %v5748_v51  ;;  %4122 = vmatprep.subr.bf16.mxu1 %v3572_v12  ;;  %v3165_v56 = vpop.f32.mrb[115].mxu0  ;;  %v3587_v33 = vpop.permute.xlu0 %3586 }
 0x32d   :  { %4123 = vmatpush3.bf16.msra.mxu1 %v5720_v5 }
 0x32e   :  { %v3452_v21 = vadd.f32 %v4353_v37, %v5756_v41  ;;  %v3534_v52 = vmax.f32 %v3449_v61, 0.0 }
 0x330   :  { %v3535_v25 = vmax.f32 %v3452_v21, 0.0 }
 0x331   :  { %v3168_v43 = vpop.f32.mrb[116].mxu0 }
 0x332   :  { %v3573_v28 = vpack.c.bf16 %v3535_v25, %v3534_v52  ;;  %v4355_v20 = vadd.f32 %v4354_v7, %v3168_v43  ;;  %v3170_v53 = vpop.f32.mrb[117].mxu0 }
 0x333   :  { %v3171_v19 = vpop.f32.mrb[118].mxu0 }
 0x334   :  { %v3457_v51 = vadd.f32 %v4355_v20, %v5746_v46  ;;  %v4357_v32 = vadd.f32 %v4356_v40, %v3171_v19  ;;  %4124 = vmatprep.subr.bf16.mxu1 %v3573_v28  ;;  %v3173_v5 = vpop.f32.mrb[119].mxu0 }
 0x335   :  { %4125 = vmatpush3.bf16.msra.mxu1 %v5727_v6 }
 0x336   :  { %v3460_v41 = vadd.f32 %v4357_v32, %v5754_v36  ;;  %v3536_v1 = vmax.f32 %v3457_v51, 0.0 }
 0x338   :  { %v3537_v4 = vmax.f32 %v3460_v41, 0.0 }
 0x339   :  { %v3176_v38 = vpop.f32.mrb[120].mxu0 }
 0x33a   :  { %v4359_v35 = vadd.f32 %v4358_v50, %v3176_v38  ;;  %v3178_v23 = vpop.f32.mrb[121].mxu0  ;;  %v3574_v22 = vpack.c.bf16 %v3537_v4, %v3536_v1 }
 0x33b   :  { %v3179_v46 = vpop.f32.mrb[122].mxu0 }
 0x33c   :  { %v4361_v13 = vadd.f32 %v4360_v14, %v3179_v46  ;;  %v3465_v3 = vadd.f32 %v4359_v35, %v5762_v30  ;;  %4126 = vmatprep.subr.bf16.mxu1 %v3574_v22  ;;  %v3181_v6 = vpop.f32.mrb[123].mxu0 }
 0x33d   :  { %4127 = vmatpush3.bf16.msra.mxu1 %v5734_v42  ;;  %v4876_v42 = vld [vmem:[#allocation8 + $0x8] ss:$16 sps:$4 sm:$0x1f]  }
 0x33e   :  { %v3468_v36 = vadd.f32 %v4361_v13, %v5766_v0  ;;  %v3538_v57 = vmax.f32 %v3465_v3, 0.0 }
 0x340   :  { %v3539_v39 = vmax.f32 %v3468_v36, 0.0 }
 0x341   :  { %v3184_v59 = vpop.f32.mrb[124].mxu0 }
 0x342   :  { %v3575_v11 = vpack.c.bf16 %v3539_v39, %v3538_v57  ;;  %v3185_v24 = vadd.f32 %v3184_v59, %v5919_v29  ;;  %v3186_v58 = vpop.f32.mrb[125].mxu0 }
 0x343   :  { %v3187_v17 = vpop.f32.mrb[126].mxu0 }
 0x344   :  { %v3473_v8 = vadd.f32 %v5760_v18, %v3185_v24  ;;  %4128 = vmatprep.subr.bf16.mxu1 %v3575_v11  ;;  %v3188_v48 = vpop.f32.mrb[127].mxu0  ;;  %v3582_v18 = vpop.permute.xlu1 %3581 }
 0x345   :  { %4129 = vmatpush3.bf16.msra.mxu1 %v5740_v10 }
 0x346   :  { %v3540_v30 = vmax.f32 %v3473_v8, 0.0 }
 0x348   :  { %v3576_v55 = vpack.c.bf16 %v3540_v30, %v3540_v30 }
 0x34a   :  { %4486 = vmatprep.subr.msk.bf16.mxu1 %vm3612_vm2, %v3576_v55 }
 0x34b   :  { %4131 = vmatpush3.bf16.msra.mxu1 %v5752_v62 }
 0x34e   :  { %3690 = vmatmul.mubr.bf16.vlgmr.msra.gmra.mrb[200].mxu1 %v4876_v42 }
 0x3b6   :  { %v4110_v0 = vpop.f32.mrb[196].mxu1 }
 0x3b7   :  { %v4111_v9 = vpop.f32.mrb[197].mxu1 }
 0x3b8   :  { %v4112_v49 = vadd.f32 %v4111_v9, %v4110_v0  ;;  %v4113_v15 = vpop.f32.mrb[198].mxu1 }
 0x3b9   :  { %v4114_v26 = vpop.f32.mrb[199].mxu1 }
 0x3ba   :  { %v4115_v54 = vadd.f32 %v4114_v26, %v4113_v15  ;;  %v3651_v60 = vadd.f32 %v4112_v49, %v3582_v18 }
 0x3bc   :  { %v3654_v12 = vadd.f32 %v4115_v54, %v3587_v33 }
 0x421   :  { %v4132_v45 = vpop.f32.mrb[200].mxu1 }
 0x422   :  { %v4133_v16 = vpop.f32.mrb[201].mxu1 }
 0x423   :  { %v4134_v47 = vadd.f32 %v4133_v16, %v4132_v45  ;;  %v4135_v10 = vpop.f32.mrb[202].mxu1 }
 0x424   :  { %v4136_v27 = vpop.f32.mrb[203].mxu1 }
 0x425   :  { %v3692_v34 = vadd.f32 %v4134_v47, %v3651_v60  ;;  %v4137_v37 = vadd.f32 %v4136_v27, %v4135_v10 }
 0x427   :  { %v3695_v62 = vadd.f32 %v4137_v37, %v3654_v12  ;;  %v3699_v61 = vsel %vm3698_vm3, %v3692_v34, -inf }
 0x429   :  { %v3701_v56 = vsel %vm3700_vm4, %v3695_v62, -inf }
 0x42a   :  { %v3702_v21 = vmax.f32 %v3699_v61, %v3701_v56 }
 0x42c   :  { %v3703_v44 = vrot.slane %v3702_v21, 4 }
 0x42e   :  { %v3704_v7 = vmax.f32 %v3702_v21, %v3703_v44 }
 0x430   :  { %v3705_v52 = vrot.slane %v3704_v7, 2 }
 0x432   :  { %v3706_v25 = vmax.f32 %v3704_v7, %v3705_v52 }
 0x434   :  { %v3707_v43 = vrot.slane %v3706_v25, 1 }
 0x436   :  { %v3708_v40 = vmax.f32 %v3706_v25, %v3707_v43 }
 0x438   :  { %v3709_v28 = vsub.f32 %v3692_v34, %v3708_v40  ;;  %v3710_v20 = vsub.f32 %v3695_v62, %v3708_v40 }
 0x43a   :  { %v3711_v53 = vmul.f32 1.442695, %v3709_v28  ;;  %v3713_v19 = vmul.f32 1.442695, %v3710_v20 }
 0x43c   :  { %4877 = vpow2.f32 %v3711_v53 }
 0x43d   :  { %4879 = vpow2.f32 %v3713_v19 }
 0x446   :  { %v4878_v51 = vpop.eup %4877 }
 0x447   :  { %v4880_v32 = vpop.eup %4879  ;;  %v3715_v5 = vsel %vm3698_vm3, %v4878_v51, 0.0 }
 0x448   :  { %v3716_v41 = vsel %vm3700_vm4, %v4880_v32, 0.0 }
 0x449   :  { %v3717_v63 = vadd.f32 %v3716_v41, %v3715_v5 }
 0x44b   :  { %v3718_v2 = vrot.slane %v3717_v63, 4 }
 0x44d   :  { %v3719_v50 = vadd.f32 %v3718_v2, %v3717_v63 }
 0x44f   :  { %v3720_v1 = vrot.slane %v3719_v50, 2 }
 0x451   :  { %v3721_v4 = vadd.f32 %v3720_v1, %v3719_v50 }
 0x453   :  { %v3722_v38 = vrot.slane %v3721_v4, 1 }
 0x455   :  { %v3723_v31 = vadd.f32 %v3722_v38, %v3721_v4 }
 0x457   :  { %4881 = vlog2.f32 %v3723_v31 }
 0x461   :  { %v4882_v14 = vpop.eup %4881 }
 0x462   :  { %v3725_v35 = vmul.f32 0.6931472, %v4882_v14 }
 0x464   :  { %v3727_v23 = vsub.f32 %v3710_v20, %v3725_v35  ;;  %v3726_v22 = vsub.f32 %v3709_v28, %v3725_v35 }
 0x466   :  { %3729 = vst.msk [vmem:[#allocation11 + $0x8] sm:$0x3] %vm3700_vm4, %v3727_v23 }
 0x467   :  { %3728 = vst.msk [vmem:[#allocation11] sm:$0xff] %vm3698_vm3, %v3726_v22 }
 0x468   :  { %5004 = shalt.err (!%p5001_p2)
}
 0x469   :  { %s5005_s9 = scalar_lea.hbm %s5833_s5, 256 }
 0x46a   :  { %p5006_p3 = scmp.ne.s32.totalorder %s5833_s5, %s5005_s9  ;;  %p5009_p4 = scmp.lt.u32.totalorder %s5005_s9, %s5833_s5 }
 0x46c   :  { %p5011_p5 = pnand %p5009_p4, %p5006_p3 }
 0x46e   :  { %5014 = shalt.err (!%p5011_p5)
}
 0x46f   :  { %3741 = dma.vmem_to_hbm [thread:$0]  %s3736_s30, 256, %s5833_s5, [#allocation4], %s5033_s0, %s5033_s0, %s5034_s17  }
 0x470   :  { %5021 = dma.done.wait [#allocation4], 256  }
 0x471   :  { %5022 = vsyncadd [#allocation4], 4294967040 }
 0x472   :  { %3745 = vsyncpa [#allocation3], 1 }
 0x473   :  { %3746 = vsyncpa [#allocation6], 1 }
 0x474   :  { %3747 = vsyncpa [#allocation9], 1 }
 0x475   :  { %3748 = vsyncpa [#allocation4], 1 }

</bundles_post_ra>
